<compile_context>
chip_gen: v7x
topology: tpu7x:2x2x1
jax: 0.10.0
libtpu: 0.0.40
codegen_flags: <defaults>
</compile_context>

<pallas_src>
import math

import jax
import jax.numpy as jnp
from jax.experimental import pallas as pl
from jax.experimental.pallas import tpu as pltpu

HIDDEN = 512
NEG_SLOPE = 0.01  # torch nn.LeakyReLU() default
LANE = 128
DEFAULT_VMEM_LIMIT = 48 * 1024 * 1024  # < v7x 64 MiB physical; ample for tile<=1024


def _leaky_relu(x):
    # max(x, a*x) == LeakyReLU for 0 < a < 1: mul+max instead of cmp+mul+select.
    return jnp.maximum(x, NEG_SLOPE * x)


def _round_up(a, m):
    return (a + m - 1) // m * m


def rnd_kernel(x_ref,
               w01, b01,                      # fused predictor/target layer 0
               pw1, pb1, pw2, pb2, pw3, pb3,  # predictor hidden layers
               pw4, pb4,                      # predictor output layer (lane-padded)
               tw1, tb1,                      # target hidden layer
               tw2, tb2,                      # target output layer (lane-padded)
               pred_ref, targ_ref):
    # x arrives f32 straight from HBM; cast to bf16 in-kernel (VALU has slack)
    # so the MXU runs the fast bf16 path with f32 accumulation.
    x = x_ref[...].astype(jnp.bfloat16)

    def linear(h, w_ref, b_ref):
        # bf16 x bf16 -> f32 accumulate on the MXU, f32 bias add on the VPU.
        return jnp.dot(h, w_ref[...],
                       preferred_element_type=jnp.float32) + b_ref[...]

    # Shared layer 0: one (in, 2*HIDDEN) matmul feeds both networks.
    h01 = _leaky_relu(linear(x, w01, b01))           # (bt, 1024) f32
    h = h01[:, :HIDDEN].astype(jnp.bfloat16)         # predictor branch
    t = h01[:, HIDDEN:].astype(jnp.bfloat16)         # target branch

    # Predictor: 3 more hidden layers + output layer.
    h = _leaky_relu(linear(h, pw1, pb1)).astype(jnp.bfloat16)
    h = _leaky_relu(linear(h, pw2, pb2)).astype(jnp.bfloat16)
    h = _leaky_relu(linear(h, pw3, pb3)).astype(jnp.bfloat16)
    pred_ref[...] = linear(h, pw4, pb4).astype(pred_ref.dtype)

    # Target: 1 more hidden layer + output layer.
    t = _leaky_relu(linear(t, tw1, tb1)).astype(jnp.bfloat16)
    targ_ref[...] = linear(t, tw2, tb2).astype(targ_ref.dtype)


def prepare_rnd_weights(params):
    """One-time weight preparation. Call at init and CACHE the result.

    Fuses the two layer-0 weights into one (in, 2*HIDDEN) slab, casts weights
    to bf16 (biases stay f32), and zero-pads the two output layers to a
    lane-dense multiple of 128 so the kernel's final stores are unmasked vst.
    Keeping this out of the per-call path removes ~3x redundant weight HBM
    traffic on the small-batch rollout path.

    Note: bf16 weights (incl. the frozen target net) approximate the f32
    torch function to ~1e-2 relative; keep the target net f32 if exact
    cross-framework parity is required.
    """
    (pw0, pb0), (pw1, pb1), (pw2, pb2), (pw3, pb3), (pw4, pb4), \
        (tw0, tb0), (tw1, tb1), (tw2, tb2) = params

    in_size = pw0.shape[0]
    out_size = pw4.shape[1]
    out_pad = _round_up(out_size, LANE)

    wcast = lambda w: w.astype(jnp.bfloat16)
    bcast = lambda b: b.astype(jnp.float32)

    def pad_out(w, b):
        out = w.shape[1]
        if out < out_pad:
            w = jnp.pad(w, ((0, 0), (0, out_pad - out)))
            b = jnp.pad(b, ((0, 0), (0, out_pad - out)))
        return wcast(w), bcast(b)

    w01 = wcast(jnp.concatenate([pw0, tw0], axis=1))   # (in, 2*HIDDEN)
    b01 = bcast(jnp.concatenate([pb0, tb0], axis=1))   # (1, 2*HIDDEN)
    pw4p, pb4p = pad_out(pw4, pb4)
    tw2p, tb2p = pad_out(tw2, tb2)

    flat_w = [w01, b01,
              wcast(pw1), bcast(pb1), wcast(pw2), bcast(pb2),
              wcast(pw3), bcast(pb3), pw4p, pb4p,
              wcast(tw1), bcast(tb1), tw2p, tb2p]
    return {"weights": flat_w, "in_size": in_size,
            "out_size": out_size, "out_pad": out_pad}


def _default_batch_tile(B):
    # >=128 rows fills MXU rows; aim for >=2 grid steps (feeds both v7x
    # TensorCores, amortizes ~0.35us/step overhead on v6e); cap at 512 rows so
    # live f32 activations stay a few MiB, well inside the 48 MiB VMEM limit.
    half = _round_up(pl.cdiv(B, 2), LANE)
    return max(8, min(512, half, _round_up(B, 8)))


def rnd_forward(x, prepared, *, batch_tile=None,
                vmem_limit_bytes=DEFAULT_VMEM_LIMIT):
    """x: (B, input_size) float32.  prepared: output of prepare_rnd_weights()
    (cache it at init; a raw 8-(w,b)-pair list is also accepted, but then the
    prep re-runs every call).  Returns (predict_feature, target_feature),
    each (B, output_size) float32."""
    if not isinstance(prepared, dict):
        prepared = prepare_rnd_weights(prepared)

    B, in_size = x.shape
    assert in_size == prepared["in_size"]
    out_size, out_pad = prepared["out_size"], prepared["out_pad"]
    flat_w = prepared["weights"]

    if batch_tile is None:
        batch_tile = _default_batch_tile(B)
    batch_tile = _round_up(batch_tile, 8)
    grid = (pl.cdiv(B, batch_tile),)   # ragged last block handled by Pallas

    in_specs = [pl.BlockSpec((batch_tile, in_size), lambda i: (i, 0))]
    for w in flat_w:
        # Constant index_map: same block every grid step -> fetched once.
        in_specs.append(pl.BlockSpec(w.shape, lambda i: (0, 0)))

    out_shape = (jax.ShapeDtypeStruct((B, out_pad), jnp.float32),
                 jax.ShapeDtypeStruct((B, out_pad), jnp.float32))
    out_specs = (pl.BlockSpec((batch_tile, out_pad), lambda i: (i, 0)),
                 pl.BlockSpec((batch_tile, out_pad), lambda i: (i, 0)))

    pred, targ = pl.pallas_call(
        rnd_kernel,
        out_shape=out_shape,
        grid_spec=pltpu.PrefetchScalarGridSpec(
            num_scalar_prefetch=0,
            grid=grid,
            in_specs=in_specs,
            out_specs=out_specs,
        ),
        compiler_params=pltpu.CompilerParams(
            dimension_semantics=("parallel",),
            vmem_limit_bytes=vmem_limit_bytes,
        ),
    )(x, *flat_w)

    # Slice off lane-padded output columns (rows are exact: out_shape has B rows).
    return pred[:, :out_size], targ[:, :out_size]


def _orthogonal(key, rows, cols, gain):
    init = jax.nn.initializers.orthogonal(scale=gain)
    return init(key, (rows, cols), jnp.float32)


def make_params(key, input_size, output_size):
    """(w, b) pairs, predictor first then target.  Torch stores Linear weights
    as (out, in); init that orthogonally (gain sqrt(2)) then transpose to
    (in, out).  Biases are zero, as in the module."""
    gain = math.sqrt(2.0)
    layer_dims = [
        # predictor
        (input_size, HIDDEN), (HIDDEN, HIDDEN), (HIDDEN, HIDDEN),
        (HIDDEN, HIDDEN), (HIDDEN, output_size),
        # target
        (input_size, HIDDEN), (HIDDEN, HIDDEN), (HIDDEN, output_size),
    ]
    keys = jax.random.split(key, len(layer_dims))
    params = []
    for k, (din, dout) in zip(keys, layer_dims):
        w = jnp.transpose(_orthogonal(k, dout, din, gain))  # (in, out)
        b = jnp.zeros((1, dout), jnp.float32)
        params.append((w, b))
    return params


def rnd_reference(x, params):
    """Pure-JAX reference following the same bf16-weight / f32-accumulate
    numeric path as the kernel (but unfused and unpadded)."""
    def mlp(h, layers):
        n = len(layers)
        h = h.astype(jnp.bfloat16)
        for i, (w, b) in enumerate(layers):
            acc = jnp.dot(h, w.astype(jnp.bfloat16),
                          preferred_element_type=jnp.float32) + b
            if i < n - 1:
                h = _leaky_relu(acc).astype(jnp.bfloat16)
            else:
                h = acc
        return h
    pred = mlp(x, params[:5])
    targ = mlp(x, params[5:])
    return pred, targ


if __name__ == "__main__":
    INPUT_SIZE = 32
    OUTPUT_SIZE = 32
    BATCH = 8

    key = jax.random.PRNGKey(0)
    k_x, k_p = jax.random.split(key)
    x = jax.random.normal(k_x, (BATCH, INPUT_SIZE), jnp.float32)
    params = make_params(k_p, INPUT_SIZE, OUTPUT_SIZE)

    # Prepare (fuse/cast/pad) weights ONCE; reuse `prepared` for every forward.
    prepared = prepare_rnd_weights(params)

    pred, targ = rnd_forward(x, prepared)
    pred = jax.block_until_ready(pred)
    targ = jax.block_until_ready(targ)

    pred_ref, targ_ref = rnd_reference(x, params)
    assert pred.shape == (BATCH, OUTPUT_SIZE)
    assert targ.shape == (BATCH, OUTPUT_SIZE)
    assert jnp.allclose(pred, pred_ref, atol=2e-2, rtol=2e-2)
    assert jnp.allclose(targ, targ_ref, atol=2e-2, rtol=2e-2)

    print("KERNEL_OK")
</pallas_src>

<mosaic_0001>
module attributes {stable_mosaic.version = 11 : i64} {
  func.func @rnd_kernel(%arg0: i32, %arg1: memref<8x32xf32, #tpu.memory_space<vmem>>, %arg2: memref<32x1024xbf16, #tpu.memory_space<vmem>>, %arg3: memref<1x1024xf32, #tpu.memory_space<vmem>>, %arg4: memref<512x512xbf16, #tpu.memory_space<vmem>>, %arg5: memref<1x512xf32, #tpu.memory_space<vmem>>, %arg6: memref<512x512xbf16, #tpu.memory_space<vmem>>, %arg7: memref<1x512xf32, #tpu.memory_space<vmem>>, %arg8: memref<512x512xbf16, #tpu.memory_space<vmem>>, %arg9: memref<1x512xf32, #tpu.memory_space<vmem>>, %arg10: memref<512x128xbf16, #tpu.memory_space<vmem>>, %arg11: memref<1x128xf32, #tpu.memory_space<vmem>>, %arg12: memref<512x512xbf16, #tpu.memory_space<vmem>>, %arg13: memref<1x512xf32, #tpu.memory_space<vmem>>, %arg14: memref<512x128xbf16, #tpu.memory_space<vmem>>, %arg15: memref<1x128xf32, #tpu.memory_space<vmem>>, %arg16: memref<8x128xf32, #tpu.memory_space<vmem>>, %arg17: memref<8x128xf32, #tpu.memory_space<vmem>>) attributes {dimension_semantics = [#tpu.dimension_semantics<parallel>], iteration_bounds = array<i64: 1>, scalar_prefetch = 0 : i64, scratch_operands = 0 : i64, tpu.core_type = #tpu.core_type<tc>, window_params = [{transform_indices = @transform_0, window_bounds = array<i64: 8, 32>}, {pipeline_mode = #tpu.pipeline_mode<synchronous>, transform_indices = @transform_1, window_bounds = array<i64: 32, 1024>}, {pipeline_mode = #tpu.pipeline_mode<synchronous>, transform_indices = @transform_2, window_bounds = array<i64: 1, 1024>}, {pipeline_mode = #tpu.pipeline_mode<synchronous>, transform_indices = @transform_3, window_bounds = array<i64: 512, 512>}, {pipeline_mode = #tpu.pipeline_mode<synchronous>, transform_indices = @transform_4, window_bounds = array<i64: 1, 512>}, {pipeline_mode = #tpu.pipeline_mode<synchronous>, transform_indices = @transform_5, window_bounds = array<i64: 512, 512>}, {pipeline_mode = #tpu.pipeline_mode<synchronous>, transform_indices = @transform_6, window_bounds = array<i64: 1, 512>}, {pipeline_mode = #tpu.pipeline_mode<synchronous>, transform_indices = @transform_7, window_bounds = array<i64: 512, 512>}, {pipeline_mode = #tpu.pipeline_mode<synchronous>, transform_indices = @transform_8, window_bounds = array<i64: 1, 512>}, {pipeline_mode = #tpu.pipeline_mode<synchronous>, transform_indices = @transform_9, window_bounds = array<i64: 512, 128>}, {pipeline_mode = #tpu.pipeline_mode<synchronous>, transform_indices = @transform_10, window_bounds = array<i64: 1, 128>}, {pipeline_mode = #tpu.pipeline_mode<synchronous>, transform_indices = @transform_11, window_bounds = array<i64: 512, 512>}, {pipeline_mode = #tpu.pipeline_mode<synchronous>, transform_indices = @transform_12, window_bounds = array<i64: 1, 512>}, {pipeline_mode = #tpu.pipeline_mode<synchronous>, transform_indices = @transform_13, window_bounds = array<i64: 512, 128>}, {pipeline_mode = #tpu.pipeline_mode<synchronous>, transform_indices = @transform_14, window_bounds = array<i64: 1, 128>}, {transform_indices = @transform_15, window_bounds = array<i64: 8, 128>}, {transform_indices = @transform_16, window_bounds = array<i64: 8, 128>}]} {
    %c0 = arith.constant 0 : index
    %c0_0 = arith.constant 0 : index
    %0 = vector.load %arg1[%c0, %c0_0] : memref<8x32xf32, #tpu.memory_space<vmem>>, vector<8x32xf32>
    %1 = arith.truncf %0 : vector<8x32xf32> to vector<8x32xbf16>
    %c0_1 = arith.constant 0 : index
    %c0_2 = arith.constant 0 : index
    %2 = vector.load %arg2[%c0_1, %c0_2] : memref<32x1024xbf16, #tpu.memory_space<vmem>>, vector<32x1024xbf16>
    %cst = arith.constant dense<0.000000e+00> : vector<8x1024xf32>
    %3 = tpu.matmul %1, %2, %cst {dimension_numbers = #tpu.dot_dimension_numbers<[1], [0], [0], [1], [0, 0, 1, 1], [], []>} : vector<8x32xbf16>, vector<32x1024xbf16>, vector<8x1024xf32> -> vector<8x1024xf32>
    %c0_3 = arith.constant 0 : index
    %c0_4 = arith.constant 0 : index
    %4 = vector.load %arg3[%c0_3, %c0_4] : memref<1x1024xf32, #tpu.memory_space<vmem>>, vector<1x1024xf32>
    %5 = vector.broadcast %4 : vector<1x1024xf32> to vector<8x1024xf32>
    %6 = arith.addf %3, %5 : vector<8x1024xf32>
    %cst_5 = arith.constant 0.00999999977 : f32
    %7 = vector.broadcast %cst_5 : f32 to vector<8x1024xf32>
    %8 = arith.mulf %7, %6 : vector<8x1024xf32>
    %9 = arith.maximumf %6, %8 : vector<8x1024xf32>
    %10 = vector.extract_strided_slice %9 {offsets = [0, 0], sizes = [8, 512], strides = [1, 1]} : vector<8x1024xf32> to vector<8x512xf32>
    %11 = arith.truncf %10 : vector<8x512xf32> to vector<8x512xbf16>
    %12 = vector.extract_strided_slice %9 {offsets = [0, 512], sizes = [8, 512], strides = [1, 1]} : vector<8x1024xf32> to vector<8x512xf32>
    %13 = arith.truncf %12 : vector<8x512xf32> to vector<8x512xbf16>
    %c0_6 = arith.constant 0 : index
    %c0_7 = arith.constant 0 : index
    %14 = vector.load %arg4[%c0_6, %c0_7] : memref<512x512xbf16, #tpu.memory_space<vmem>>, vector<512x512xbf16>
    %cst_8 = arith.constant dense<0.000000e+00> : vector<8x512xf32>
    %15 = tpu.matmul %11, %14, %cst_8 {dimension_numbers = #tpu.dot_dimension_numbers<[1], [0], [0], [1], [0, 0, 1, 1], [], []>} : vector<8x512xbf16>, vector<512x512xbf16>, vector<8x512xf32> -> vector<8x512xf32>
    %c0_9 = arith.constant 0 : index
    %c0_10 = arith.constant 0 : index
    %16 = vector.load %arg5[%c0_9, %c0_10] : memref<1x512xf32, #tpu.memory_space<vmem>>, vector<1x512xf32>
    %17 = vector.broadcast %16 : vector<1x512xf32> to vector<8x512xf32>
    %18 = arith.addf %15, %17 : vector<8x512xf32>
    %cst_11 = arith.constant 0.00999999977 : f32
    %19 = vector.broadcast %cst_11 : f32 to vector<8x512xf32>
    %20 = arith.mulf %19, %18 : vector<8x512xf32>
    %21 = arith.maximumf %18, %20 : vector<8x512xf32>
    %22 = arith.truncf %21 : vector<8x512xf32> to vector<8x512xbf16>
    %c0_12 = arith.constant 0 : index
    %c0_13 = arith.constant 0 : index
    %23 = vector.load %arg6[%c0_12, %c0_13] : memref<512x512xbf16, #tpu.memory_space<vmem>>, vector<512x512xbf16>
    %cst_14 = arith.constant dense<0.000000e+00> : vector<8x512xf32>
    %24 = tpu.matmul %22, %23, %cst_14 {dimension_numbers = #tpu.dot_dimension_numbers<[1], [0], [0], [1], [0, 0, 1, 1], [], []>} : vector<8x512xbf16>, vector<512x512xbf16>, vector<8x512xf32> -> vector<8x512xf32>
    %c0_15 = arith.constant 0 : index
    %c0_16 = arith.constant 0 : index
    %25 = vector.load %arg7[%c0_15, %c0_16] : memref<1x512xf32, #tpu.memory_space<vmem>>, vector<1x512xf32>
    %26 = vector.broadcast %25 : vector<1x512xf32> to vector<8x512xf32>
    %27 = arith.addf %24, %26 : vector<8x512xf32>
    %cst_17 = arith.constant 0.00999999977 : f32
    %28 = vector.broadcast %cst_17 : f32 to vector<8x512xf32>
    %29 = arith.mulf %28, %27 : vector<8x512xf32>
    %30 = arith.maximumf %27, %29 : vector<8x512xf32>
    %31 = arith.truncf %30 : vector<8x512xf32> to vector<8x512xbf16>
    %c0_18 = arith.constant 0 : index
    %c0_19 = arith.constant 0 : index
    %32 = vector.load %arg8[%c0_18, %c0_19] : memref<512x512xbf16, #tpu.memory_space<vmem>>, vector<512x512xbf16>
    %cst_20 = arith.constant dense<0.000000e+00> : vector<8x512xf32>
    %33 = tpu.matmul %31, %32, %cst_20 {dimension_numbers = #tpu.dot_dimension_numbers<[1], [0], [0], [1], [0, 0, 1, 1], [], []>} : vector<8x512xbf16>, vector<512x512xbf16>, vector<8x512xf32> -> vector<8x512xf32>
    %c0_21 = arith.constant 0 : index
    %c0_22 = arith.constant 0 : index
    %34 = vector.load %arg9[%c0_21, %c0_22] : memref<1x512xf32, #tpu.memory_space<vmem>>, vector<1x512xf32>
    %35 = vector.broadcast %34 : vector<1x512xf32> to vector<8x512xf32>
    %36 = arith.addf %33, %35 : vector<8x512xf32>
    %cst_23 = arith.constant 0.00999999977 : f32
    %37 = vector.broadcast %cst_23 : f32 to vector<8x512xf32>
    %38 = arith.mulf %37, %36 : vector<8x512xf32>
    %39 = arith.maximumf %36, %38 : vector<8x512xf32>
    %40 = arith.truncf %39 : vector<8x512xf32> to vector<8x512xbf16>
    %c0_24 = arith.constant 0 : index
    %c0_25 = arith.constant 0 : index
    %41 = vector.load %arg10[%c0_24, %c0_25] : memref<512x128xbf16, #tpu.memory_space<vmem>>, vector<512x128xbf16>
    %cst_26 = arith.constant dense<0.000000e+00> : vector<8x128xf32>
    %42 = tpu.matmul %40, %41, %cst_26 {dimension_numbers = #tpu.dot_dimension_numbers<[1], [0], [0], [1], [0, 0, 1, 1], [], []>} : vector<8x512xbf16>, vector<512x128xbf16>, vector<8x128xf32> -> vector<8x128xf32>
    %c0_27 = arith.constant 0 : index
    %c0_28 = arith.constant 0 : index
    %43 = vector.load %arg11[%c0_27, %c0_28] : memref<1x128xf32, #tpu.memory_space<vmem>>, vector<1x128xf32>
    %44 = vector.broadcast %43 : vector<1x128xf32> to vector<8x128xf32>
    %45 = arith.addf %42, %44 : vector<8x128xf32>
    %c0_29 = arith.constant 0 : index
    %c0_30 = arith.constant 0 : index
    %46 = vector.load %arg16[%c0_29, %c0_30] : memref<8x128xf32, #tpu.memory_space<vmem>>, vector<8x128xf32>
    tpu.vector_store %arg16[%c0_29, %c0_30], %45 {strides = array<i32>} : memref<8x128xf32, #tpu.memory_space<vmem>>, vector<8x128xf32>,
    %c0_31 = arith.constant 0 : index
    %c0_32 = arith.constant 0 : index
    %47 = vector.load %arg12[%c0_31, %c0_32] : memref<512x512xbf16, #tpu.memory_space<vmem>>, vector<512x512xbf16>
    %cst_33 = arith.constant dense<0.000000e+00> : vector<8x512xf32>
    %48 = tpu.matmul %13, %47, %cst_33 {dimension_numbers = #tpu.dot_dimension_numbers<[1], [0], [0], [1], [0, 0, 1, 1], [], []>} : vector<8x512xbf16>, vector<512x512xbf16>, vector<8x512xf32> -> vector<8x512xf32>
    %c0_34 = arith.constant 0 : index
    %c0_35 = arith.constant 0 : index
    %49 = vector.load %arg13[%c0_34, %c0_35] : memref<1x512xf32, #tpu.memory_space<vmem>>, vector<1x512xf32>
    %50 = vector.broadcast %49 : vector<1x512xf32> to vector<8x512xf32>
    %51 = arith.addf %48, %50 : vector<8x512xf32>
    %cst_36 = arith.constant 0.00999999977 : f32
    %52 = vector.broadcast %cst_36 : f32 to vector<8x512xf32>
    %53 = arith.mulf %52, %51 : vector<8x512xf32>
    %54 = arith.maximumf %51, %53 : vector<8x512xf32>
    %55 = arith.truncf %54 : vector<8x512xf32> to vector<8x512xbf16>
    %c0_37 = arith.constant 0 : index
    %c0_38 = arith.constant 0 : index
    %56 = vector.load %arg14[%c0_37, %c0_38] : memref<512x128xbf16, #tpu.memory_space<vmem>>, vector<512x128xbf16>
    %cst_39 = arith.constant dense<0.000000e+00> : vector<8x128xf32>
    %57 = tpu.matmul %55, %56, %cst_39 {dimension_numbers = #tpu.dot_dimension_numbers<[1], [0], [0], [1], [0, 0, 1, 1], [], []>} : vector<8x512xbf16>, vector<512x128xbf16>, vector<8x128xf32> -> vector<8x128xf32>
    %c0_40 = arith.constant 0 : index
    %c0_41 = arith.constant 0 : index
    %58 = vector.load %arg15[%c0_40, %c0_41] : memref<1x128xf32, #tpu.memory_space<vmem>>, vector<1x128xf32>
    %59 = vector.broadcast %58 : vector<1x128xf32> to vector<8x128xf32>
    %60 = arith.addf %57, %59 : vector<8x128xf32>
    %c0_42 = arith.constant 0 : index
    %c0_43 = arith.constant 0 : index
    %61 = vector.load %arg17[%c0_42, %c0_43] : memref<8x128xf32, #tpu.memory_space<vmem>>, vector<8x128xf32>
    tpu.vector_store %arg17[%c0_42, %c0_43], %60 {strides = array<i32>} : memref<8x128xf32, #tpu.memory_space<vmem>>, vector<8x128xf32>,
    return
  }
  func.func @transform_0(%arg0: i32) -> (i32, i32) {
    %c0_i32 = arith.constant 0 : i32
    %c0_i32_0 = arith.constant 0 : i32
    return %arg0, %c0_i32 : i32, i32
  }
  func.func @transform_1(%arg0: i32) -> (i32, i32) {
    %c0_i32 = arith.constant 0 : i32
    %c0_i32_0 = arith.constant 0 : i32
    %c0_i32_1 = arith.constant 0 : i32
    return %c0_i32, %c0_i32_0 : i32, i32
  }
  func.func @transform_2(%arg0: i32) -> (i32, i32) {
    %c0_i32 = arith.constant 0 : i32
    %c0_i32_0 = arith.constant 0 : i32
    %c0_i32_1 = arith.constant 0 : i32
    return %c0_i32, %c0_i32_0 : i32, i32
  }
  func.func @transform_3(%arg0: i32) -> (i32, i32) {
    %c0_i32 = arith.constant 0 : i32
    %c0_i32_0 = arith.constant 0 : i32
    %c0_i32_1 = arith.constant 0 : i32
    return %c0_i32, %c0_i32_0 : i32, i32
  }
  func.func @transform_4(%arg0: i32) -> (i32, i32) {
    %c0_i32 = arith.constant 0 : i32
    %c0_i32_0 = arith.constant 0 : i32
    %c0_i32_1 = arith.constant 0 : i32
    return %c0_i32, %c0_i32_0 : i32, i32
  }
  func.func @transform_5(%arg0: i32) -> (i32, i32) {
    %c0_i32 = arith.constant 0 : i32
    %c0_i32_0 = arith.constant 0 : i32
    %c0_i32_1 = arith.constant 0 : i32
    return %c0_i32, %c0_i32_0 : i32, i32
  }
  func.func @transform_6(%arg0: i32) -> (i32, i32) {
    %c0_i32 = arith.constant 0 : i32
    %c0_i32_0 = arith.constant 0 : i32
    %c0_i32_1 = arith.constant 0 : i32
    return %c0_i32, %c0_i32_0 : i32, i32
  }
  func.func @transform_7(%arg0: i32) -> (i32, i32) {
    %c0_i32 = arith.constant 0 : i32
    %c0_i32_0 = arith.constant 0 : i32
    %c0_i32_1 = arith.constant 0 : i32
    return %c0_i32, %c0_i32_0 : i32, i32
  }
  func.func @transform_8(%arg0: i32) -> (i32, i32) {
    %c0_i32 = arith.constant 0 : i32
    %c0_i32_0 = arith.constant 0 : i32
    %c0_i32_1 = arith.constant 0 : i32
    return %c0_i32, %c0_i32_0 : i32, i32
  }
  func.func @transform_9(%arg0: i32) -> (i32, i32) {
    %c0_i32 = arith.constant 0 : i32
    %c0_i32_0 = arith.constant 0 : i32
    %c0_i32_1 = arith.constant 0 : i32
    return %c0_i32, %c0_i32_0 : i32, i32
  }
  func.func @transform_10(%arg0: i32) -> (i32, i32) {
    %c0_i32 = arith.constant 0 : i32
    %c0_i32_0 = arith.constant 0 : i32
    %c0_i32_1 = arith.constant 0 : i32
    return %c0_i32, %c0_i32_0 : i32, i32
  }
  func.func @transform_11(%arg0: i32) -> (i32, i32) {
    %c0_i32 = arith.constant 0 : i32
    %c0_i32_0 = arith.constant 0 : i32
    %c0_i32_1 = arith.constant 0 : i32
    return %c0_i32, %c0_i32_0 : i32, i32
  }
  func.func @transform_12(%arg0: i32) -> (i32, i32) {
    %c0_i32 = arith.constant 0 : i32
    %c0_i32_0 = arith.constant 0 : i32
    %c0_i32_1 = arith.constant 0 : i32
    return %c0_i32, %c0_i32_0 : i32, i32
  }
  func.func @transform_13(%arg0: i32) -> (i32, i32) {
    %c0_i32 = arith.constant 0 : i32
    %c0_i32_0 = arith.constant 0 : i32
    %c0_i32_1 = arith.constant 0 : i32
    return %c0_i32, %c0_i32_0 : i32, i32
  }
  func.func @transform_14(%arg0: i32) -> (i32, i32) {
    %c0_i32 = arith.constant 0 : i32
    %c0_i32_0 = arith.constant 0 : i32
    %c0_i32_1 = arith.constant 0 : i32
    return %c0_i32, %c0_i32_0 : i32, i32
  }
  func.func @transform_15(%arg0: i32) -> (i32, i32) {
    %c0_i32 = arith.constant 0 : i32
    %c0_i32_0 = arith.constant 0 : i32
    return %arg0, %c0_i32 : i32, i32
  }
  func.func @transform_16(%arg0: i32) -> (i32, i32) {
    %c0_i32 = arith.constant 0 : i32
    %c0_i32_0 = arith.constant 0 : i32
    return %arg0, %c0_i32 : i32, i32
  }
}

</mosaic_0001>

<bundles_post_ra>
// kernel: tpu_custom_call.1
= control target key start
LH: loop header
LB: loop body
LE: loop exit
PB: predicated region body
PF: predicated region fallthrough
CT: control target
= control target key end

     0   :  { %s7297_s0 = inlined_call_operand.hbm [shape: f32[8,32], index: 0, kind: input, shape index: {}]   ;;  %s7298_s1 = inlined_call_operand.hbm [shape: bf16[32,1024], index: 1, kind: input, shape index: {}]   ;;  %s7299_s2 = inlined_call_operand.hbm [shape: f32[1,1024], index: 2, kind: input, shape index: {}]   ;;  %s7300_s3 = inlined_call_operand.hbm [shape: bf16[512,512], index: 3, kind: input, shape index: {}]   ;;  %s7301_s4 = inlined_call_operand.vmem [shape: f32[1,512], index: 4, kind: input, shape index: {}]   ;;  %s7302_s5 = inlined_call_operand.hbm [shape: bf16[512,512], index: 5, kind: input, shape index: {}]   ;;  %s7303_s6 = inlined_call_operand.vmem [shape: f32[1,512], index: 6, kind: input, shape index: {}]   ;;  %s7304_s7 = inlined_call_operand.hbm [shape: bf16[512,512], index: 7, kind: input, shape index: {}]   ;;  %s7305_s8 = inlined_call_operand.vmem [shape: f32[1,512], index: 8, kind: input, shape index: {}]   ;;  %s7306_s9 = inlined_call_operand.hbm [shape: bf16[512,128], index: 9, kind: input, shape index: {}]   ;;  %s7307_s10 = inlined_call_operand.vmem [shape: f32[1,128], index: 10, kind: input, shape index: {}]   ;;  %s7308_s11 = inlined_call_operand.hbm [shape: bf16[512,512], index: 11, kind: input, shape index: {}]   ;;  %s7309_s12 = inlined_call_operand.vmem [shape: f32[1,512], index: 12, kind: input, shape index: {}]   ;;  %s7310_s13 = inlined_call_operand.hbm [shape: bf16[512,128], index: 13, kind: input, shape index: {}]   ;;  %s7311_s14 = inlined_call_operand.vmem [shape: f32[1,128], index: 14, kind: input, shape index: {}]   ;;  %s7312_s15 = inlined_call_operand.hbm [shape: f32[8,128], index: 15, kind: output, shape index: {0}]   ;;  %s7313_s16 = inlined_call_operand.hbm [shape: f32[8,128], index: 16, kind: output, shape index: {1}]  }
   0x1   :  { %7315 = sst [smem:[#allocation27_spill]] %s7297_s0 }
   0x2   :  { %22 = vsyncpa [#allocation3], 0 }
   0x3   :  { %23 = vsyncpa [#allocation6], 0 }
   0x4   :  { %24 = vsyncpa [#allocation9], 0 }
   0x5   :  { %25 = vsyncpa [#allocation12], 0 }
   0x6   :  { %26 = vsyncpa [#allocation15], 0 }
   0x7   :  { %27 = vsyncpa [#allocation4], 0 }
   0x8   :  { %28 = vsyncpa [#allocation19], 0  ;;  %s6931_s21 = smov [#allocation5]   ;;  %s6675_s25 = scalar_lea.hbm %s7298_s1, 2048 }
   0x9   :  { %s44_s22 = sshll.u32 %s6931_s21, 4  ;;  %p6676_p0 = scmp.ne.s32.totalorder %s7298_s1, %s6675_s25  ;;  %s45_s22 = int_to_ptr.vmem [resolvable:$true] %s44_s22 }
   0xa   :  { %p6679_p1 = scmp.lt.u32.totalorder %s6675_s25, %s7298_s1 }
   0xc   :  { %p6681_p2 = pnand %p6679_p1, %p6676_p0 }
   0xe   :  { %6684 = shalt.err (!%p6681_p2)
}
   0xf   :  { %s6685_s30 = scalar_lea.vmem %s45_s22, 2048  ;;  %p6690_p4 = scmp.lt.s32.totalorder %s45_s22, %s45_s22 }
  0x10   :  { %p6686_p3 = scmp.ne.s32.totalorder %s45_s22, %s6685_s30  ;;  %p6691_p5 = scmp.lt.s32.totalorder %s6685_s30, %s6685_s30 }
  0x12   :  { %p6692_p6 = por %p6691_p5, %p6690_p4 }
  0x14   :  { %p6693_p7 = pnand %p6692_p6, %p6686_p3 }
  0x16   :  { %6696 = shalt.err (!%p6693_p7)
}
  0x17   :  { %s6932_s0 = smov 512   ;;  %s6933_s17 = smov 32  }
  0x18   :  { %50 = dma.hbm_to_vmem [thread:$0]  %s7298_s1, 2048, %s45_s22, [#allocation6], %s6932_s0, %s6932_s0, %s6933_s17  }
  0x19   :  { %s6934_s20 = smov [#allocation8]   ;;  %s6697_s25 = scalar_lea.hbm %s7300_s3, 16384 }
  0x1a   :  { %s66_s21 = sshll.u32 %s6934_s20, 4  ;;  %p6698_p8 = scmp.ne.s32.totalorder %s7300_s3, %s6697_s25  ;;  %s67_s21 = int_to_ptr.vmem [resolvable:$true] %s66_s21 }
  0x1b   :  { %p6701_p9 = scmp.lt.u32.totalorder %s6697_s25, %s7300_s3 }
  0x1d   :  { %p6703_p10 = pnand %p6701_p9, %p6698_p8 }
  0x1f   :  { %6706 = shalt.err (!%p6703_p10)
}
  0x20   :  { %s6707_s30 = scalar_lea.vmem %s67_s21, 16384  ;;  %p6712_p12 = scmp.lt.s32.totalorder %s67_s21, %s67_s21 }
  0x21   :  { %p6708_p11 = scmp.ne.s32.totalorder %s67_s21, %s6707_s30  ;;  %p6713_p13 = scmp.lt.s32.totalorder %s6707_s30, %s6707_s30 }
  0x23   :  { %p6714_p0 = por %p6713_p13, %p6712_p12 }
  0x25   :  { %p6715_p1 = pnand %p6714_p0, %p6708_p11 }
  0x27   :  { %6718 = shalt.err (!%p6715_p1)
}
  0x28   :  { %s6935_s1 = smov 256   ;;  %s6936_s22 = smov 16  }
  0x29   :  { %72 = dma.hbm_to_vmem [thread:$0]  %s7300_s3, 16384, %s67_s21, [#allocation9], %s6935_s1, %s6935_s1, %s6936_s22  }
  0x2a   :  { %s6937_s18 = smov [#allocation11]   ;;  %s6938_s20 = smov [#allocation14]  }
  0x2b   :  { %s94_s19 = sshll.u32 %s6937_s18, 4  ;;  %s122_s23 = sshll.u32 %s6938_s20, 4  ;;  %s95_s19 = int_to_ptr.vmem [resolvable:$true] %s94_s19  ;;  %s7061_s23 = int_to_ptr.vmem [resolvable:$true] %s122_s23 }
  0x2c   :  { %s6719_s26 = scalar_lea.hbm %s7304_s7, 16384 }
  0x2d   :  { %p6720_p2 = scmp.ne.s32.totalorder %s7304_s7, %s6719_s26  ;;  %p6723_p3 = scmp.lt.u32.totalorder %s6719_s26, %s7304_s7 }
  0x2f   :  { %p6725_p4 = pnand %p6723_p3, %p6720_p2 }
  0x31   :  { %6728 = shalt.err (!%p6725_p4)
}
  0x32   :  { %s6729_s3 = scalar_lea.vmem %s95_s19, 16384  ;;  %p6734_p6 = scmp.lt.s32.totalorder %s95_s19, %s95_s19 }
  0x33   :  { %p6730_p5 = scmp.ne.s32.totalorder %s95_s19, %s6729_s3  ;;  %p6735_p7 = scmp.lt.s32.totalorder %s6729_s3, %s6729_s3 }
  0x35   :  { %p6736_p8 = por %p6735_p7, %p6734_p6 }
  0x37   :  { %p6737_p9 = pnand %p6736_p8, %p6730_p5 }
  0x39   :  { %6740 = shalt.err (!%p6737_p9)
}
  0x3a   :  { %100 = dma.hbm_to_vmem [thread:$0]  %s7304_s7, 16384, %s95_s19, [#allocation12], %s6935_s1, %s6935_s1, %s6936_s22  }
  0x3b   :  { %s6741_s20 = scalar_lea.hbm %s7308_s11, 16384 }
  0x3c   :  { %p6742_p10 = scmp.ne.s32.totalorder %s7308_s11, %s6741_s20  ;;  %p6745_p11 = scmp.lt.u32.totalorder %s6741_s20, %s7308_s11 }
  0x3e   :  { %p6747_p12 = pnand %p6745_p11, %p6742_p10 }
  0x40   :  { %6750 = shalt.err (!%p6747_p12)
}
  0x41   :  { %s6751_s28 = scalar_lea.vmem %s7061_s23, 16384  ;;  %p6756_p0 = scmp.lt.s32.totalorder %s7061_s23, %s7061_s23 }
  0x42   :  { %p6752_p13 = scmp.ne.s32.totalorder %s7061_s23, %s6751_s28  ;;  %p6757_p1 = scmp.lt.s32.totalorder %s6751_s28, %s6751_s28 }
  0x44   :  { %p6758_p2 = por %p6757_p1, %p6756_p0 }
  0x46   :  { %p6759_p3 = pnand %p6758_p2, %p6752_p13 }
  0x48   :  { %6762 = shalt.err (!%p6759_p3)
}
  0x49   :  { %128 = dma.hbm_to_vmem [thread:$0]  %s7308_s11, 16384, %s7061_s23, [#allocation15], %s6935_s1, %s6935_s1, %s6936_s22  }
  0x4a   :  { %s6939_s29 = smov [#allocation2]   ;;  %s6940_s3 = smov [#allocation7]  }
  0x4b   :  { %s35_s30 = sshll.u32 %s6939_s29, 4  ;;  %s57_s21 = sshll.u32 %s6940_s3, 4  ;;  %s36_s30 = int_to_ptr.vmem [resolvable:$true] %s35_s30  ;;  %s58_s21 = int_to_ptr.vmem [resolvable:$true] %s57_s21 }
  0x4c   :  { %s7316_s18 = sld [smem:[#allocation27_spill]] }
  0x52   :  { %s6763_s20 = scalar_lea.hbm %s7316_s18, 128 }
  0x53   :  { %p6764_p4 = scmp.ne.s32.totalorder %s7316_s18, %s6763_s20  ;;  %p6767_p5 = scmp.lt.u32.totalorder %s6763_s20, %s7316_s18 }
  0x55   :  { %p6769_p6 = pnand %p6767_p5, %p6764_p4 }
  0x57   :  { %6772 = shalt.err (!%p6769_p6)
}
  0x58   :  { %s6773_s11 = scalar_lea.vmem %s36_s30, 128  ;;  %p6778_p8 = scmp.lt.s32.totalorder %s36_s30, %s36_s30 }
  0x59   :  { %p6774_p7 = scmp.ne.s32.totalorder %s36_s30, %s6773_s11  ;;  %p6779_p9 = scmp.lt.s32.totalorder %s6773_s11, %s6773_s11 }
  0x5b   :  { %p6780_p10 = por %p6779_p9, %p6778_p8 }
  0x5d   :  { %p6781_p11 = pnand %p6780_p10, %p6774_p7 }
  0x5f   :  { %6784 = shalt.err (!%p6781_p11)
}
  0x60   :  { %38 = dma.hbm_to_vmem [thread:$0]  %s7316_s18, 128, %s36_s30, [#allocation3]  }
  0x61   :  { %s6785_s29 = scalar_lea.hbm %s7299_s2, 128 }
  0x62   :  { %p6786_p12 = scmp.ne.s32.totalorder %s7299_s2, %s6785_s29  ;;  %p6789_p13 = scmp.lt.u32.totalorder %s6785_s29, %s7299_s2 }
  0x64   :  { %p6791_p0 = pnand %p6789_p13, %p6786_p12 }
  0x66   :  { %6794 = shalt.err (!%p6791_p0)
}
  0x67   :  { %s6795_s24 = scalar_lea.vmem %s58_s21, 128  ;;  %p6800_p2 = scmp.lt.s32.totalorder %s58_s21, %s58_s21 }
  0x68   :  { %p6796_p1 = scmp.ne.s32.totalorder %s58_s21, %s6795_s24  ;;  %p6801_p3 = scmp.lt.s32.totalorder %s6795_s24, %s6795_s24 }
  0x6a   :  { %p6802_p4 = por %p6801_p3, %p6800_p2 }
  0x6c   :  { %p6803_p5 = pnand %p6802_p4, %p6796_p1 }
  0x6e   :  { %6806 = shalt.err (!%p6803_p5)
}
  0x6f   :  { %60 = dma.hbm_to_vmem [thread:$0]  %s7299_s2, 128, %s58_s21, [#allocation6]  }
  0x70   :  { %s6941_s25 = smov [#allocation10]   ;;  %s6942_s27 = smov [#allocation13]  }
  0x71   :  { %s80_s26 = sshll.u32 %s6941_s25, 4  ;;  %s108_s11 = sshll.u32 %s6942_s27, 4  ;;  %s81_s26 = int_to_ptr.vmem [resolvable:$true] %s80_s26  ;;  %s7122_s11 = int_to_ptr.vmem [resolvable:$true] %s108_s11 }
  0x72   :  { %s6807_s7 = scalar_lea.hbm %s7302_s5, 16384 }
  0x73   :  { %p6808_p6 = scmp.ne.s32.totalorder %s7302_s5, %s6807_s7  ;;  %p6811_p7 = scmp.lt.u32.totalorder %s6807_s7, %s7302_s5 }
  0x75   :  { %p6813_p8 = pnand %p6811_p7, %p6808_p6 }
  0x77   :  { %6816 = shalt.err (!%p6813_p8)
}
  0x78   :  { %s6817_s2 = scalar_lea.vmem %s81_s26, 16384  ;;  %p6822_p10 = scmp.lt.s32.totalorder %s81_s26, %s81_s26 }
  0x79   :  { %p6818_p9 = scmp.ne.s32.totalorder %s81_s26, %s6817_s2  ;;  %p6823_p11 = scmp.lt.s32.totalorder %s6817_s2, %s6817_s2 }
  0x7b   :  { %p6824_p12 = por %p6823_p11, %p6822_p10 }
  0x7d   :  { %p6825_p13 = pnand %p6824_p12, %p6818_p9 }
  0x7f   :  { %6828 = shalt.err (!%p6825_p13)
}
  0x80   :  { %86 = dma.hbm_to_vmem [thread:$0]  %s7302_s5, 16384, %s81_s26, [#allocation9], %s6935_s1, %s6935_s1, %s6936_s22  }
  0x81   :  { %s6829_s30 = scalar_lea.hbm %s7306_s9, 4096 }
  0x82   :  { %p6830_p0 = scmp.ne.s32.totalorder %s7306_s9, %s6829_s30  ;;  %p6833_p1 = scmp.lt.u32.totalorder %s6829_s30, %s7306_s9 }
  0x84   :  { %p6835_p2 = pnand %p6833_p1, %p6830_p0 }
  0x86   :  { %6838 = shalt.err (!%p6835_p2)
}
  0x87   :  { %s6839_s28 = scalar_lea.vmem %s7122_s11, 4096  ;;  %p6844_p4 = scmp.lt.s32.totalorder %s7122_s11, %s7122_s11 }
  0x88   :  { %p6840_p3 = scmp.ne.s32.totalorder %s7122_s11, %s6839_s28  ;;  %p6845_p5 = scmp.lt.s32.totalorder %s6839_s28, %s6839_s28 }
  0x8a   :  { %p6846_p6 = por %p6845_p5, %p6844_p4 }
  0x8c   :  { %p6847_p7 = pnand %p6846_p6, %p6840_p3 }
  0x8e   :  { %6850 = shalt.err (!%p6847_p7)
}
  0x8f   :  { %s6943_s5 = smov 64   ;;  %s6944_s1 = smov 4  }
  0x90   :  { %114 = dma.hbm_to_vmem [thread:$0]  %s7306_s9, 4096, %s7122_s11, [#allocation12], %s6943_s5, %s6943_s5, %s6944_s1  }
  0x91   :  { %s6945_s7 = smov [#allocation16]   ;;  %s6851_s0 = scalar_lea.hbm %s7310_s13, 4096 }
  0x92   :  { %s136_s19 = sshll.u32 %s6945_s7, 4  ;;  %p6852_p8 = scmp.ne.s32.totalorder %s7310_s13, %s6851_s0  ;;  %s137_s19 = int_to_ptr.vmem [resolvable:$true] %s136_s19 }
  0x93   :  { %p6855_p9 = scmp.lt.u32.totalorder %s6851_s0, %s7310_s13 }
  0x95   :  { %p6857_p10 = pnand %p6855_p9, %p6852_p8 }
  0x97   :  { %6860 = shalt.err (!%p6857_p10)
}
  0x98   :  { %s6861_s24 = scalar_lea.vmem %s137_s19, 4096  ;;  %p6866_p12 = scmp.lt.s32.totalorder %s137_s19, %s137_s19 }
  0x99   :  { %p6862_p11 = scmp.ne.s32.totalorder %s137_s19, %s6861_s24  ;;  %p6867_p13 = scmp.lt.s32.totalorder %s6861_s24, %s6861_s24 }
  0x9b   :  { %p6868_p0 = por %p6867_p13, %p6866_p12 }
  0x9d   :  { %p6869_p1 = pnand %p6868_p0, %p6862_p11 }
  0x9f   :  { %6872 = shalt.err (!%p6869_p1)
}
  0xa0   :  { %142 = dma.hbm_to_vmem [thread:$0]  %s7310_s13, 4096, %s137_s19, [#allocation15], %s6943_s5, %s6943_s5, %s6944_s1  }
  0xa1   :  { %6917 = dma.done.wait [#allocation3], 128  }
  0xa2   :  { %6918 = vsyncadd [#allocation3], 4294967168 }
  0xa3   :  { %6919 = dma.done.wait [#allocation6], 2176  }
  0xa4   :  { %6920 = vsyncadd [#allocation6], 4294965120 }
  0xa5   :  { %6921 = dma.done.wait [#allocation9], 32768  }
  0xa6   :  { %6922 = vsyncadd [#allocation9], 4294934528 }
  0xa7   :  { %6923 = dma.done.wait [#allocation12], 20480  }
  0xa8   :  { %6924 = vsyncadd [#allocation12], 4294946816 }
  0xa9   :  { %6925 = dma.done.wait [#allocation15], 20480  }
  0xaa   :  { %6926 = vsyncadd [#allocation15], 4294946816  ;;  %v6946_v0 = vmov 0   ;;  %v175_v1 = vld [vmem:[#allocation5] sm:$0xff]  ;;  %v176_v7 = vld [vmem:[#allocation5 + $0x8] sm:$0xff]  ;;  %vm313_vm0 = vcmask 261120  }
  0xab   :  { %349 = vmatprep.mubr.bf16.mxu0 %v6946_v0  ;;  %390 = vmatprep.mubr.bf16.mxu1 %v6946_v0  ;;  %v179_v2 = vld [vmem:[#allocation5 + $0x20] sm:$0xff]  ;;  %v180_v9 = vld [vmem:[#allocation5 + $0x28] sm:$0xff]  ;;  %v177_v15 = vld [vmem:[#allocation5 + $0x10] sm:$0xff] }
  0xac   :  { %v183_v3 = vld [vmem:[#allocation5 + $0x40] sm:$0xff]  ;;  %v5091_v4 = vcombine.high %v175_v1, %v179_v2  ;;  %v5090_v5 = vcombine.low %v175_v1, %v179_v2  ;;  %v184_v10 = vld [vmem:[#allocation5 + $0x48] sm:$0xff]  ;;  %v5093_v12 = vcombine.high %v176_v7, %v180_v9  ;;  %v5092_v13 = vcombine.low %v176_v7, %v180_v9  ;;  %v181_v16 = vld [vmem:[#allocation5 + $0x30] sm:$0xff] }
  0xad   :  { %v187_v6 = vld [vmem:[#allocation5 + $0x60] sm:$0xff]  ;;  %v188_v11 = vld [vmem:[#allocation5 + $0x68] sm:$0xff]  ;;  %v173_v18 = vld [vmem:[#allocation2] sm:$0xff]  ;;  %v5095_v21 = vcombine.high %v177_v15, %v181_v16  ;;  %v5094_v28 = vcombine.low %v177_v15, %v181_v16 }
  0xae   :  { %v5099_v8 = vcombine.high %v183_v3, %v187_v6  ;;  %317 = vmatprep.subr.bf16.mxu0 %v5091_v4  ;;  %v5101_v14 = vcombine.high %v184_v10, %v188_v11  ;;  %v5098_v17 = vcombine.low %v183_v3, %v187_v6  ;;  %v178_v19 = vld [vmem:[#allocation5 + $0x18] sm:$0xff]  ;;  %358 = vmatprep.subr.bf16.mxu1 %v5093_v12  ;;  %v185_v23 = vld [vmem:[#allocation5 + $0x50] sm:$0xff] }
  0xaf   :  { %318 = vmatpush1.bf16.msra.mxu0 %v5090_v5  ;;  %v182_v20 = vld [vmem:[#allocation5 + $0x38] sm:$0xff]  ;;  %359 = vmatpush1.bf16.msra.mxu1 %v5092_v13  ;;  %v5100_v22 = vcombine.low %v184_v10, %v188_v11  ;;  %v189_v24 = vld [vmem:[#allocation5 + $0x70] sm:$0xff]  ;;  %v174_v25 = vpack.c.bf16 %v173_v18, %v173_v18 }
  0xb0   :  { %319 = vmatprep.subr.bf16.mxu0 %v5099_v8  ;;  %360 = vmatprep.subr.bf16.mxu1 %v5101_v14  ;;  %v5097_v26 = vcombine.high %v178_v19, %v182_v20  ;;  %v186_v27 = vld [vmem:[#allocation5 + $0x58] sm:$0xff]  ;;  %v5103_v30 = vcombine.high %v185_v23, %v189_v24  ;;  %v5096_v31 = vcombine.low %v178_v19, %v182_v20  ;;  %v5847_v36 = vld [vmem:[#allocation8 + $0xc] ss:$16 sps:$4 sm:$0xff]   ;;  %v5845_v39 = vld [vmem:[#allocation8 + $0x8] ss:$16 sps:$4 sm:$0xff]  }
  0xb1   :  { %v190_v29 = vld [vmem:[#allocation5 + $0x78] sm:$0xff]  ;;  %v5102_v33 = vcombine.low %v185_v23, %v189_v24  ;;  %v5853_v40 = vld [vmem:[#allocation8 + $0x2c] ss:$16 sps:$4 sm:$0xff]   ;;  %v5851_v43 = vld [vmem:[#allocation8 + $0x28] ss:$16 sps:$4 sm:$0xff]  }
  0xb2   :  { %v5105_v32 = vcombine.high %v186_v27, %v190_v29  ;;  %v5844_v34 = vld [vmem:[#allocation8 + $0x4] ss:$16 sps:$4 sm:$0xff]   ;;  %v5104_v35 = vcombine.low %v186_v27, %v190_v29  ;;  %v5842_v37 = vld [vmem:[#allocation8] ss:$16 sps:$4 sm:$0xff]   ;;  %v5859_v44 = vld [vmem:[#allocation8 + $0x4c] ss:$16 sps:$4 sm:$0xff]  }
  0xb3   :  { %320 = vmatpush1.bf16.msra.mxu0 %v5098_v17  ;;  %361 = vmatpush1.bf16.msra.mxu1 %v5100_v22  ;;  %v5850_v38 = vld [vmem:[#allocation8 + $0x24] ss:$16 sps:$4 sm:$0xff]   ;;  %v5848_v41 = vld [vmem:[#allocation8 + $0x20] ss:$16 sps:$4 sm:$0xff]   ;;  %v5857_v47 = vld [vmem:[#allocation8 + $0x48] ss:$16 sps:$4 sm:$0xff]  }
  0xb4   :  { %399 = vmatprep.subr.bf16.mxu0 %v5095_v21  ;;  %440 = vmatprep.subr.bf16.mxu1 %v5097_v26  ;;  %v5856_v42 = vld [vmem:[#allocation8 + $0x44] ss:$16 sps:$4 sm:$0xff]   ;;  %v5854_v45 = vld [vmem:[#allocation8 + $0x40] ss:$16 sps:$4 sm:$0xff]   ;;  %v5865_v48 = vld [vmem:[#allocation8 + $0x6c] ss:$16 sps:$4 sm:$0xff]  }
  0xb5   :  { %v5862_v46 = vld [vmem:[#allocation8 + $0x64] ss:$16 sps:$4 sm:$0xff]   ;;  %v5860_v49 = vld [vmem:[#allocation8 + $0x60] ss:$16 sps:$4 sm:$0xff]   ;;  %v5863_v51 = vld [vmem:[#allocation8 + $0x68] ss:$16 sps:$4 sm:$0xff]  }
  0xb6   :  { %5106 = vmatmul.mubr.msk.bf16.vlgmr.msra.gmra.mrb[0].mxu0 %vm313_vm0, %v174_v25  ;;  %5107 = vmatmul.mubr.msk.bf16.vlgmr.msra.gmra.mrb[0].mxu1 %vm313_vm0, %v174_v25  ;;  %v5868_v50 = vld [vmem:[#allocation8 + $0x84] ss:$16 sps:$4 sm:$0xff]   ;;  %v5871_v52 = vld [vmem:[#allocation8 + $0x8c] ss:$16 sps:$4 sm:$0xff]   ;;  %v5866_v53 = vld [vmem:[#allocation8 + $0x80] ss:$16 sps:$4 sm:$0xff]  }
  0xb7   :  { %400 = vmatpush1.bf16.msra.mxu0 %v5094_v28  ;;  %431 = vmatprep.mubr.bf16.mxu0 %v6946_v0  ;;  %v5874_v54 = vld [vmem:[#allocation8 + $0xa4] ss:$16 sps:$4 sm:$0xff]   ;;  %v5869_v55 = vld [vmem:[#allocation8 + $0x88] ss:$16 sps:$4 sm:$0xff]   ;;  %v5877_v56 = vld [vmem:[#allocation8 + $0xac] ss:$16 sps:$4 sm:$0xff]  }
  0xb8   :  { %401 = vmatprep.subr.bf16.mxu0 %v5103_v30  ;;  %441 = vmatpush1.bf16.msra.mxu1 %v5096_v31  ;;  %v5872_v57 = vld [vmem:[#allocation8 + $0xa0] ss:$16 sps:$4 sm:$0xff]   ;;  %v5880_v58 = vld [vmem:[#allocation8 + $0xc4] ss:$16 sps:$4 sm:$0xff]   ;;  %v5875_v59 = vld [vmem:[#allocation8 + $0xa8] ss:$16 sps:$4 sm:$0xff]  }
  0xb9   :  { %472 = vmatprep.mubr.bf16.mxu1 %v6946_v0  ;;  %442 = vmatprep.subr.bf16.mxu1 %v5105_v32  ;;  %v5883_v60 = vld [vmem:[#allocation8 + $0xcc] ss:$16 sps:$4 sm:$0xff]   ;;  %v5878_v61 = vld [vmem:[#allocation8 + $0xc0] ss:$16 sps:$4 sm:$0xff]   ;;  %v5881_v62 = vld [vmem:[#allocation8 + $0xc8] ss:$16 sps:$4 sm:$0xff]  }
  0xba   :  { %v5886_v63 = vld [vmem:[#allocation8 + $0xe4] ss:$16 sps:$4 sm:$0xff]   ;;  %v5884_v0 = vld [vmem:[#allocation8 + $0xe0] ss:$16 sps:$4 sm:$0xff]   ;;  %v5889_v1 = vld [vmem:[#allocation8 + $0xec] ss:$16 sps:$4 sm:$0xff]  }
  0xbb   :  { %402 = vmatpush1.bf16.msra.mxu0 %v5102_v33  ;;  %v5892_v2 = vld [vmem:[#allocation8 + $0x104] ss:$16 sps:$4 sm:$0xff]   ;;  %v5887_v3 = vld [vmem:[#allocation8 + $0xe8] ss:$16 sps:$4 sm:$0xff]   ;;  %v5895_v4 = vld [vmem:[#allocation8 + $0x10c] ss:$16 sps:$4 sm:$0xff]  }
  0xbc   :  { %1295 = vmatprep.subr.bf16.mxu0 %v5844_v34  ;;  %443 = vmatpush1.bf16.msra.mxu1 %v5104_v35  ;;  %v5890_v5 = vld [vmem:[#allocation8 + $0x100] ss:$16 sps:$4 sm:$0xff]   ;;  %v5898_v6 = vld [vmem:[#allocation8 + $0x124] ss:$16 sps:$4 sm:$0xff]   ;;  %v5893_v7 = vld [vmem:[#allocation8 + $0x108] ss:$16 sps:$4 sm:$0xff]  }
  0xbd   :  { %1377 = vmatprep.subr.bf16.mxu1 %v5847_v36  ;;  %v5901_v8 = vld [vmem:[#allocation8 + $0x12c] ss:$16 sps:$4 sm:$0xff]   ;;  %v5896_v9 = vld [vmem:[#allocation8 + $0x120] ss:$16 sps:$4 sm:$0xff]   ;;  %v5904_v10 = vld [vmem:[#allocation8 + $0x144] ss:$16 sps:$4 sm:$0xff]  }
  0xbe   :  { %5108 = vmatmul.mubr.msk.bf16.vlgmr.msra.gmra.mrb[4].mxu0 %vm313_vm0, %v174_v25  ;;  %v5899_v11 = vld [vmem:[#allocation8 + $0x128] ss:$16 sps:$4 sm:$0xff]   ;;  %v5907_v12 = vld [vmem:[#allocation8 + $0x14c] ss:$16 sps:$4 sm:$0xff]   ;;  %v5902_v13 = vld [vmem:[#allocation8 + $0x140] ss:$16 sps:$4 sm:$0xff]  }
  0xbf   :  { %1296 = vmatpush1.bf16.msra.mxu0 %v5842_v37  ;;  %5109 = vmatmul.mubr.msk.bf16.vlgmr.msra.gmra.mrb[4].mxu1 %vm313_vm0, %v174_v25  ;;  %v5910_v14 = vld [vmem:[#allocation8 + $0x164] ss:$16 sps:$4 sm:$0xff]   ;;  %v5905_v15 = vld [vmem:[#allocation8 + $0x148] ss:$16 sps:$4 sm:$0xff]   ;;  %v5913_v16 = vld [vmem:[#allocation8 + $0x16c] ss:$16 sps:$4 sm:$0xff]   ;;  %v193_v37 = vlaneseq }
  0xc0   :  { %1297 = vmatprep.subr.bf16.mxu0 %v5850_v38  ;;  %1378 = vmatpush1.bf16.msra.mxu1 %v5845_v39  ;;  %v5908_v17 = vld [vmem:[#allocation8 + $0x160] ss:$16 sps:$4 sm:$0xff]   ;;  %v5916_v18 = vld [vmem:[#allocation8 + $0x184] ss:$16 sps:$4 sm:$0xff]   ;;  %v5911_v19 = vld [vmem:[#allocation8 + $0x168] ss:$16 sps:$4 sm:$0xff]  }
  0xc1   :  { %1379 = vmatprep.subr.bf16.mxu1 %v5853_v40  ;;  %v5919_v20 = vld [vmem:[#allocation8 + $0x18c] ss:$16 sps:$4 sm:$0xff]   ;;  %v5914_v21 = vld [vmem:[#allocation8 + $0x180] ss:$16 sps:$4 sm:$0xff]   ;;  %v5922_v22 = vld [vmem:[#allocation8 + $0x1a4] ss:$16 sps:$4 sm:$0xff]  }
  0xc2   :  { %v5917_v23 = vld [vmem:[#allocation8 + $0x188] ss:$16 sps:$4 sm:$0xff]   ;;  %v5925_v24 = vld [vmem:[#allocation8 + $0x1ac] ss:$16 sps:$4 sm:$0xff]   ;;  %v5920_v25 = vld [vmem:[#allocation8 + $0x1a0] ss:$16 sps:$4 sm:$0xff]  }
  0xc3   :  { %1298 = vmatpush1.bf16.msra.mxu0 %v5848_v41  ;;  %v5923_v26 = vld [vmem:[#allocation8 + $0x1a8] ss:$16 sps:$4 sm:$0xff]   ;;  %v5928_v27 = vld [vmem:[#allocation8 + $0x1c4] ss:$16 sps:$4 sm:$0xff]   ;;  %v5931_v28 = vld [vmem:[#allocation8 + $0x1cc] ss:$16 sps:$4 sm:$0xff]  }
  0xc4   :  { %1299 = vmatprep.subr.bf16.mxu0 %v5856_v42  ;;  %1380 = vmatpush1.bf16.msra.mxu1 %v5851_v43  ;;  %v5926_v29 = vld [vmem:[#allocation8 + $0x1c0] ss:$16 sps:$4 sm:$0xff]   ;;  %v5929_v30 = vld [vmem:[#allocation8 + $0x1c8] ss:$16 sps:$4 sm:$0xff]   ;;  %v5934_v31 = vld [vmem:[#allocation8 + $0x1e4] ss:$16 sps:$4 sm:$0xff]  }
  0xc5   :  { %1381 = vmatprep.subr.bf16.mxu1 %v5859_v44  ;;  %v5937_v32 = vld [vmem:[#allocation8 + $0x1ec] ss:$16 sps:$4 sm:$0xff]   ;;  %v5932_v33 = vld [vmem:[#allocation8 + $0x1e0] ss:$16 sps:$4 sm:$0xff]   ;;  %v5935_v34 = vld [vmem:[#allocation8 + $0x1e8] ss:$16 sps:$4 sm:$0xff]  }
  0xc6   :  { %v5940_v35 = vld [vmem:[#allocation8 + $0x204] ss:$16 sps:$4 sm:$0xff]   ;;  %v5943_v36 = vld [vmem:[#allocation8 + $0x20c] ss:$16 sps:$4 sm:$0xff]   ;;  %v7172_v38 = vshrl.u32 %v193_v37, 7 }
  0xc7   :  { %1300 = vmatpush1.bf16.msra.mxu0 %v5854_v45  ;;  %v7174_v39 = vld [vmem:[#allocation7] sm:$0xff] }
  0xc8   :  { %1301 = vmatprep.subr.bf16.mxu0 %v5862_v46  ;;  %1382 = vmatpush1.bf16.msra.mxu1 %v5857_v47  ;;  %v7177_v40 = vsub.s32 0, %v7172_v38  ;;  %v7180_v41 = vsub.s32 1, %v7172_v38  ;;  %v7183_v42 = vsub.s32 3, %v7172_v38  ;;  %v5985_v37 = vld [vmem:[#allocation8 + $0x2ec] ss:$16 sps:$4 sm:$0xff]  }
  0xc9   :  { %1383 = vmatprep.subr.bf16.mxu1 %v5865_v48 }
  0xca   :  { %v196_v43 = vrot.slane %v7174_v39, %v7177_v40  ;;  %v200_v44 = vrot.slane %v7174_v39, %v7180_v41  ;;  %v208_v46 = vrot.slane %v7174_v39, %v7183_v42 }
  0xcb   :  { %1302 = vmatpush1.bf16.msra.mxu0 %v5860_v49 }
  0xcc   :  { %1303 = vmatprep.subr.bf16.mxu0 %v5868_v50  ;;  %1384 = vmatpush1.bf16.msra.mxu1 %v5863_v51 }
  0xcd   :  { %1385 = vmatprep.subr.bf16.mxu1 %v5871_v52 }
  0xcf   :  { %1304 = vmatpush1.bf16.msra.mxu0 %v5866_v53 }
  0xd0   :  { %1305 = vmatprep.subr.bf16.mxu0 %v5874_v54  ;;  %1386 = vmatpush1.bf16.msra.mxu1 %v5869_v55 }
  0xd1   :  { %1387 = vmatprep.subr.bf16.mxu1 %v5877_v56 }
  0xd3   :  { %1306 = vmatpush1.bf16.msra.mxu0 %v5872_v57 }
  0xd4   :  { %1307 = vmatprep.subr.bf16.mxu0 %v5880_v58  ;;  %1388 = vmatpush1.bf16.msra.mxu1 %v5875_v59 }
  0xd5   :  { %1389 = vmatprep.subr.bf16.mxu1 %v5883_v60 }
  0xd7   :  { %1308 = vmatpush1.bf16.msra.mxu0 %v5878_v61  ;;  %v5938_v61 = vld [vmem:[#allocation8 + $0x200] ss:$16 sps:$4 sm:$0xff]  }
  0xd8   :  { %1309 = vmatprep.subr.bf16.mxu0 %v5886_v63  ;;  %1390 = vmatpush1.bf16.msra.mxu1 %v5881_v62  ;;  %v5941_v62 = vld [vmem:[#allocation8 + $0x208] ss:$16 sps:$4 sm:$0xff]  }
  0xd9   :  { %1391 = vmatprep.subr.bf16.mxu1 %v5889_v1  ;;  %v5949_v1 = vld [vmem:[#allocation8 + $0x22c] ss:$16 sps:$4 sm:$0xff]  }
  0xdb   :  { %1310 = vmatpush1.bf16.msra.mxu0 %v5884_v0  ;;  %v5946_v0 = vld [vmem:[#allocation8 + $0x224] ss:$16 sps:$4 sm:$0xff]  }
  0xdc   :  { %1311 = vmatprep.subr.bf16.mxu0 %v5892_v2  ;;  %1392 = vmatpush1.bf16.msra.mxu1 %v5887_v3 }
  0xdd   :  { %1393 = vmatprep.subr.bf16.mxu1 %v5895_v4 }
  0xdf   :  { %1312 = vmatpush1.bf16.msra.mxu0 %v5890_v5 }
  0xe0   :  { %1313 = vmatprep.subr.bf16.mxu0 %v5898_v6  ;;  %1394 = vmatpush1.bf16.msra.mxu1 %v5893_v7  ;;  %v5944_v7 = vld [vmem:[#allocation8 + $0x220] ss:$16 sps:$4 sm:$0xff]  }
  0xe1   :  { %1395 = vmatprep.subr.bf16.mxu1 %v5901_v8  ;;  %v5947_v8 = vld [vmem:[#allocation8 + $0x228] ss:$16 sps:$4 sm:$0xff]  }
  0xe3   :  { %1314 = vmatpush1.bf16.msra.mxu0 %v5896_v9 }
  0xe4   :  { %1315 = vmatprep.subr.bf16.mxu0 %v5904_v10  ;;  %1396 = vmatpush1.bf16.msra.mxu1 %v5899_v11 }
  0xe5   :  { %1397 = vmatprep.subr.bf16.mxu1 %v5907_v12  ;;  %v5952_v12 = vld [vmem:[#allocation8 + $0x244] ss:$16 sps:$4 sm:$0xff]  }
  0xe7   :  { %1316 = vmatpush1.bf16.msra.mxu0 %v5902_v13  ;;  %v5955_v13 = vld [vmem:[#allocation8 + $0x24c] ss:$16 sps:$4 sm:$0xff]  }
  0xe8   :  { %1317 = vmatprep.subr.bf16.mxu0 %v5910_v14  ;;  %1398 = vmatpush1.bf16.msra.mxu1 %v5905_v15 }
  0xe9   :  { %1399 = vmatprep.subr.bf16.mxu1 %v5913_v16 }
  0xeb   :  { %1318 = vmatpush1.bf16.msra.mxu0 %v5908_v17 }
  0xec   :  { %1319 = vmatprep.subr.bf16.mxu0 %v5916_v18  ;;  %1400 = vmatpush1.bf16.msra.mxu1 %v5911_v19  ;;  %v5950_v18 = vld [vmem:[#allocation8 + $0x240] ss:$16 sps:$4 sm:$0xff]   ;;  %v5953_v19 = vld [vmem:[#allocation8 + $0x248] ss:$16 sps:$4 sm:$0xff]  }
  0xed   :  { %1401 = vmatprep.subr.bf16.mxu1 %v5919_v20  ;;  %v5958_v20 = vld [vmem:[#allocation8 + $0x264] ss:$16 sps:$4 sm:$0xff]  }
  0xef   :  { %1320 = vmatpush1.bf16.msra.mxu0 %v5914_v21  ;;  %v5961_v21 = vld [vmem:[#allocation8 + $0x26c] ss:$16 sps:$4 sm:$0xff]  }
  0xf0   :  { %1321 = vmatprep.subr.bf16.mxu0 %v5922_v22  ;;  %1402 = vmatpush1.bf16.msra.mxu1 %v5917_v23  ;;  %v5956_v22 = vld [vmem:[#allocation8 + $0x260] ss:$16 sps:$4 sm:$0xff]   ;;  %v5959_v23 = vld [vmem:[#allocation8 + $0x268] ss:$16 sps:$4 sm:$0xff]  }
  0xf1   :  { %1403 = vmatprep.subr.bf16.mxu1 %v5925_v24  ;;  %v5964_v24 = vld [vmem:[#allocation8 + $0x284] ss:$16 sps:$4 sm:$0xff]  }
  0xf3   :  { %1322 = vmatpush1.bf16.msra.mxu0 %v5920_v25  ;;  %v5967_v25 = vld [vmem:[#allocation8 + $0x28c] ss:$16 sps:$4 sm:$0xff]  }
  0xf4   :  { %1404 = vmatpush1.bf16.msra.mxu1 %v5923_v26  ;;  %1323 = vmatprep.subr.bf16.mxu0 %v5928_v27  ;;  %v5962_v26 = vld [vmem:[#allocation8 + $0x280] ss:$16 sps:$4 sm:$0xff]   ;;  %v5965_v27 = vld [vmem:[#allocation8 + $0x288] ss:$16 sps:$4 sm:$0xff]  }
  0xf5   :  { %1405 = vmatprep.subr.bf16.mxu1 %v5931_v28  ;;  %v5970_v28 = vld [vmem:[#allocation8 + $0x2a4] ss:$16 sps:$4 sm:$0xff]  }
  0xf7   :  { %1324 = vmatpush1.bf16.msra.mxu0 %v5926_v29  ;;  %v5973_v29 = vld [vmem:[#allocation8 + $0x2ac] ss:$16 sps:$4 sm:$0xff]  }
  0xf8   :  { %1406 = vmatpush1.bf16.msra.mxu1 %v5929_v30  ;;  %1325 = vmatprep.subr.bf16.mxu0 %v5934_v31  ;;  %v5968_v30 = vld [vmem:[#allocation8 + $0x2a0] ss:$16 sps:$4 sm:$0xff]   ;;  %v5971_v31 = vld [vmem:[#allocation8 + $0x2a8] ss:$16 sps:$4 sm:$0xff]  }
  0xf9   :  { %1407 = vmatprep.subr.bf16.mxu1 %v5937_v32  ;;  %v5976_v32 = vld [vmem:[#allocation8 + $0x2c4] ss:$16 sps:$4 sm:$0xff]  }
  0xfb   :  { %1326 = vmatpush1.bf16.msra.mxu0 %v5932_v33  ;;  %v5979_v33 = vld [vmem:[#allocation8 + $0x2cc] ss:$16 sps:$4 sm:$0xff]  }
  0xfc   :  { %1408 = vmatpush1.bf16.msra.mxu1 %v5935_v34  ;;  %1336 = vmatprep.subr.bf16.mxu0 %v5940_v35  ;;  %v5974_v34 = vld [vmem:[#allocation8 + $0x2c0] ss:$16 sps:$4 sm:$0xff]   ;;  %v5977_v35 = vld [vmem:[#allocation8 + $0x2c8] ss:$16 sps:$4 sm:$0xff]  }
  0xfd   :  { %1418 = vmatprep.subr.bf16.mxu1 %v5943_v36  ;;  %v5982_v36 = vld [vmem:[#allocation8 + $0x2e4] ss:$16 sps:$4 sm:$0xff]  }
 0x189   :  { %v351_v45 = vpop.f32.mrb[0].mxu0  ;;  %v7191_v51 = vpop.f32.mrb[0].mxu1 }
 0x18a   :  { %v352_v47 = vadd.f32 %v351_v45, %v196_v43  ;;  %v353_v48 = vpop.f32.mrb[1].mxu0  ;;  %v394_v54 = vpop.f32.mrb[1].mxu1  ;;  %v5980_v43 = vld [vmem:[#allocation8 + $0x2e0] ss:$16 sps:$4 sm:$0xff]   ;;  %v5988_v45 = vld [vmem:[#allocation8 + $0x304] ss:$16 sps:$4 sm:$0xff]  }
 0x18b   :  { %v354_v49 = vadd.f32 %v353_v48, %v200_v44  ;;  %v355_v50 = vpop.f32.mrb[2].mxu0  ;;  %v395_v56 = vadd.f32 %v394_v54, %v208_v46  ;;  %v396_v57 = vpop.f32.mrb[2].mxu1  ;;  %v5983_v44 = vld [vmem:[#allocation8 + $0x2e8] ss:$16 sps:$4 sm:$0xff]   ;;  %v5991_v46 = vld [vmem:[#allocation8 + $0x30c] ss:$16 sps:$4 sm:$0xff]  }
 0x18c   :  { %v481_v52 = vmul.f32 0.01, %v352_v47  ;;  %v356_v53 = vpop.f32.mrb[3].mxu0  ;;  %v397_v59 = vpop.f32.mrb[3].mxu1  ;;  %v5989_v48 = vld [vmem:[#allocation8 + $0x308] ss:$16 sps:$4 sm:$0xff]  }
 0x18d   :  { %v482_v55 = vmul.f32 0.01, %v354_v49  ;;  %v484_v63 = vmul.f32 0.01, %v395_v56  ;;  %v5994_v50 = vld [vmem:[#allocation8 + $0x324] ss:$16 sps:$4 sm:$0xff]  }
 0x18e   :  { %v489_v58 = vmax.f32 %v352_v47, %v481_v52  ;;  %v5986_v47 = vld [vmem:[#allocation8 + $0x300] ss:$16 sps:$4 sm:$0xff]   ;;  %v5997_v52 = vld [vmem:[#allocation8 + $0x32c] ss:$16 sps:$4 sm:$0xff]   ;;  %v5995_v54 = vld [vmem:[#allocation8 + $0x328] ss:$16 sps:$4 sm:$0xff]  }
 0x18f   :  { %v490_v60 = vmax.f32 %v354_v49, %v482_v55  ;;  %v492_v3 = vmax.f32 %v395_v56, %v484_v63  ;;  %v7202_v49 = vsub.s32 2, %v7172_v38  ;;  %v5992_v53 = vld [vmem:[#allocation8 + $0x320] ss:$16 sps:$4 sm:$0xff]   ;;  %v6000_v55 = vld [vmem:[#allocation8 + $0x344] ss:$16 sps:$4 sm:$0xff]  }
 0x190   :  { %v497_v5 = vpack.c.bf16 %v489_v58, %v489_v58  ;;  %v6003_v56 = vld [vmem:[#allocation8 + $0x34c] ss:$16 sps:$4 sm:$0xff]   ;;  %v5998_v57 = vld [vmem:[#allocation8 + $0x340] ss:$16 sps:$4 sm:$0xff]   ;;  %v6001_v58 = vld [vmem:[#allocation8 + $0x348] ss:$16 sps:$4 sm:$0xff]  }
 0x191   :  { %v498_v2 = vpack.c.bf16 %v490_v60, %v490_v60  ;;  %v7193_v4 = vpop.f32.mrb[4].mxu0  ;;  %v500_v9 = vpack.c.bf16 %v492_v3, %v492_v3  ;;  %v6006_v59 = vld [vmem:[#allocation8 + $0x364] ss:$16 sps:$4 sm:$0xff]   ;;  %v6009_v60 = vld [vmem:[#allocation8 + $0x36c] ss:$16 sps:$4 sm:$0xff]  }
 0x192   :  { %v7195_v6 = vpop.f32.mrb[5].mxu0  ;;  %v7197_v11 = vpop.f32.mrb[4].mxu1  ;;  %v6012_v63 = vld [vmem:[#allocation8 + $0x384] ss:$16 sps:$4 sm:$0xff]  }
 0x193   :  { %1327 = vmatprep.mubr.bf16.mxu0 %v498_v2  ;;  %1409 = vmatprep.mubr.bf16.mxu1 %v498_v2  ;;  %v437_v10 = vpop.f32.mrb[6].mxu0  ;;  %v7199_v15 = vpop.f32.mrb[5].mxu1  ;;  %v6013_v2 = vld [vmem:[#allocation8 + $0x388] ss:$16 sps:$4 sm:$0xff]   ;;  %v6018_v3 = vld [vmem:[#allocation8 + $0x3a4] ss:$16 sps:$4 sm:$0xff]  }
 0x194   :  { %1328 = vmatmul.mubr.bf16.vlgmr.msra.gmra.mrb[8].mxu0 %v497_v5  ;;  %1410 = vmatmul.mubr.bf16.vlgmr.msra.gmra.mrb[8].mxu1 %v497_v5  ;;  %v438_v14 = vpop.f32.mrb[7].mxu0  ;;  %v478_v16 = vpop.f32.mrb[6].mxu1  ;;  %v6021_v5 = vld [vmem:[#allocation8 + $0x3ac] ss:$16 sps:$4 sm:$0xff]  }
 0x195   :  { %1337 = vmatpush1.bf16.msra.mxu0 %v5938_v61  ;;  %1419 = vmatpush1.bf16.msra.mxu1 %v5941_v62  ;;  %v479_v17 = vpop.f32.mrb[7].mxu1  ;;  %v6004_v61 = vld [vmem:[#allocation8 + $0x360] ss:$16 sps:$4 sm:$0xff]   ;;  %v6007_v62 = vld [vmem:[#allocation8 + $0x368] ss:$16 sps:$4 sm:$0xff]  }
 0x196   :  { %1338 = vmatprep.subr.bf16.mxu0 %v5946_v0  ;;  %1420 = vmatprep.subr.bf16.mxu1 %v5949_v1  ;;  %v6015_v0 = vld [vmem:[#allocation8 + $0x38c] ss:$16 sps:$4 sm:$0xff]   ;;  %v6010_v1 = vld [vmem:[#allocation8 + $0x380] ss:$16 sps:$4 sm:$0xff]   ;;  %v6025_v16 = vld [vmem:[#allocation8 + $0x3c8] ss:$16 sps:$4 sm:$0xff]  }
 0x197   :  { %1368 = vmatprep.mubr.bf16.mxu0 %v500_v9  ;;  %1450 = vmatprep.mubr.bf16.mxu1 %v500_v9  ;;  %v6019_v9 = vld [vmem:[#allocation8 + $0x3a8] ss:$16 sps:$4 sm:$0xff]   ;;  %v6022_v14 = vld [vmem:[#allocation8 + $0x3c0] ss:$16 sps:$4 sm:$0xff]  }
 0x199   :  { %1339 = vmatpush1.bf16.msra.mxu0 %v5944_v7  ;;  %1421 = vmatpush1.bf16.msra.mxu1 %v5947_v8  ;;  %v204_v7 = vrot.slane %v7174_v39, %v7202_v49  ;;  %v6016_v8 = vld [vmem:[#allocation8 + $0x3a0] ss:$16 sps:$4 sm:$0xff]  }
 0x19a   :  { %1340 = vmatprep.subr.bf16.mxu0 %v5952_v12  ;;  %1422 = vmatprep.subr.bf16.mxu1 %v5955_v13  ;;  %v6024_v12 = vld [vmem:[#allocation8 + $0x3c4] ss:$16 sps:$4 sm:$0xff]   ;;  %v6027_v13 = vld [vmem:[#allocation8 + $0x3cc] ss:$16 sps:$4 sm:$0xff]   ;;  %v6028_v39 = vld [vmem:[#allocation8 + $0x3e0] ss:$16 sps:$4 sm:$0xff]  }
 0x19b   :  { %v393_v10 = vadd.f32 %v7191_v51, %v204_v7  ;;  %v6036_v51 = vld [vmem:[#allocation10 + $0x4] ss:$16 sps:$4 sm:$0xff]  }
 0x19c   :  { %v6096_v7 = vld [vmem:[#allocation10 + $0x144] ss:$16 sps:$4 sm:$0xff]  }
 0x19d   :  { %1341 = vmatpush1.bf16.msra.mxu0 %v5950_v18  ;;  %1423 = vmatpush1.bf16.msra.mxu1 %v5953_v19  ;;  %v483_v17 = vmul.f32 0.01, %v393_v10  ;;  %v6030_v18 = vld [vmem:[#allocation8 + $0x3e4] ss:$16 sps:$4 sm:$0xff]   ;;  %v6033_v19 = vld [vmem:[#allocation8 + $0x3ec] ss:$16 sps:$4 sm:$0xff]  }
 0x19e   :  { %1342 = vmatprep.subr.bf16.mxu0 %v5958_v20  ;;  %1424 = vmatprep.subr.bf16.mxu1 %v5961_v21  ;;  %v6031_v20 = vld [vmem:[#allocation8 + $0x3e8] ss:$16 sps:$4 sm:$0xff]  }
 0x19f   :  { %v491_v21 = vmax.f32 %v393_v10, %v483_v17  ;;  %v6097_v10 = vld [vmem:[#allocation10 + $0x148] ss:$16 sps:$4 sm:$0xff]   ;;  %v6108_v17 = vld [vmem:[#allocation10 + $0x184] ss:$16 sps:$4 sm:$0xff]  }
 0x1a1   :  { %1343 = vmatpush1.bf16.msra.mxu0 %v5956_v22  ;;  %1425 = vmatpush1.bf16.msra.mxu1 %v5959_v23  ;;  %v6039_v22 = vld [vmem:[#allocation10 + $0xc] ss:$16 sps:$4 sm:$0xff]   ;;  %v6034_v23 = vld [vmem:[#allocation10] ss:$16 sps:$4 sm:$0xff]  }
 0x1a2   :  { %1344 = vmatprep.subr.bf16.mxu0 %v5964_v24  ;;  %1426 = vmatprep.subr.bf16.mxu1 %v5967_v25  ;;  %v6037_v24 = vld [vmem:[#allocation10 + $0x8] ss:$16 sps:$4 sm:$0xff]   ;;  %v499_v25 = vpack.c.bf16 %v491_v21, %v491_v21  ;;  %v6117_v21 = vld [vmem:[#allocation10 + $0x1ac] ss:$16 sps:$4 sm:$0xff]  }
 0x1a5   :  { %1345 = vmatpush1.bf16.msra.mxu0 %v5962_v26  ;;  %1427 = vmatpush1.bf16.msra.mxu1 %v5965_v27  ;;  %v6042_v26 = vld [vmem:[#allocation10 + $0x24] ss:$16 sps:$4 sm:$0xff]   ;;  %v6045_v27 = vld [vmem:[#allocation10 + $0x2c] ss:$16 sps:$4 sm:$0xff]  }
 0x1a6   :  { %1346 = vmatprep.subr.bf16.mxu0 %v5970_v28  ;;  %1428 = vmatprep.subr.bf16.mxu1 %v5973_v29  ;;  %v6040_v28 = vld [vmem:[#allocation10 + $0x20] ss:$16 sps:$4 sm:$0xff]   ;;  %v6043_v29 = vld [vmem:[#allocation10 + $0x28] ss:$16 sps:$4 sm:$0xff]  }
 0x1a9   :  { %1347 = vmatpush1.bf16.msra.mxu0 %v5968_v30  ;;  %1429 = vmatpush1.bf16.msra.mxu1 %v5971_v31  ;;  %v6048_v30 = vld [vmem:[#allocation10 + $0x44] ss:$16 sps:$4 sm:$0xff]   ;;  %v6051_v31 = vld [vmem:[#allocation10 + $0x4c] ss:$16 sps:$4 sm:$0xff]  }
 0x1aa   :  { %1348 = vmatprep.subr.bf16.mxu0 %v5976_v32  ;;  %1430 = vmatprep.subr.bf16.mxu1 %v5979_v33  ;;  %v6046_v32 = vld [vmem:[#allocation10 + $0x40] ss:$16 sps:$4 sm:$0xff]   ;;  %v6049_v33 = vld [vmem:[#allocation10 + $0x48] ss:$16 sps:$4 sm:$0xff]  }
 0x1ad   :  { %1349 = vmatpush1.bf16.msra.mxu0 %v5974_v34  ;;  %1431 = vmatpush1.bf16.msra.mxu1 %v5977_v35  ;;  %v6054_v34 = vld [vmem:[#allocation10 + $0x64] ss:$16 sps:$4 sm:$0xff]   ;;  %v6057_v35 = vld [vmem:[#allocation10 + $0x6c] ss:$16 sps:$4 sm:$0xff]  }
 0x1ae   :  { %1350 = vmatprep.subr.bf16.mxu0 %v5982_v36  ;;  %1432 = vmatprep.subr.bf16.mxu1 %v5985_v37  ;;  %v6052_v36 = vld [vmem:[#allocation10 + $0x60] ss:$16 sps:$4 sm:$0xff]   ;;  %v6055_v37 = vld [vmem:[#allocation10 + $0x68] ss:$16 sps:$4 sm:$0xff]  }
 0x1b1   :  { %1351 = vmatpush1.bf16.msra.mxu0 %v5980_v43  ;;  %1433 = vmatpush1.bf16.msra.mxu1 %v5983_v44  ;;  %v6060_v43 = vld [vmem:[#allocation10 + $0x84] ss:$16 sps:$4 sm:$0xff]   ;;  %v6063_v44 = vld [vmem:[#allocation10 + $0x8c] ss:$16 sps:$4 sm:$0xff]  }
 0x1b2   :  { %1352 = vmatprep.subr.bf16.mxu0 %v5988_v45  ;;  %1434 = vmatprep.subr.bf16.mxu1 %v5991_v46  ;;  %v6058_v45 = vld [vmem:[#allocation10 + $0x80] ss:$16 sps:$4 sm:$0xff]   ;;  %v6061_v46 = vld [vmem:[#allocation10 + $0x88] ss:$16 sps:$4 sm:$0xff]  }
 0x1b5   :  { %1353 = vmatpush1.bf16.msra.mxu0 %v5986_v47  ;;  %1435 = vmatpush1.bf16.msra.mxu1 %v5989_v48  ;;  %v6066_v47 = vld [vmem:[#allocation10 + $0xa4] ss:$16 sps:$4 sm:$0xff]   ;;  %v6069_v48 = vld [vmem:[#allocation10 + $0xac] ss:$16 sps:$4 sm:$0xff]  }
 0x1b6   :  { %1354 = vmatprep.subr.bf16.mxu0 %v5994_v50  ;;  %1436 = vmatprep.subr.bf16.mxu1 %v5997_v52  ;;  %v6064_v50 = vld [vmem:[#allocation10 + $0xa0] ss:$16 sps:$4 sm:$0xff]   ;;  %v6067_v52 = vld [vmem:[#allocation10 + $0xa8] ss:$16 sps:$4 sm:$0xff]  }
 0x1b9   :  { %1355 = vmatpush1.bf16.msra.mxu0 %v5992_v53  ;;  %1437 = vmatpush1.bf16.msra.mxu1 %v5995_v54  ;;  %v6072_v53 = vld [vmem:[#allocation10 + $0xc4] ss:$16 sps:$4 sm:$0xff]   ;;  %v6075_v54 = vld [vmem:[#allocation10 + $0xcc] ss:$16 sps:$4 sm:$0xff]  }
 0x1ba   :  { %1356 = vmatprep.subr.bf16.mxu0 %v6000_v55  ;;  %1438 = vmatprep.subr.bf16.mxu1 %v6003_v56  ;;  %v6070_v55 = vld [vmem:[#allocation10 + $0xc0] ss:$16 sps:$4 sm:$0xff]   ;;  %v6073_v56 = vld [vmem:[#allocation10 + $0xc8] ss:$16 sps:$4 sm:$0xff]  }
 0x1bd   :  { %1357 = vmatpush1.bf16.msra.mxu0 %v5998_v57  ;;  %1439 = vmatpush1.bf16.msra.mxu1 %v6001_v58  ;;  %v6078_v57 = vld [vmem:[#allocation10 + $0xe4] ss:$16 sps:$4 sm:$0xff]   ;;  %v6081_v58 = vld [vmem:[#allocation10 + $0xec] ss:$16 sps:$4 sm:$0xff]  }
 0x1be   :  { %1358 = vmatprep.subr.bf16.mxu0 %v6006_v59  ;;  %1440 = vmatprep.subr.bf16.mxu1 %v6009_v60  ;;  %v6076_v59 = vld [vmem:[#allocation10 + $0xe0] ss:$16 sps:$4 sm:$0xff]   ;;  %v6079_v60 = vld [vmem:[#allocation10 + $0xe8] ss:$16 sps:$4 sm:$0xff]  }
 0x1c1   :  { %1359 = vmatpush1.bf16.msra.mxu0 %v6004_v61  ;;  %1441 = vmatpush1.bf16.msra.mxu1 %v6007_v62  ;;  %v6084_v61 = vld [vmem:[#allocation10 + $0x104] ss:$16 sps:$4 sm:$0xff]   ;;  %v6087_v62 = vld [vmem:[#allocation10 + $0x10c] ss:$16 sps:$4 sm:$0xff]  }
 0x1c2   :  { %1360 = vmatprep.subr.bf16.mxu0 %v6012_v63  ;;  %1442 = vmatprep.subr.bf16.mxu1 %v6015_v0  ;;  %v6082_v63 = vld [vmem:[#allocation10 + $0x100] ss:$16 sps:$4 sm:$0xff]   ;;  %v6085_v0 = vld [vmem:[#allocation10 + $0x108] ss:$16 sps:$4 sm:$0xff]  }
 0x1c5   :  { %1361 = vmatpush1.bf16.msra.mxu0 %v6010_v1  ;;  %1443 = vmatpush1.bf16.msra.mxu1 %v6013_v2  ;;  %v6090_v1 = vld [vmem:[#allocation10 + $0x124] ss:$16 sps:$4 sm:$0xff]   ;;  %v6093_v2 = vld [vmem:[#allocation10 + $0x12c] ss:$16 sps:$4 sm:$0xff]  }
 0x1c6   :  { %1362 = vmatprep.subr.bf16.mxu0 %v6018_v3  ;;  %1444 = vmatprep.subr.bf16.mxu1 %v6021_v5  ;;  %v6088_v3 = vld [vmem:[#allocation10 + $0x120] ss:$16 sps:$4 sm:$0xff]   ;;  %v6091_v5 = vld [vmem:[#allocation10 + $0x128] ss:$16 sps:$4 sm:$0xff]  }
 0x1c9   :  { %1363 = vmatpush1.bf16.msra.mxu0 %v6016_v8  ;;  %1445 = vmatpush1.bf16.msra.mxu1 %v6019_v9  ;;  %v6099_v8 = vld [vmem:[#allocation10 + $0x14c] ss:$16 sps:$4 sm:$0xff]   ;;  %v6094_v9 = vld [vmem:[#allocation10 + $0x140] ss:$16 sps:$4 sm:$0xff]  }
 0x1ca   :  { %1364 = vmatprep.subr.bf16.mxu0 %v6024_v12  ;;  %1446 = vmatprep.subr.bf16.mxu1 %v6027_v13  ;;  %v6102_v12 = vld [vmem:[#allocation10 + $0x164] ss:$16 sps:$4 sm:$0xff]   ;;  %v6105_v13 = vld [vmem:[#allocation10 + $0x16c] ss:$16 sps:$4 sm:$0xff]  }
 0x1cd   :  { %1365 = vmatpush1.bf16.msra.mxu0 %v6022_v14  ;;  %1447 = vmatpush1.bf16.msra.mxu1 %v6025_v16  ;;  %v6100_v14 = vld [vmem:[#allocation10 + $0x160] ss:$16 sps:$4 sm:$0xff]   ;;  %v6103_v16 = vld [vmem:[#allocation10 + $0x168] ss:$16 sps:$4 sm:$0xff]  }
 0x1ce   :  { %1366 = vmatprep.subr.bf16.mxu0 %v6030_v18  ;;  %1448 = vmatprep.subr.bf16.mxu1 %v6033_v19  ;;  %v6111_v18 = vld [vmem:[#allocation10 + $0x18c] ss:$16 sps:$4 sm:$0xff]   ;;  %v6106_v19 = vld [vmem:[#allocation10 + $0x180] ss:$16 sps:$4 sm:$0xff]  }
 0x1d1   :  { %1367 = vmatpush1.bf16.msra.mxu0 %v6028_v39  ;;  %1449 = vmatpush1.bf16.msra.mxu1 %v6031_v20  ;;  %v6109_v39 = vld [vmem:[#allocation10 + $0x188] ss:$16 sps:$4 sm:$0xff]   ;;  %v6114_v20 = vld [vmem:[#allocation10 + $0x1a4] ss:$16 sps:$4 sm:$0xff]  }
 0x1d2   :  { %2261 = vmatprep.subr.bf16.mxu0 %v6036_v51  ;;  %2343 = vmatprep.subr.bf16.mxu1 %v6039_v22  ;;  %v6112_v51 = vld [vmem:[#allocation10 + $0x1a0] ss:$16 sps:$4 sm:$0xff]   ;;  %v6115_v22 = vld [vmem:[#allocation10 + $0x1a8] ss:$16 sps:$4 sm:$0xff]  }
 0x1d4   :  { %1369 = vmatmul.mubr.bf16.vlgmr.msra.gmra.mrb[8].mxu0 %v499_v25  ;;  %1451 = vmatmul.mubr.bf16.vlgmr.msra.gmra.mrb[8].mxu1 %v499_v25  ;;  %v6118_v25 = vld [vmem:[#allocation10 + $0x1c0] ss:$16 sps:$4 sm:$0xff]  }
 0x1d5   :  { %2262 = vmatpush1.bf16.msra.mxu0 %v6034_v23  ;;  %2344 = vmatpush1.bf16.msra.mxu1 %v6037_v24  ;;  %v6120_v23 = vld [vmem:[#allocation10 + $0x1c4] ss:$16 sps:$4 sm:$0xff]   ;;  %v6123_v24 = vld [vmem:[#allocation10 + $0x1cc] ss:$16 sps:$4 sm:$0xff]  }
 0x1d6   :  { %2263 = vmatprep.subr.bf16.mxu0 %v6042_v26  ;;  %2345 = vmatprep.subr.bf16.mxu1 %v6045_v27  ;;  %v6121_v26 = vld [vmem:[#allocation10 + $0x1c8] ss:$16 sps:$4 sm:$0xff]   ;;  %v6126_v27 = vld [vmem:[#allocation10 + $0x1e4] ss:$16 sps:$4 sm:$0xff]  }
 0x1d9   :  { %2264 = vmatpush1.bf16.msra.mxu0 %v6040_v28  ;;  %2346 = vmatpush1.bf16.msra.mxu1 %v6043_v29  ;;  %v6129_v28 = vld [vmem:[#allocation10 + $0x1ec] ss:$16 sps:$4 sm:$0xff]   ;;  %v6124_v29 = vld [vmem:[#allocation10 + $0x1e0] ss:$16 sps:$4 sm:$0xff]  }
 0x1da   :  { %2265 = vmatprep.subr.bf16.mxu0 %v6048_v30  ;;  %2347 = vmatprep.subr.bf16.mxu1 %v6051_v31  ;;  %v6127_v30 = vld [vmem:[#allocation10 + $0x1e8] ss:$16 sps:$4 sm:$0xff]   ;;  %v6132_v31 = vld [vmem:[#allocation10 + $0x204] ss:$16 sps:$4 sm:$0xff]  }
 0x1dd   :  { %2266 = vmatpush1.bf16.msra.mxu0 %v6046_v32  ;;  %2348 = vmatpush1.bf16.msra.mxu1 %v6049_v33  ;;  %v6135_v32 = vld [vmem:[#allocation10 + $0x20c] ss:$16 sps:$4 sm:$0xff]   ;;  %v7210_v33 = vld [vmem:[%s7301_s4] sm:$0xf] }
 0x1de   :  { %2267 = vmatprep.subr.bf16.mxu0 %v6054_v34  ;;  %2349 = vmatprep.subr.bf16.mxu1 %v6057_v35  ;;  %v638_v34 = vrot.slane %v7210_v33, %v7177_v40  ;;  %v642_v35 = vrot.slane %v7210_v33, %v7180_v41 }
 0x1e1   :  { %2268 = vmatpush1.bf16.msra.mxu0 %v6052_v36  ;;  %2350 = vmatpush1.bf16.msra.mxu1 %v6055_v37  ;;  %v650_v36 = vrot.slane %v7210_v33, %v7183_v42 }
 0x1e2   :  { %2269 = vmatprep.subr.bf16.mxu0 %v6060_v43  ;;  %2351 = vmatprep.subr.bf16.mxu1 %v6063_v44 }
 0x1e5   :  { %2270 = vmatpush1.bf16.msra.mxu0 %v6058_v45  ;;  %2352 = vmatpush1.bf16.msra.mxu1 %v6061_v46 }
 0x1e6   :  { %2271 = vmatprep.subr.bf16.mxu0 %v6066_v47  ;;  %2353 = vmatprep.subr.bf16.mxu1 %v6069_v48 }
 0x1e9   :  { %2272 = vmatpush1.bf16.msra.mxu0 %v6064_v50  ;;  %2354 = vmatpush1.bf16.msra.mxu1 %v6067_v52 }
 0x1ea   :  { %2273 = vmatprep.subr.bf16.mxu0 %v6072_v53  ;;  %2355 = vmatprep.subr.bf16.mxu1 %v6075_v54 }
 0x1ed   :  { %2274 = vmatpush1.bf16.msra.mxu0 %v6070_v55  ;;  %2356 = vmatpush1.bf16.msra.mxu1 %v6073_v56 }
 0x1ee   :  { %2275 = vmatprep.subr.bf16.mxu0 %v6078_v57  ;;  %2357 = vmatprep.subr.bf16.mxu1 %v6081_v58 }
 0x1f1   :  { %2276 = vmatpush1.bf16.msra.mxu0 %v6076_v59  ;;  %2358 = vmatpush1.bf16.msra.mxu1 %v6079_v60 }
 0x1f2   :  { %2277 = vmatprep.subr.bf16.mxu0 %v6084_v61  ;;  %2359 = vmatprep.subr.bf16.mxu1 %v6087_v62  ;;  %v6130_v62 = vld [vmem:[#allocation10 + $0x200] ss:$16 sps:$4 sm:$0xff]  }
 0x1f5   :  { %2278 = vmatpush1.bf16.msra.mxu0 %v6082_v63  ;;  %2360 = vmatpush1.bf16.msra.mxu1 %v6085_v0  ;;  %v6133_v63 = vld [vmem:[#allocation10 + $0x208] ss:$16 sps:$4 sm:$0xff]  }
 0x1f6   :  { %2279 = vmatprep.subr.bf16.mxu0 %v6090_v1  ;;  %2361 = vmatprep.subr.bf16.mxu1 %v6093_v2  ;;  %v6138_v1 = vld [vmem:[#allocation10 + $0x224] ss:$16 sps:$4 sm:$0xff]   ;;  %v6141_v2 = vld [vmem:[#allocation10 + $0x22c] ss:$16 sps:$4 sm:$0xff]  }
 0x1f9   :  { %2280 = vmatpush1.bf16.msra.mxu0 %v6088_v3  ;;  %2362 = vmatpush1.bf16.msra.mxu1 %v6091_v5  ;;  %v6136_v5 = vld [vmem:[#allocation10 + $0x220] ss:$16 sps:$4 sm:$0xff]  }
 0x1fa   :  { %2281 = vmatprep.subr.bf16.mxu0 %v6096_v7  ;;  %2363 = vmatprep.subr.bf16.mxu1 %v6099_v8  ;;  %v6139_v7 = vld [vmem:[#allocation10 + $0x228] ss:$16 sps:$4 sm:$0xff]   ;;  %v6144_v8 = vld [vmem:[#allocation10 + $0x244] ss:$16 sps:$4 sm:$0xff]  }
 0x1fd   :  { %2282 = vmatpush1.bf16.msra.mxu0 %v6094_v9  ;;  %2364 = vmatpush1.bf16.msra.mxu1 %v6097_v10  ;;  %v6147_v9 = vld [vmem:[#allocation10 + $0x24c] ss:$16 sps:$4 sm:$0xff]   ;;  %v6142_v10 = vld [vmem:[#allocation10 + $0x240] ss:$16 sps:$4 sm:$0xff]  }
 0x1fe   :  { %2283 = vmatprep.subr.bf16.mxu0 %v6102_v12  ;;  %2365 = vmatprep.subr.bf16.mxu1 %v6105_v13  ;;  %v6145_v12 = vld [vmem:[#allocation10 + $0x248] ss:$16 sps:$4 sm:$0xff]   ;;  %v6150_v13 = vld [vmem:[#allocation10 + $0x264] ss:$16 sps:$4 sm:$0xff]  }
 0x201   :  { %2284 = vmatpush1.bf16.msra.mxu0 %v6100_v14  ;;  %2366 = vmatpush1.bf16.msra.mxu1 %v6103_v16  ;;  %v6153_v14 = vld [vmem:[#allocation10 + $0x26c] ss:$16 sps:$4 sm:$0xff]   ;;  %v6148_v16 = vld [vmem:[#allocation10 + $0x260] ss:$16 sps:$4 sm:$0xff]  }
 0x202   :  { %2285 = vmatprep.subr.bf16.mxu0 %v6108_v17  ;;  %2367 = vmatprep.subr.bf16.mxu1 %v6111_v18  ;;  %v6151_v17 = vld [vmem:[#allocation10 + $0x268] ss:$16 sps:$4 sm:$0xff]   ;;  %v6156_v18 = vld [vmem:[#allocation10 + $0x284] ss:$16 sps:$4 sm:$0xff]  }
 0x205   :  { %2286 = vmatpush1.bf16.msra.mxu0 %v6106_v19  ;;  %2368 = vmatpush1.bf16.msra.mxu1 %v6109_v39  ;;  %v6159_v19 = vld [vmem:[#allocation10 + $0x28c] ss:$16 sps:$4 sm:$0xff]   ;;  %v6154_v39 = vld [vmem:[#allocation10 + $0x280] ss:$16 sps:$4 sm:$0xff]  }
 0x206   :  { %2287 = vmatprep.subr.bf16.mxu0 %v6114_v20  ;;  %2369 = vmatprep.subr.bf16.mxu1 %v6117_v21  ;;  %v6157_v20 = vld [vmem:[#allocation10 + $0x288] ss:$16 sps:$4 sm:$0xff]   ;;  %v6162_v21 = vld [vmem:[#allocation10 + $0x2a4] ss:$16 sps:$4 sm:$0xff]  }
 0x209   :  { %2288 = vmatpush1.bf16.msra.mxu0 %v6112_v51  ;;  %2370 = vmatpush1.bf16.msra.mxu1 %v6115_v22  ;;  %v6165_v51 = vld [vmem:[#allocation10 + $0x2ac] ss:$16 sps:$4 sm:$0xff]   ;;  %v6160_v22 = vld [vmem:[#allocation10 + $0x2a0] ss:$16 sps:$4 sm:$0xff]  }
 0x20a   :  { %2289 = vmatprep.subr.bf16.mxu0 %v6120_v23  ;;  %2371 = vmatprep.subr.bf16.mxu1 %v6123_v24  ;;  %v6163_v23 = vld [vmem:[#allocation10 + $0x2a8] ss:$16 sps:$4 sm:$0xff]   ;;  %v6168_v24 = vld [vmem:[#allocation10 + $0x2c4] ss:$16 sps:$4 sm:$0xff]  }
 0x20d   :  { %2290 = vmatpush1.bf16.msra.mxu0 %v6118_v25  ;;  %2372 = vmatpush1.bf16.msra.mxu1 %v6121_v26  ;;  %v6171_v25 = vld [vmem:[#allocation10 + $0x2cc] ss:$16 sps:$4 sm:$0xff]   ;;  %v6166_v26 = vld [vmem:[#allocation10 + $0x2c0] ss:$16 sps:$4 sm:$0xff]  }
 0x20e   :  { %2291 = vmatprep.subr.bf16.mxu0 %v6126_v27  ;;  %2373 = vmatprep.subr.bf16.mxu1 %v6129_v28  ;;  %v6169_v27 = vld [vmem:[#allocation10 + $0x2c8] ss:$16 sps:$4 sm:$0xff]   ;;  %v6174_v28 = vld [vmem:[#allocation10 + $0x2e4] ss:$16 sps:$4 sm:$0xff]  }
 0x211   :  { %2292 = vmatpush1.bf16.msra.mxu0 %v6124_v29  ;;  %2374 = vmatpush1.bf16.msra.mxu1 %v6127_v30  ;;  %v6177_v29 = vld [vmem:[#allocation10 + $0x2ec] ss:$16 sps:$4 sm:$0xff]   ;;  %v6172_v30 = vld [vmem:[#allocation10 + $0x2e0] ss:$16 sps:$4 sm:$0xff]  }
 0x212   :  { %2302 = vmatprep.subr.bf16.mxu0 %v6132_v31  ;;  %2384 = vmatprep.subr.bf16.mxu1 %v6135_v32  ;;  %v6175_v31 = vld [vmem:[#allocation10 + $0x2e8] ss:$16 sps:$4 sm:$0xff]   ;;  %v6180_v32 = vld [vmem:[#allocation10 + $0x304] ss:$16 sps:$4 sm:$0xff]  }
 0x2a7   :  { %v1370_v37 = vpop.f32.mrb[8].mxu0  ;;  %v7218_v43 = vpop.f32.mrb[8].mxu1 }
 0x2a8   :  { %v5776_v44 = vadd.f32 %v1370_v37, %v638_v34  ;;  %v1372_v45 = vpop.f32.mrb[9].mxu0  ;;  %v1454_v46 = vpop.f32.mrb[9].mxu1  ;;  %v6183_v34 = vld [vmem:[#allocation10 + $0x30c] ss:$16 sps:$4 sm:$0xff]   ;;  %v6186_v37 = vld [vmem:[#allocation10 + $0x324] ss:$16 sps:$4 sm:$0xff]  }
 0x2a9   :  { %v5777_v47 = vadd.f32 %v1372_v45, %v642_v35  ;;  %v5779_v48 = vadd.f32 %v1454_v46, %v650_v36  ;;  %v1374_v50 = vpop.f32.mrb[10].mxu0  ;;  %v1456_v52 = vpop.f32.mrb[10].mxu1  ;;  %v6178_v35 = vld [vmem:[#allocation10 + $0x300] ss:$16 sps:$4 sm:$0xff]   ;;  %v6181_v36 = vld [vmem:[#allocation10 + $0x308] ss:$16 sps:$4 sm:$0xff]  }
 0x2aa   :  { %v1459_v53 = vmul.f32 0.01, %v5776_v44  ;;  %v1375_v54 = vpop.f32.mrb[11].mxu0  ;;  %v1457_v55 = vpop.f32.mrb[11].mxu1  ;;  %v6184_v45 = vld [vmem:[#allocation10 + $0x320] ss:$16 sps:$4 sm:$0xff]  }
 0x2ab   :  { %v1460_v56 = vmul.f32 0.01, %v5777_v47  ;;  %v1462_v57 = vmul.f32 0.01, %v5779_v48  ;;  %v6187_v46 = vld [vmem:[#allocation10 + $0x328] ss:$16 sps:$4 sm:$0xff]  }
 0x2ac   :  { %v1463_v58 = vmax.f32 %v5776_v44, %v1459_v53  ;;  %v6189_v44 = vld [vmem:[#allocation10 + $0x32c] ss:$16 sps:$4 sm:$0xff]   ;;  %v6190_v50 = vld [vmem:[#allocation10 + $0x340] ss:$16 sps:$4 sm:$0xff]   ;;  %v6193_v52 = vld [vmem:[#allocation10 + $0x348] ss:$16 sps:$4 sm:$0xff]  }
 0x2ad   :  { %v1464_v59 = vmax.f32 %v5777_v47, %v1460_v56  ;;  %v1466_v60 = vmax.f32 %v5779_v48, %v1462_v57  ;;  %v6192_v47 = vld [vmem:[#allocation10 + $0x344] ss:$16 sps:$4 sm:$0xff]   ;;  %v6195_v48 = vld [vmem:[#allocation10 + $0x34c] ss:$16 sps:$4 sm:$0xff]   ;;  %v6196_v55 = vld [vmem:[#allocation10 + $0x360] ss:$16 sps:$4 sm:$0xff]  }
 0x2ae   :  { %v1467_v0 = vpack.c.bf16 %v1463_v58, %v1463_v58  ;;  %v6198_v53 = vld [vmem:[#allocation10 + $0x364] ss:$16 sps:$4 sm:$0xff]   ;;  %v6201_v54 = vld [vmem:[#allocation10 + $0x36c] ss:$16 sps:$4 sm:$0xff]   ;;  %v6199_v56 = vld [vmem:[#allocation10 + $0x368] ss:$16 sps:$4 sm:$0xff]  }
 0x2af   :  { %v1468_v61 = vpack.c.bf16 %v1464_v59, %v1464_v59  ;;  %v1470_v3 = vpack.c.bf16 %v1466_v60, %v1466_v60  ;;  %v6204_v57 = vld [vmem:[#allocation10 + $0x384] ss:$16 sps:$4 sm:$0xff]   ;;  %v6207_v58 = vld [vmem:[#allocation10 + $0x38c] ss:$16 sps:$4 sm:$0xff]   ;;  %v6202_v59 = vld [vmem:[#allocation10 + $0x380] ss:$16 sps:$4 sm:$0xff]  }
 0x2b0   :  { %v6205_v60 = vld [vmem:[#allocation10 + $0x388] ss:$16 sps:$4 sm:$0xff]  }
 0x2b1   :  { %2293 = vmatprep.mubr.bf16.mxu0 %v1468_v61  ;;  %2375 = vmatprep.mubr.bf16.mxu1 %v1468_v61  ;;  %v646_v61 = vrot.slane %v7210_v33, %v7202_v49  ;;  %v6222_v33 = vld [vmem:[#allocation10 + $0x3e4] ss:$16 sps:$4 sm:$0xff]  }
 0x2b2   :  { %2294 = vmatmul.mubr.bf16.vlgmr.msra.gmra.mrb[12].mxu0 %v1467_v0  ;;  %2376 = vmatmul.mubr.bf16.vlgmr.msra.gmra.mrb[12].mxu1 %v1467_v0  ;;  %v6208_v0 = vld [vmem:[#allocation10 + $0x3a0] ss:$16 sps:$4 sm:$0xff]  }
 0x2b3   :  { %2303 = vmatpush1.bf16.msra.mxu0 %v6130_v62  ;;  %2385 = vmatpush1.bf16.msra.mxu1 %v6133_v63  ;;  %v6210_v62 = vld [vmem:[#allocation10 + $0x3a4] ss:$16 sps:$4 sm:$0xff]   ;;  %v6213_v63 = vld [vmem:[#allocation10 + $0x3ac] ss:$16 sps:$4 sm:$0xff]  }
 0x2b4   :  { %2334 = vmatprep.mubr.bf16.mxu0 %v1470_v3  ;;  %2416 = vmatprep.mubr.bf16.mxu1 %v1470_v3  ;;  %v6216_v3 = vld [vmem:[#allocation10 + $0x3c4] ss:$16 sps:$4 sm:$0xff]  }
 0x2b5   :  { %2304 = vmatprep.subr.bf16.mxu0 %v6138_v1  ;;  %2386 = vmatprep.subr.bf16.mxu1 %v6141_v2  ;;  %v6211_v1 = vld [vmem:[#allocation10 + $0x3a8] ss:$16 sps:$4 sm:$0xff]   ;;  %v5778_v2 = vadd.f32 %v7218_v43, %v646_v61  ;;  %v6228_v43 = vld [vmem:[#allocation11 + $0x4] ss:$16 sps:$4 sm:$0xff]   ;;  %v6280_v61 = vld [vmem:[#allocation11 + $0x120] ss:$16 sps:$4 sm:$0xff]  }
 0x2b7   :  { %2305 = vmatpush1.bf16.msra.mxu0 %v6136_v5  ;;  %2387 = vmatpush1.bf16.msra.mxu1 %v6139_v7  ;;  %v6219_v5 = vld [vmem:[#allocation10 + $0x3cc] ss:$16 sps:$4 sm:$0xff]   ;;  %v6214_v7 = vld [vmem:[#allocation10 + $0x3c0] ss:$16 sps:$4 sm:$0xff]  }
 0x2b8   :  { %2306 = vmatprep.subr.bf16.mxu0 %v6144_v8  ;;  %2388 = vmatprep.subr.bf16.mxu1 %v6147_v9  ;;  %v6217_v8 = vld [vmem:[#allocation10 + $0x3c8] ss:$16 sps:$4 sm:$0xff]   ;;  %v1461_v9 = vmul.f32 0.01, %v5778_v2 }
 0x2bb   :  { %2307 = vmatpush1.bf16.msra.mxu0 %v6142_v10  ;;  %2389 = vmatpush1.bf16.msra.mxu1 %v6145_v12  ;;  %v6225_v10 = vld [vmem:[#allocation10 + $0x3ec] ss:$16 sps:$4 sm:$0xff]   ;;  %v6220_v12 = vld [vmem:[#allocation10 + $0x3e0] ss:$16 sps:$4 sm:$0xff]  }
 0x2bc   :  { %2308 = vmatprep.subr.bf16.mxu0 %v6150_v13  ;;  %2390 = vmatprep.subr.bf16.mxu1 %v6153_v14  ;;  %v6223_v13 = vld [vmem:[#allocation10 + $0x3e8] ss:$16 sps:$4 sm:$0xff]   ;;  %v1465_v14 = vmax.f32 %v5778_v2, %v1461_v9  ;;  %v6300_v9 = vld [vmem:[#allocation11 + $0x184] ss:$16 sps:$4 sm:$0xff]  }
 0x2bd   :  { %v6289_v2 = vld [vmem:[#allocation11 + $0x148] ss:$16 sps:$4 sm:$0xff]  }
 0x2bf   :  { %2309 = vmatpush1.bf16.msra.mxu0 %v6148_v16  ;;  %2391 = vmatpush1.bf16.msra.mxu1 %v6151_v17  ;;  %v6231_v16 = vld [vmem:[#allocation11 + $0xc] ss:$16 sps:$4 sm:$0xff]   ;;  %v6226_v17 = vld [vmem:[#allocation11] ss:$16 sps:$4 sm:$0xff]  }
 0x2c0   :  { %2310 = vmatprep.subr.bf16.mxu0 %v6156_v18  ;;  %2392 = vmatprep.subr.bf16.mxu1 %v6159_v19  ;;  %v6229_v18 = vld [vmem:[#allocation11 + $0x8] ss:$16 sps:$4 sm:$0xff]   ;;  %v1469_v19 = vpack.c.bf16 %v1465_v14, %v1465_v14  ;;  %v6309_v14 = vld [vmem:[#allocation11 + $0x1ac] ss:$16 sps:$4 sm:$0xff]  }
 0x2c3   :  { %2311 = vmatpush1.bf16.msra.mxu0 %v6154_v39  ;;  %2393 = vmatpush1.bf16.msra.mxu1 %v6157_v20  ;;  %v6234_v39 = vld [vmem:[#allocation11 + $0x24] ss:$16 sps:$4 sm:$0xff]   ;;  %v6237_v20 = vld [vmem:[#allocation11 + $0x2c] ss:$16 sps:$4 sm:$0xff]  }
 0x2c4   :  { %2312 = vmatprep.subr.bf16.mxu0 %v6162_v21  ;;  %2394 = vmatprep.subr.bf16.mxu1 %v6165_v51  ;;  %v6232_v21 = vld [vmem:[#allocation11 + $0x20] ss:$16 sps:$4 sm:$0xff]   ;;  %v6235_v51 = vld [vmem:[#allocation11 + $0x28] ss:$16 sps:$4 sm:$0xff]  }
 0x2c7   :  { %2313 = vmatpush1.bf16.msra.mxu0 %v6160_v22  ;;  %2395 = vmatpush1.bf16.msra.mxu1 %v6163_v23  ;;  %v6240_v22 = vld [vmem:[#allocation11 + $0x44] ss:$16 sps:$4 sm:$0xff]   ;;  %v6243_v23 = vld [vmem:[#allocation11 + $0x4c] ss:$16 sps:$4 sm:$0xff]  }
 0x2c8   :  { %2314 = vmatprep.subr.bf16.mxu0 %v6168_v24  ;;  %2396 = vmatprep.subr.bf16.mxu1 %v6171_v25  ;;  %v6238_v24 = vld [vmem:[#allocation11 + $0x40] ss:$16 sps:$4 sm:$0xff]   ;;  %v6241_v25 = vld [vmem:[#allocation11 + $0x48] ss:$16 sps:$4 sm:$0xff]  }
 0x2cb   :  { %2315 = vmatpush1.bf16.msra.mxu0 %v6166_v26  ;;  %2397 = vmatpush1.bf16.msra.mxu1 %v6169_v27  ;;  %v6246_v26 = vld [vmem:[#allocation11 + $0x64] ss:$16 sps:$4 sm:$0xff]   ;;  %v6249_v27 = vld [vmem:[#allocation11 + $0x6c] ss:$16 sps:$4 sm:$0xff]  }
 0x2cc   :  { %2316 = vmatprep.subr.bf16.mxu0 %v6174_v28  ;;  %2398 = vmatprep.subr.bf16.mxu1 %v6177_v29  ;;  %v6244_v28 = vld [vmem:[#allocation11 + $0x60] ss:$16 sps:$4 sm:$0xff]   ;;  %v6247_v29 = vld [vmem:[#allocation11 + $0x68] ss:$16 sps:$4 sm:$0xff]  }
 0x2cf   :  { %2317 = vmatpush1.bf16.msra.mxu0 %v6172_v30  ;;  %2399 = vmatpush1.bf16.msra.mxu1 %v6175_v31  ;;  %v6252_v30 = vld [vmem:[#allocation11 + $0x84] ss:$16 sps:$4 sm:$0xff]   ;;  %v6255_v31 = vld [vmem:[#allocation11 + $0x8c] ss:$16 sps:$4 sm:$0xff]  }
 0x2d0   :  { %2318 = vmatprep.subr.bf16.mxu0 %v6180_v32  ;;  %2400 = vmatprep.subr.bf16.mxu1 %v6183_v34  ;;  %v6250_v32 = vld [vmem:[#allocation11 + $0x80] ss:$16 sps:$4 sm:$0xff]   ;;  %v6253_v34 = vld [vmem:[#allocation11 + $0x88] ss:$16 sps:$4 sm:$0xff]  }
 0x2d3   :  { %2319 = vmatpush1.bf16.msra.mxu0 %v6178_v35  ;;  %2401 = vmatpush1.bf16.msra.mxu1 %v6181_v36  ;;  %v6258_v35 = vld [vmem:[#allocation11 + $0xa4] ss:$16 sps:$4 sm:$0xff]   ;;  %v6261_v36 = vld [vmem:[#allocation11 + $0xac] ss:$16 sps:$4 sm:$0xff]  }
 0x2d4   :  { %2320 = vmatprep.subr.bf16.mxu0 %v6186_v37  ;;  %2402 = vmatprep.subr.bf16.mxu1 %v6189_v44  ;;  %v6256_v37 = vld [vmem:[#allocation11 + $0xa0] ss:$16 sps:$4 sm:$0xff]   ;;  %v6259_v44 = vld [vmem:[#allocation11 + $0xa8] ss:$16 sps:$4 sm:$0xff]  }
 0x2d7   :  { %2321 = vmatpush1.bf16.msra.mxu0 %v6184_v45  ;;  %2403 = vmatpush1.bf16.msra.mxu1 %v6187_v46  ;;  %v6264_v45 = vld [vmem:[#allocation11 + $0xc4] ss:$16 sps:$4 sm:$0xff]   ;;  %v6267_v46 = vld [vmem:[#allocation11 + $0xcc] ss:$16 sps:$4 sm:$0xff]  }
 0x2d8   :  { %2322 = vmatprep.subr.bf16.mxu0 %v6192_v47  ;;  %2404 = vmatprep.subr.bf16.mxu1 %v6195_v48  ;;  %v6262_v47 = vld [vmem:[#allocation11 + $0xc0] ss:$16 sps:$4 sm:$0xff]   ;;  %v6265_v48 = vld [vmem:[#allocation11 + $0xc8] ss:$16 sps:$4 sm:$0xff]  }
 0x2db   :  { %2323 = vmatpush1.bf16.msra.mxu0 %v6190_v50  ;;  %2405 = vmatpush1.bf16.msra.mxu1 %v6193_v52  ;;  %v6270_v50 = vld [vmem:[#allocation11 + $0xe4] ss:$16 sps:$4 sm:$0xff]   ;;  %v6273_v52 = vld [vmem:[#allocation11 + $0xec] ss:$16 sps:$4 sm:$0xff]  }
 0x2dc   :  { %2324 = vmatprep.subr.bf16.mxu0 %v6198_v53  ;;  %2406 = vmatprep.subr.bf16.mxu1 %v6201_v54  ;;  %v6268_v53 = vld [vmem:[#allocation11 + $0xe0] ss:$16 sps:$4 sm:$0xff]   ;;  %v6271_v54 = vld [vmem:[#allocation11 + $0xe8] ss:$16 sps:$4 sm:$0xff]  }
 0x2df   :  { %2325 = vmatpush1.bf16.msra.mxu0 %v6196_v55  ;;  %2407 = vmatpush1.bf16.msra.mxu1 %v6199_v56  ;;  %v6276_v55 = vld [vmem:[#allocation11 + $0x104] ss:$16 sps:$4 sm:$0xff]   ;;  %v6279_v56 = vld [vmem:[#allocation11 + $0x10c] ss:$16 sps:$4 sm:$0xff]  }
 0x2e0   :  { %2326 = vmatprep.subr.bf16.mxu0 %v6204_v57  ;;  %2408 = vmatprep.subr.bf16.mxu1 %v6207_v58  ;;  %v6274_v57 = vld [vmem:[#allocation11 + $0x100] ss:$16 sps:$4 sm:$0xff]   ;;  %v6277_v58 = vld [vmem:[#allocation11 + $0x108] ss:$16 sps:$4 sm:$0xff]  }
 0x2e3   :  { %2327 = vmatpush1.bf16.msra.mxu0 %v6202_v59  ;;  %2409 = vmatpush1.bf16.msra.mxu1 %v6205_v60  ;;  %v6282_v59 = vld [vmem:[#allocation11 + $0x124] ss:$16 sps:$4 sm:$0xff]   ;;  %v6285_v60 = vld [vmem:[#allocation11 + $0x12c] ss:$16 sps:$4 sm:$0xff]  }
 0x2e4   :  { %2328 = vmatprep.subr.bf16.mxu0 %v6210_v62  ;;  %2410 = vmatprep.subr.bf16.mxu1 %v6213_v63  ;;  %v6283_v62 = vld [vmem:[#allocation11 + $0x128] ss:$16 sps:$4 sm:$0xff]   ;;  %v6288_v63 = vld [vmem:[#allocation11 + $0x144] ss:$16 sps:$4 sm:$0xff]  }
 0x2e7   :  { %2329 = vmatpush1.bf16.msra.mxu0 %v6208_v0  ;;  %2411 = vmatpush1.bf16.msra.mxu1 %v6211_v1  ;;  %v6291_v0 = vld [vmem:[#allocation11 + $0x14c] ss:$16 sps:$4 sm:$0xff]   ;;  %v6286_v1 = vld [vmem:[#allocation11 + $0x140] ss:$16 sps:$4 sm:$0xff]  }
 0x2e8   :  { %2330 = vmatprep.subr.bf16.mxu0 %v6216_v3  ;;  %2412 = vmatprep.subr.bf16.mxu1 %v6219_v5  ;;  %v6294_v3 = vld [vmem:[#allocation11 + $0x164] ss:$16 sps:$4 sm:$0xff]   ;;  %v6297_v5 = vld [vmem:[#allocation11 + $0x16c] ss:$16 sps:$4 sm:$0xff]  }
 0x2eb   :  { %2331 = vmatpush1.bf16.msra.mxu0 %v6214_v7  ;;  %2413 = vmatpush1.bf16.msra.mxu1 %v6217_v8  ;;  %v6292_v7 = vld [vmem:[#allocation11 + $0x160] ss:$16 sps:$4 sm:$0xff]   ;;  %v6295_v8 = vld [vmem:[#allocation11 + $0x168] ss:$16 sps:$4 sm:$0xff]  }
 0x2ec   :  { %2332 = vmatprep.subr.bf16.mxu0 %v6222_v33  ;;  %2414 = vmatprep.subr.bf16.mxu1 %v6225_v10  ;;  %v6303_v33 = vld [vmem:[#allocation11 + $0x18c] ss:$16 sps:$4 sm:$0xff]   ;;  %v6298_v10 = vld [vmem:[#allocation11 + $0x180] ss:$16 sps:$4 sm:$0xff]  }
 0x2ef   :  { %2333 = vmatpush1.bf16.msra.mxu0 %v6220_v12  ;;  %2415 = vmatpush1.bf16.msra.mxu1 %v6223_v13  ;;  %v6301_v12 = vld [vmem:[#allocation11 + $0x188] ss:$16 sps:$4 sm:$0xff]   ;;  %v6306_v13 = vld [vmem:[#allocation11 + $0x1a4] ss:$16 sps:$4 sm:$0xff]  }
 0x2f0   :  { %3227 = vmatprep.subr.bf16.mxu0 %v6228_v43  ;;  %3309 = vmatprep.subr.bf16.mxu1 %v6231_v16  ;;  %v6304_v43 = vld [vmem:[#allocation11 + $0x1a0] ss:$16 sps:$4 sm:$0xff]   ;;  %v6307_v16 = vld [vmem:[#allocation11 + $0x1a8] ss:$16 sps:$4 sm:$0xff]  }
 0x2f2   :  { %2335 = vmatmul.mubr.bf16.vlgmr.msra.gmra.mrb[12].mxu0 %v1469_v19  ;;  %2417 = vmatmul.mubr.bf16.vlgmr.msra.gmra.mrb[12].mxu1 %v1469_v19  ;;  %v6310_v19 = vld [vmem:[#allocation11 + $0x1c0] ss:$16 sps:$4 sm:$0xff]  }
 0x2f3   :  { %3228 = vmatpush1.bf16.msra.mxu0 %v6226_v17  ;;  %3310 = vmatpush1.bf16.msra.mxu1 %v6229_v18  ;;  %v6312_v17 = vld [vmem:[#allocation11 + $0x1c4] ss:$16 sps:$4 sm:$0xff]   ;;  %v6315_v18 = vld [vmem:[#allocation11 + $0x1cc] ss:$16 sps:$4 sm:$0xff]  }
 0x2f4   :  { %3229 = vmatprep.subr.bf16.mxu0 %v6234_v39  ;;  %3311 = vmatprep.subr.bf16.mxu1 %v6237_v20  ;;  %v6313_v39 = vld [vmem:[#allocation11 + $0x1c8] ss:$16 sps:$4 sm:$0xff]   ;;  %v6318_v20 = vld [vmem:[#allocation11 + $0x1e4] ss:$16 sps:$4 sm:$0xff]  }
 0x2f7   :  { %3230 = vmatpush1.bf16.msra.mxu0 %v6232_v21  ;;  %3312 = vmatpush1.bf16.msra.mxu1 %v6235_v51  ;;  %v6321_v21 = vld [vmem:[#allocation11 + $0x1ec] ss:$16 sps:$4 sm:$0xff]   ;;  %v6316_v51 = vld [vmem:[#allocation11 + $0x1e0] ss:$16 sps:$4 sm:$0xff]  }
 0x2f8   :  { %3231 = vmatprep.subr.bf16.mxu0 %v6240_v22  ;;  %3313 = vmatprep.subr.bf16.mxu1 %v6243_v23  ;;  %v6319_v22 = vld [vmem:[#allocation11 + $0x1e8] ss:$16 sps:$4 sm:$0xff]   ;;  %v6324_v23 = vld [vmem:[#allocation11 + $0x204] ss:$16 sps:$4 sm:$0xff]  }
 0x2fb   :  { %3232 = vmatpush1.bf16.msra.mxu0 %v6238_v24  ;;  %3314 = vmatpush1.bf16.msra.mxu1 %v6241_v25  ;;  %v6327_v24 = vld [vmem:[#allocation11 + $0x20c] ss:$16 sps:$4 sm:$0xff]   ;;  %v7226_v25 = vld [vmem:[%s7303_s6] sm:$0xf] }
 0x2fc   :  { %3233 = vmatprep.subr.bf16.mxu0 %v6246_v26  ;;  %3315 = vmatprep.subr.bf16.mxu1 %v6249_v27  ;;  %v1604_v26 = vrot.slane %v7226_v25, %v7177_v40  ;;  %v1608_v27 = vrot.slane %v7226_v25, %v7180_v41 }
 0x2ff   :  { %3234 = vmatpush1.bf16.msra.mxu0 %v6244_v28  ;;  %3316 = vmatpush1.bf16.msra.mxu1 %v6247_v29  ;;  %v1616_v28 = vrot.slane %v7226_v25, %v7183_v42 }
 0x300   :  { %3235 = vmatprep.subr.bf16.mxu0 %v6252_v30  ;;  %3317 = vmatprep.subr.bf16.mxu1 %v6255_v31 }
 0x303   :  { %3236 = vmatpush1.bf16.msra.mxu0 %v6250_v32  ;;  %3318 = vmatpush1.bf16.msra.mxu1 %v6253_v34 }
 0x304   :  { %3237 = vmatprep.subr.bf16.mxu0 %v6258_v35  ;;  %3319 = vmatprep.subr.bf16.mxu1 %v6261_v36 }
 0x307   :  { %3238 = vmatpush1.bf16.msra.mxu0 %v6256_v37  ;;  %3320 = vmatpush1.bf16.msra.mxu1 %v6259_v44 }
 0x308   :  { %3239 = vmatprep.subr.bf16.mxu0 %v6264_v45  ;;  %3321 = vmatprep.subr.bf16.mxu1 %v6267_v46 }
 0x30b   :  { %3240 = vmatpush1.bf16.msra.mxu0 %v6262_v47  ;;  %3322 = vmatpush1.bf16.msra.mxu1 %v6265_v48 }
 0x30c   :  { %3241 = vmatprep.subr.bf16.mxu0 %v6270_v50  ;;  %3323 = vmatprep.subr.bf16.mxu1 %v6273_v52 }
 0x30f   :  { %3242 = vmatpush1.bf16.msra.mxu0 %v6268_v53  ;;  %3324 = vmatpush1.bf16.msra.mxu1 %v6271_v54 }
 0x310   :  { %3243 = vmatprep.subr.bf16.mxu0 %v6276_v55  ;;  %3325 = vmatprep.subr.bf16.mxu1 %v6279_v56  ;;  %v6322_v56 = vld [vmem:[#allocation11 + $0x200] ss:$16 sps:$4 sm:$0xff]  }
 0x313   :  { %3244 = vmatpush1.bf16.msra.mxu0 %v6274_v57  ;;  %3326 = vmatpush1.bf16.msra.mxu1 %v6277_v58  ;;  %v6325_v57 = vld [vmem:[#allocation11 + $0x208] ss:$16 sps:$4 sm:$0xff]  }
 0x314   :  { %3245 = vmatprep.subr.bf16.mxu0 %v6282_v59  ;;  %3327 = vmatprep.subr.bf16.mxu1 %v6285_v60  ;;  %v6330_v59 = vld [vmem:[#allocation11 + $0x224] ss:$16 sps:$4 sm:$0xff]   ;;  %v6333_v60 = vld [vmem:[#allocation11 + $0x22c] ss:$16 sps:$4 sm:$0xff]  }
 0x317   :  { %3246 = vmatpush1.bf16.msra.mxu0 %v6280_v61  ;;  %3328 = vmatpush1.bf16.msra.mxu1 %v6283_v62  ;;  %v6328_v62 = vld [vmem:[#allocation11 + $0x220] ss:$16 sps:$4 sm:$0xff]  }
 0x318   :  { %3247 = vmatprep.subr.bf16.mxu0 %v6288_v63  ;;  %3329 = vmatprep.subr.bf16.mxu1 %v6291_v0  ;;  %v6331_v63 = vld [vmem:[#allocation11 + $0x228] ss:$16 sps:$4 sm:$0xff]   ;;  %v6336_v0 = vld [vmem:[#allocation11 + $0x244] ss:$16 sps:$4 sm:$0xff]  }
 0x31b   :  { %3248 = vmatpush1.bf16.msra.mxu0 %v6286_v1  ;;  %3330 = vmatpush1.bf16.msra.mxu1 %v6289_v2  ;;  %v6339_v1 = vld [vmem:[#allocation11 + $0x24c] ss:$16 sps:$4 sm:$0xff]   ;;  %v6334_v2 = vld [vmem:[#allocation11 + $0x240] ss:$16 sps:$4 sm:$0xff]  }
 0x31c   :  { %3249 = vmatprep.subr.bf16.mxu0 %v6294_v3  ;;  %3331 = vmatprep.subr.bf16.mxu1 %v6297_v5  ;;  %v6337_v3 = vld [vmem:[#allocation11 + $0x248] ss:$16 sps:$4 sm:$0xff]   ;;  %v6342_v5 = vld [vmem:[#allocation11 + $0x264] ss:$16 sps:$4 sm:$0xff]  }
 0x31f   :  { %3250 = vmatpush1.bf16.msra.mxu0 %v6292_v7  ;;  %3332 = vmatpush1.bf16.msra.mxu1 %v6295_v8  ;;  %v6345_v7 = vld [vmem:[#allocation11 + $0x26c] ss:$16 sps:$4 sm:$0xff]   ;;  %v6340_v8 = vld [vmem:[#allocation11 + $0x260] ss:$16 sps:$4 sm:$0xff]  }
 0x320   :  { %3251 = vmatprep.subr.bf16.mxu0 %v6300_v9  ;;  %3333 = vmatprep.subr.bf16.mxu1 %v6303_v33  ;;  %v6343_v9 = vld [vmem:[#allocation11 + $0x268] ss:$16 sps:$4 sm:$0xff]   ;;  %v6348_v33 = vld [vmem:[#allocation11 + $0x284] ss:$16 sps:$4 sm:$0xff]  }
 0x323   :  { %3252 = vmatpush1.bf16.msra.mxu0 %v6298_v10  ;;  %3334 = vmatpush1.bf16.msra.mxu1 %v6301_v12  ;;  %v6351_v10 = vld [vmem:[#allocation11 + $0x28c] ss:$16 sps:$4 sm:$0xff]   ;;  %v6346_v12 = vld [vmem:[#allocation11 + $0x280] ss:$16 sps:$4 sm:$0xff]  }
 0x324   :  { %3253 = vmatprep.subr.bf16.mxu0 %v6306_v13  ;;  %3335 = vmatprep.subr.bf16.mxu1 %v6309_v14  ;;  %v6349_v13 = vld [vmem:[#allocation11 + $0x288] ss:$16 sps:$4 sm:$0xff]   ;;  %v6354_v14 = vld [vmem:[#allocation11 + $0x2a4] ss:$16 sps:$4 sm:$0xff]  }
 0x327   :  { %3254 = vmatpush1.bf16.msra.mxu0 %v6304_v43  ;;  %3336 = vmatpush1.bf16.msra.mxu1 %v6307_v16  ;;  %v6357_v43 = vld [vmem:[#allocation11 + $0x2ac] ss:$16 sps:$4 sm:$0xff]   ;;  %v6352_v16 = vld [vmem:[#allocation11 + $0x2a0] ss:$16 sps:$4 sm:$0xff]  }
 0x328   :  { %3255 = vmatprep.subr.bf16.mxu0 %v6312_v17  ;;  %3337 = vmatprep.subr.bf16.mxu1 %v6315_v18  ;;  %v6355_v17 = vld [vmem:[#allocation11 + $0x2a8] ss:$16 sps:$4 sm:$0xff]   ;;  %v6360_v18 = vld [vmem:[#allocation11 + $0x2c4] ss:$16 sps:$4 sm:$0xff]  }
 0x32b   :  { %3256 = vmatpush1.bf16.msra.mxu0 %v6310_v19  ;;  %3338 = vmatpush1.bf16.msra.mxu1 %v6313_v39  ;;  %v6363_v19 = vld [vmem:[#allocation11 + $0x2cc] ss:$16 sps:$4 sm:$0xff]   ;;  %v6358_v39 = vld [vmem:[#allocation11 + $0x2c0] ss:$16 sps:$4 sm:$0xff]  }
 0x32c   :  { %3257 = vmatprep.subr.bf16.mxu0 %v6318_v20  ;;  %3339 = vmatprep.subr.bf16.mxu1 %v6321_v21  ;;  %v6361_v20 = vld [vmem:[#allocation11 + $0x2c8] ss:$16 sps:$4 sm:$0xff]   ;;  %v6366_v21 = vld [vmem:[#allocation11 + $0x2e4] ss:$16 sps:$4 sm:$0xff]  }
 0x32f   :  { %3258 = vmatpush1.bf16.msra.mxu0 %v6316_v51  ;;  %3340 = vmatpush1.bf16.msra.mxu1 %v6319_v22  ;;  %v6369_v51 = vld [vmem:[#allocation11 + $0x2ec] ss:$16 sps:$4 sm:$0xff]   ;;  %v6364_v22 = vld [vmem:[#allocation11 + $0x2e0] ss:$16 sps:$4 sm:$0xff]  }
 0x330   :  { %3268 = vmatprep.subr.bf16.mxu0 %v6324_v23  ;;  %3350 = vmatprep.subr.bf16.mxu1 %v6327_v24  ;;  %v6367_v23 = vld [vmem:[#allocation11 + $0x2e8] ss:$16 sps:$4 sm:$0xff]   ;;  %v6372_v24 = vld [vmem:[#allocation11 + $0x304] ss:$16 sps:$4 sm:$0xff]  }
 0x3c5   :  { %v2336_v29 = vpop.f32.mrb[12].mxu0  ;;  %v7234_v30 = vpop.f32.mrb[12].mxu1 }
 0x3c6   :  { %v5780_v31 = vadd.f32 %v2336_v29, %v1604_v26  ;;  %v2338_v32 = vpop.f32.mrb[13].mxu0  ;;  %v2420_v34 = vpop.f32.mrb[13].mxu1  ;;  %v6375_v26 = vld [vmem:[#allocation11 + $0x30c] ss:$16 sps:$4 sm:$0xff]   ;;  %v6378_v29 = vld [vmem:[#allocation11 + $0x324] ss:$16 sps:$4 sm:$0xff]  }
 0x3c7   :  { %v5781_v35 = vadd.f32 %v2338_v32, %v1608_v27  ;;  %v5783_v36 = vadd.f32 %v2420_v34, %v1616_v28  ;;  %v2340_v37 = vpop.f32.mrb[14].mxu0  ;;  %v2422_v44 = vpop.f32.mrb[14].mxu1  ;;  %v6370_v27 = vld [vmem:[#allocation11 + $0x300] ss:$16 sps:$4 sm:$0xff]   ;;  %v6373_v28 = vld [vmem:[#allocation11 + $0x308] ss:$16 sps:$4 sm:$0xff]  }
 0x3c8   :  { %v2425_v45 = vmul.f32 0.01, %v5780_v31  ;;  %v2341_v46 = vpop.f32.mrb[15].mxu0  ;;  %v2423_v47 = vpop.f32.mrb[15].mxu1  ;;  %v6376_v32 = vld [vmem:[#allocation11 + $0x320] ss:$16 sps:$4 sm:$0xff]  }
 0x3c9   :  { %v2426_v48 = vmul.f32 0.01, %v5781_v35  ;;  %v2428_v50 = vmul.f32 0.01, %v5783_v36  ;;  %v6379_v34 = vld [vmem:[#allocation11 + $0x328] ss:$16 sps:$4 sm:$0xff]  }
 0x3ca   :  { %v2429_v52 = vmax.f32 %v5780_v31, %v2425_v45  ;;  %v6381_v31 = vld [vmem:[#allocation11 + $0x32c] ss:$16 sps:$4 sm:$0xff]   ;;  %v6382_v37 = vld [vmem:[#allocation11 + $0x340] ss:$16 sps:$4 sm:$0xff]   ;;  %v6385_v44 = vld [vmem:[#allocation11 + $0x348] ss:$16 sps:$4 sm:$0xff]  }
 0x3cb   :  { %v2430_v53 = vmax.f32 %v5781_v35, %v2426_v48  ;;  %v2432_v54 = vmax.f32 %v5783_v36, %v2428_v50  ;;  %v6384_v35 = vld [vmem:[#allocation11 + $0x344] ss:$16 sps:$4 sm:$0xff]   ;;  %v6387_v36 = vld [vmem:[#allocation11 + $0x34c] ss:$16 sps:$4 sm:$0xff]   ;;  %v6388_v47 = vld [vmem:[#allocation11 + $0x360] ss:$16 sps:$4 sm:$0xff]  }
 0x3cc   :  { %v2433_v58 = vpack.c.bf16 %v2429_v52, %v2429_v52  ;;  %v6390_v45 = vld [vmem:[#allocation11 + $0x364] ss:$16 sps:$4 sm:$0xff]   ;;  %v6393_v46 = vld [vmem:[#allocation11 + $0x36c] ss:$16 sps:$4 sm:$0xff]   ;;  %v6391_v48 = vld [vmem:[#allocation11 + $0x368] ss:$16 sps:$4 sm:$0xff]  }
 0x3cd   :  { %v2434_v55 = vpack.c.bf16 %v2430_v53, %v2430_v53  ;;  %v2436_v61 = vpack.c.bf16 %v2432_v54, %v2432_v54  ;;  %v6396_v50 = vld [vmem:[#allocation11 + $0x384] ss:$16 sps:$4 sm:$0xff]   ;;  %v6399_v52 = vld [vmem:[#allocation11 + $0x38c] ss:$16 sps:$4 sm:$0xff]   ;;  %v6394_v53 = vld [vmem:[#allocation11 + $0x380] ss:$16 sps:$4 sm:$0xff]  }
 0x3ce   :  { %v6397_v54 = vld [vmem:[#allocation11 + $0x388] ss:$16 sps:$4 sm:$0xff]  }
 0x3cf   :  { %3259 = vmatprep.mubr.bf16.mxu0 %v2434_v55  ;;  %3341 = vmatprep.mubr.bf16.mxu1 %v2434_v55  ;;  %v1612_v55 = vrot.slane %v7226_v25, %v7202_v49  ;;  %v6414_v25 = vld [vmem:[#allocation11 + $0x3e4] ss:$16 sps:$4 sm:$0xff]  }
 0x3d0   :  { %3260 = vmatmul.mubr.bf16.vlgmr.msra.gmra.mrb[16].mxu0 %v2433_v58  ;;  %3342 = vmatmul.mubr.bf16.vlgmr.msra.gmra.mrb[16].mxu1 %v2433_v58  ;;  %v6400_v58 = vld [vmem:[#allocation11 + $0x3a0] ss:$16 sps:$4 sm:$0xff]  }
 0x3d1   :  { %3269 = vmatpush1.bf16.msra.mxu0 %v6322_v56  ;;  %3351 = vmatpush1.bf16.msra.mxu1 %v6325_v57  ;;  %v6402_v56 = vld [vmem:[#allocation11 + $0x3a4] ss:$16 sps:$4 sm:$0xff]   ;;  %v6405_v57 = vld [vmem:[#allocation11 + $0x3ac] ss:$16 sps:$4 sm:$0xff]  }
 0x3d2   :  { %3300 = vmatprep.mubr.bf16.mxu0 %v2436_v61  ;;  %3382 = vmatprep.mubr.bf16.mxu1 %v2436_v61  ;;  %v6408_v61 = vld [vmem:[#allocation11 + $0x3c4] ss:$16 sps:$4 sm:$0xff]  }
 0x3d3   :  { %3270 = vmatprep.subr.bf16.mxu0 %v6330_v59  ;;  %3352 = vmatprep.subr.bf16.mxu1 %v6333_v60  ;;  %v6403_v59 = vld [vmem:[#allocation11 + $0x3a8] ss:$16 sps:$4 sm:$0xff]   ;;  %v5782_v60 = vadd.f32 %v7234_v30, %v1612_v55  ;;  %v6418_v30 = vld [vmem:[#allocation13 + $0x40] sm:$0xff]  }
 0x3d5   :  { %3271 = vmatpush1.bf16.msra.mxu0 %v6328_v62  ;;  %3353 = vmatpush1.bf16.msra.mxu1 %v6331_v63  ;;  %v6411_v62 = vld [vmem:[#allocation11 + $0x3cc] ss:$16 sps:$4 sm:$0xff]   ;;  %v6406_v63 = vld [vmem:[#allocation11 + $0x3c0] ss:$16 sps:$4 sm:$0xff]  }
 0x3d6   :  { %3272 = vmatprep.subr.bf16.mxu0 %v6336_v0  ;;  %3354 = vmatprep.subr.bf16.mxu1 %v6339_v1  ;;  %v6409_v0 = vld [vmem:[#allocation11 + $0x3c8] ss:$16 sps:$4 sm:$0xff]   ;;  %v2427_v1 = vmul.f32 0.01, %v5782_v60 }
 0x3d9   :  { %3273 = vmatpush1.bf16.msra.mxu0 %v6334_v2  ;;  %3355 = vmatpush1.bf16.msra.mxu1 %v6337_v3  ;;  %v6417_v2 = vld [vmem:[#allocation11 + $0x3ec] ss:$16 sps:$4 sm:$0xff]   ;;  %v6412_v3 = vld [vmem:[#allocation11 + $0x3e0] ss:$16 sps:$4 sm:$0xff]  }
 0x3da   :  { %3274 = vmatprep.subr.bf16.mxu0 %v6342_v5  ;;  %3356 = vmatprep.subr.bf16.mxu1 %v6345_v7  ;;  %v6415_v5 = vld [vmem:[#allocation11 + $0x3e8] ss:$16 sps:$4 sm:$0xff]   ;;  %v2431_v7 = vmax.f32 %v5782_v60, %v2427_v1 }
 0x3dd   :  { %3275 = vmatpush1.bf16.msra.mxu0 %v6340_v8  ;;  %3357 = vmatpush1.bf16.msra.mxu1 %v6343_v9  ;;  %v6419_v8 = vld [vmem:[#allocation13 + $0xc0] sm:$0xff]  }
 0x3de   :  { %3276 = vmatprep.subr.bf16.mxu0 %v6348_v33  ;;  %3358 = vmatprep.subr.bf16.mxu1 %v6351_v10  ;;  %v6420_v9 = vld [vmem:[#allocation13] sm:$0xff]   ;;  %v2435_v10 = vpack.c.bf16 %v2431_v7, %v2431_v7 }
 0x3df   :  { %v6421_v33 = vld [vmem:[#allocation13 + $0x80] sm:$0xff]  }
 0x3e1   :  { %3277 = vmatpush1.bf16.msra.mxu0 %v6346_v12  ;;  %3359 = vmatpush1.bf16.msra.mxu1 %v6349_v13  ;;  %v6422_v12 = vld [vmem:[#allocation13 + $0x48] sm:$0xff]  }
 0x3e2   :  { %3278 = vmatprep.subr.bf16.mxu0 %v6354_v14  ;;  %3360 = vmatprep.subr.bf16.mxu1 %v6357_v43  ;;  %v6423_v13 = vld [vmem:[#allocation13 + $0xc8] sm:$0xff]  }
 0x3e3   :  { %v6424_v14 = vld [vmem:[#allocation13 + $0x8] sm:$0xff]  }
 0x3e4   :  { %v6425_v43 = vld [vmem:[#allocation13 + $0x88] sm:$0xff]  }
 0x3e5   :  { %3279 = vmatpush1.bf16.msra.mxu0 %v6352_v16  ;;  %3361 = vmatpush1.bf16.msra.mxu1 %v6355_v17  ;;  %v6426_v16 = vld [vmem:[#allocation13 + $0x50] sm:$0xff]  }
 0x3e6   :  { %3280 = vmatprep.subr.bf16.mxu0 %v6360_v18  ;;  %3362 = vmatprep.subr.bf16.mxu1 %v6363_v19  ;;  %v6427_v17 = vld [vmem:[#allocation13 + $0xd0] sm:$0xff]  }
 0x3e7   :  { %v6428_v18 = vld [vmem:[#allocation13 + $0x10] sm:$0xff]  }
 0x3e8   :  { %v6429_v19 = vld [vmem:[#allocation13 + $0x90] sm:$0xff]  }
 0x3e9   :  { %3281 = vmatpush1.bf16.msra.mxu0 %v6358_v39  ;;  %3363 = vmatpush1.bf16.msra.mxu1 %v6361_v20  ;;  %v6430_v39 = vld [vmem:[#allocation13 + $0x58] sm:$0xff]  }
 0x3ea   :  { %3282 = vmatprep.subr.bf16.mxu0 %v6366_v21  ;;  %3364 = vmatprep.subr.bf16.mxu1 %v6369_v51  ;;  %v6431_v20 = vld [vmem:[#allocation13 + $0xd8] sm:$0xff]  }
 0x3eb   :  { %v6432_v21 = vld [vmem:[#allocation13 + $0x18] sm:$0xff]  }
 0x3ec   :  { %v6433_v51 = vld [vmem:[#allocation13 + $0x98] sm:$0xff]  }
 0x3ed   :  { %3283 = vmatpush1.bf16.msra.mxu0 %v6364_v22  ;;  %3365 = vmatpush1.bf16.msra.mxu1 %v6367_v23  ;;  %v6434_v22 = vld [vmem:[#allocation13 + $0x60] sm:$0xff]  }
 0x3ee   :  { %3284 = vmatprep.subr.bf16.mxu0 %v6372_v24  ;;  %3366 = vmatprep.subr.bf16.mxu1 %v6375_v26  ;;  %v6435_v23 = vld [vmem:[#allocation13 + $0xe0] sm:$0xff]  }
 0x3ef   :  { %v6436_v24 = vld [vmem:[#allocation13 + $0x20] sm:$0xff]  }
 0x3f0   :  { %v6437_v26 = vld [vmem:[#allocation13 + $0xa0] sm:$0xff]  }
 0x3f1   :  { %3285 = vmatpush1.bf16.msra.mxu0 %v6370_v27  ;;  %3367 = vmatpush1.bf16.msra.mxu1 %v6373_v28  ;;  %v6438_v27 = vld [vmem:[#allocation13 + $0x68] sm:$0xff]  }
 0x3f2   :  { %3286 = vmatprep.subr.bf16.mxu0 %v6378_v29  ;;  %3368 = vmatprep.subr.bf16.mxu1 %v6381_v31  ;;  %v6439_v28 = vld [vmem:[#allocation13 + $0xe8] sm:$0xff]  }
 0x3f3   :  { %v6440_v29 = vld [vmem:[#allocation13 + $0x28] sm:$0xff]  }
 0x3f4   :  { %v6441_v31 = vld [vmem:[#allocation13 + $0xa8] sm:$0xff]  }
 0x3f5   :  { %3287 = vmatpush1.bf16.msra.mxu0 %v6376_v32  ;;  %3369 = vmatpush1.bf16.msra.mxu1 %v6379_v34  ;;  %v6442_v32 = vld [vmem:[#allocation13 + $0x70] sm:$0xff]  }
 0x3f6   :  { %3288 = vmatprep.subr.bf16.mxu0 %v6384_v35  ;;  %3370 = vmatprep.subr.bf16.mxu1 %v6387_v36  ;;  %v6443_v34 = vld [vmem:[#allocation13 + $0xf0] sm:$0xff]  }
 0x3f7   :  { %v6444_v35 = vld [vmem:[#allocation13 + $0x30] sm:$0xff]  }
 0x3f8   :  { %v6445_v36 = vld [vmem:[#allocation13 + $0xb0] sm:$0xff]  }
 0x3f9   :  { %3289 = vmatpush1.bf16.msra.mxu0 %v6382_v37  ;;  %3371 = vmatpush1.bf16.msra.mxu1 %v6385_v44  ;;  %v6446_v37 = vld [vmem:[#allocation13 + $0x78] sm:$0xff]  }
 0x3fa   :  { %3290 = vmatprep.subr.bf16.mxu0 %v6390_v45  ;;  %3372 = vmatprep.subr.bf16.mxu1 %v6393_v46  ;;  %v6447_v44 = vld [vmem:[#allocation13 + $0xf8] sm:$0xff]  }
 0x3fb   :  { %v6448_v45 = vld [vmem:[#allocation13 + $0x38] sm:$0xff]  }
 0x3fc   :  { %v6449_v46 = vld [vmem:[#allocation13 + $0xb8] sm:$0xff]  }
 0x3fd   :  { %3291 = vmatpush1.bf16.msra.mxu0 %v6388_v47  ;;  %3373 = vmatpush1.bf16.msra.mxu1 %v6391_v48  ;;  %v6452_v47 = vld [vmem:[#allocation14 + $0x4] ss:$16 sps:$4 sm:$0xff]   ;;  %v6455_v48 = vld [vmem:[#allocation14 + $0xc] ss:$16 sps:$4 sm:$0xff]  }
 0x3fe   :  { %3292 = vmatprep.subr.bf16.mxu0 %v6396_v50  ;;  %3374 = vmatprep.subr.bf16.mxu1 %v6399_v52  ;;  %v215_v50 = vsub.s32 5, %v7172_v38  ;;  %v7240_v52 = vld [vmem:[#allocation7] sm:$0xff] }
 0x401   :  { %3293 = vmatpush1.bf16.msra.mxu0 %v6394_v53  ;;  %3375 = vmatpush1.bf16.msra.mxu1 %v6397_v54  ;;  %v216_v53 = vrot.slane %v7240_v52, %v215_v50  ;;  %v2565_v54 = vld [vmem:[%s7305_s8] sm:$0xf] }
 0x402   :  { %3294 = vmatprep.subr.bf16.mxu0 %v6402_v56  ;;  %3376 = vmatprep.subr.bf16.mxu1 %v6405_v57  ;;  %v2570_v55 = vrot.slane %v2565_v54, %v7177_v40  ;;  %v2578_v56 = vrot.slane %v2565_v54, %v7202_v49  ;;  %v6480_v50 = vld [vmem:[#allocation14 + $0xa0] ss:$16 sps:$4 sm:$0xff]  }
 0x403   :  { %v436_v57 = vadd.f32 %v7195_v6, %v216_v53  ;;  %v6483_v53 = vld [vmem:[#allocation14 + $0xa8] ss:$16 sps:$4 sm:$0xff]  }
 0x405   :  { %3295 = vmatpush1.bf16.msra.mxu0 %v6400_v58  ;;  %3377 = vmatpush1.bf16.msra.mxu1 %v6403_v59  ;;  %v2574_v58 = vrot.slane %v2565_v54, %v7180_v41  ;;  %v2582_v59 = vrot.slane %v2565_v54, %v7183_v42  ;;  %v6488_v54 = vld [vmem:[#allocation14 + $0xc4] ss:$16 sps:$4 sm:$0xff]  }
 0x406   :  { %3296 = vmatprep.subr.bf16.mxu0 %v6408_v61  ;;  %3378 = vmatprep.subr.bf16.mxu1 %v6411_v62 }
 0x409   :  { %3297 = vmatpush1.bf16.msra.mxu0 %v6406_v63  ;;  %3379 = vmatpush1.bf16.msra.mxu1 %v6409_v0 }
 0x40a   :  { %3298 = vmatprep.subr.bf16.mxu0 %v6414_v25  ;;  %3380 = vmatprep.subr.bf16.mxu1 %v6417_v2  ;;  %v486_v25 = vmul.f32 0.01, %v436_v57 }
 0x40d   :  { %3299 = vmatpush1.bf16.msra.mxu0 %v6412_v3  ;;  %3381 = vmatpush1.bf16.msra.mxu1 %v6415_v5 }
 0x40e   :  { %5688 = vmatprep.subr.bf16.mxu0 %v6418_v30  ;;  %5710 = vmatprep.subr.bf16.mxu1 %v6419_v8 }
 0x410   :  { %3301 = vmatmul.mubr.bf16.vlgmr.msra.gmra.mrb[16].mxu0 %v2435_v10  ;;  %3383 = vmatmul.mubr.bf16.vlgmr.msra.gmra.mrb[16].mxu1 %v2435_v10 }
 0x411   :  { %5689 = vmatpush3.bf16.msra.mxu0 %v6420_v9  ;;  %5711 = vmatpush3.bf16.msra.mxu1 %v6421_v33 }
 0x412   :  { %5690 = vmatprep.subr.bf16.mxu0 %v6422_v12  ;;  %5712 = vmatprep.subr.bf16.mxu1 %v6423_v13 }
 0x415   :  { %5691 = vmatpush3.bf16.msra.mxu0 %v6424_v14  ;;  %5713 = vmatpush3.bf16.msra.mxu1 %v6425_v43 }
 0x416   :  { %5692 = vmatprep.subr.bf16.mxu0 %v6426_v16  ;;  %5714 = vmatprep.subr.bf16.mxu1 %v6427_v17  ;;  %v494_v16 = vmax.f32 %v436_v57, %v486_v25  ;;  %v6489_v57 = vld [vmem:[#allocation14 + $0xc8] ss:$16 sps:$4 sm:$0xff]   ;;  %v6506_v25 = vld [vmem:[#allocation14 + $0x124] ss:$16 sps:$4 sm:$0xff]  }
 0x419   :  { %5693 = vmatpush3.bf16.msra.mxu0 %v6428_v18  ;;  %5715 = vmatpush3.bf16.msra.mxu1 %v6429_v19  ;;  %v6450_v19 = vld [vmem:[#allocation14] ss:$16 sps:$4 sm:$0xff]  }
 0x41a   :  { %5694 = vmatprep.subr.bf16.mxu0 %v6430_v39  ;;  %5716 = vmatprep.subr.bf16.mxu1 %v6431_v20  ;;  %v6453_v39 = vld [vmem:[#allocation14 + $0x8] ss:$16 sps:$4 sm:$0xff]  }
 0x41d   :  { %5695 = vmatpush3.bf16.msra.mxu0 %v6432_v21  ;;  %5717 = vmatpush3.bf16.msra.mxu1 %v6433_v51  ;;  %v6458_v51 = vld [vmem:[#allocation14 + $0x24] ss:$16 sps:$4 sm:$0xff]  }
 0x41e   :  { %5696 = vmatprep.subr.bf16.mxu0 %v6434_v22  ;;  %5718 = vmatprep.subr.bf16.mxu1 %v6435_v23  ;;  %v6461_v22 = vld [vmem:[#allocation14 + $0x2c] ss:$16 sps:$4 sm:$0xff]   ;;  %v502_v23 = vpack.c.bf16 %v494_v16, %v494_v16  ;;  %v223_v16 = vsub.s32 7, %v7172_v38 }
 0x421   :  { %5697 = vmatpush3.bf16.msra.mxu0 %v6436_v24  ;;  %5719 = vmatpush3.bf16.msra.mxu1 %v6437_v26  ;;  %v6456_v24 = vld [vmem:[#allocation14 + $0x20] ss:$16 sps:$4 sm:$0xff]   ;;  %v6459_v26 = vld [vmem:[#allocation14 + $0x28] ss:$16 sps:$4 sm:$0xff]  }
 0x422   :  { %5698 = vmatprep.subr.bf16.mxu0 %v6438_v27  ;;  %5720 = vmatprep.subr.bf16.mxu1 %v6439_v28  ;;  %v6464_v27 = vld [vmem:[#allocation14 + $0x44] ss:$16 sps:$4 sm:$0xff]   ;;  %v6467_v28 = vld [vmem:[#allocation14 + $0x4c] ss:$16 sps:$4 sm:$0xff]  }
 0x425   :  { %5699 = vmatpush3.bf16.msra.mxu0 %v6440_v29  ;;  %5721 = vmatpush3.bf16.msra.mxu1 %v6441_v31  ;;  %v6462_v29 = vld [vmem:[#allocation14 + $0x40] ss:$16 sps:$4 sm:$0xff]   ;;  %v6465_v31 = vld [vmem:[#allocation14 + $0x48] ss:$16 sps:$4 sm:$0xff]  }
 0x426   :  { %5700 = vmatprep.subr.bf16.mxu0 %v6442_v32  ;;  %5722 = vmatprep.subr.bf16.mxu1 %v6443_v34  ;;  %v6470_v32 = vld [vmem:[#allocation14 + $0x64] ss:$16 sps:$4 sm:$0xff]   ;;  %v6473_v34 = vld [vmem:[#allocation14 + $0x6c] ss:$16 sps:$4 sm:$0xff]  }
 0x429   :  { %5701 = vmatpush3.bf16.msra.mxu0 %v6444_v35  ;;  %5723 = vmatpush3.bf16.msra.mxu1 %v6445_v36  ;;  %v6468_v35 = vld [vmem:[#allocation14 + $0x60] ss:$16 sps:$4 sm:$0xff]   ;;  %v6471_v36 = vld [vmem:[#allocation14 + $0x68] ss:$16 sps:$4 sm:$0xff]  }
 0x42a   :  { %5702 = vmatprep.subr.bf16.mxu0 %v6446_v37  ;;  %5724 = vmatprep.subr.bf16.mxu1 %v6447_v44  ;;  %v6476_v37 = vld [vmem:[#allocation14 + $0x84] ss:$16 sps:$4 sm:$0xff]   ;;  %v6479_v44 = vld [vmem:[#allocation14 + $0x8c] ss:$16 sps:$4 sm:$0xff]  }
 0x42d   :  { %5703 = vmatpush3.bf16.msra.mxu0 %v6448_v45  ;;  %5725 = vmatpush3.bf16.msra.mxu1 %v6449_v46  ;;  %v6474_v45 = vld [vmem:[#allocation14 + $0x80] ss:$16 sps:$4 sm:$0xff]   ;;  %v6477_v46 = vld [vmem:[#allocation14 + $0x88] ss:$16 sps:$4 sm:$0xff]  }
 0x42e   :  { %4537 = vmatprep.subr.bf16.mxu0 %v6452_v47  ;;  %4619 = vmatprep.subr.bf16.mxu1 %v6455_v48  ;;  %v6482_v47 = vld [vmem:[#allocation14 + $0xa4] ss:$16 sps:$4 sm:$0xff]   ;;  %v6485_v48 = vld [vmem:[#allocation14 + $0xac] ss:$16 sps:$4 sm:$0xff]  }
 0x4e3   :  { %v3302_v60 = vpop.f32.mrb[16].mxu0  ;;  %v3384_v61 = vpop.f32.mrb[16].mxu1 }
 0x4e4   :  { %v5784_v62 = vadd.f32 %v3302_v60, %v2570_v55  ;;  %v5786_v63 = vadd.f32 %v3384_v61, %v2578_v56  ;;  %v3304_v0 = vpop.f32.mrb[17].mxu0  ;;  %v3386_v1 = vpop.f32.mrb[17].mxu1  ;;  %v6491_v55 = vld [vmem:[#allocation14 + $0xcc] ss:$16 sps:$4 sm:$0xff]   ;;  %v6486_v56 = vld [vmem:[#allocation14 + $0xc0] ss:$16 sps:$4 sm:$0xff]  }
 0x4e5   :  { %v5785_v2 = vadd.f32 %v3304_v0, %v2574_v58  ;;  %v5787_v3 = vadd.f32 %v3386_v1, %v2582_v59  ;;  %v3306_v5 = vpop.f32.mrb[18].mxu0  ;;  %v3388_v7 = vpop.f32.mrb[18].mxu1  ;;  %v6494_v58 = vld [vmem:[#allocation14 + $0xe4] ss:$16 sps:$4 sm:$0xff]   ;;  %v6497_v59 = vld [vmem:[#allocation14 + $0xec] ss:$16 sps:$4 sm:$0xff]  }
 0x4e6   :  { %v3391_v30 = vmul.f32 0.01, %v5784_v62  ;;  %v3393_v8 = vmul.f32 0.01, %v5786_v63  ;;  %v3307_v9 = vpop.f32.mrb[19].mxu0  ;;  %v3389_v33 = vpop.f32.mrb[19].mxu1 }
 0x4e7   :  { %v3392_v6 = vmul.f32 0.01, %v5785_v2  ;;  %v3394_v10 = vmul.f32 0.01, %v5787_v3  ;;  %v6492_v60 = vld [vmem:[#allocation14 + $0xe0] ss:$16 sps:$4 sm:$0xff]  }
 0x4e8   :  { %v3395_v12 = vmax.f32 %v5784_v62, %v3391_v30  ;;  %v3397_v13 = vmax.f32 %v5786_v63, %v3393_v8  ;;  %v6495_v61 = vld [vmem:[#allocation14 + $0xe8] ss:$16 sps:$4 sm:$0xff]   ;;  %v6500_v62 = vld [vmem:[#allocation14 + $0x104] ss:$16 sps:$4 sm:$0xff]   ;;  %v6503_v63 = vld [vmem:[#allocation14 + $0x10c] ss:$16 sps:$4 sm:$0xff]  }
 0x4e9   :  { %v3396_v14 = vmax.f32 %v5785_v2, %v3392_v6  ;;  %v3398_v43 = vmax.f32 %v5787_v3, %v3394_v10  ;;  %v6498_v0 = vld [vmem:[#allocation14 + $0x100] ss:$16 sps:$4 sm:$0xff]   ;;  %v6501_v1 = vld [vmem:[#allocation14 + $0x108] ss:$16 sps:$4 sm:$0xff]   ;;  %v6509_v2 = vld [vmem:[#allocation14 + $0x12c] ss:$16 sps:$4 sm:$0xff]  }
 0x4ea   :  { %v3399_v20 = vpack.c.bf16 %v3395_v12, %v3395_v12  ;;  %v3401_v21 = vpack.c.bf16 %v3397_v13, %v3397_v13  ;;  %v6504_v3 = vld [vmem:[#allocation14 + $0x120] ss:$16 sps:$4 sm:$0xff]   ;;  %v6507_v5 = vld [vmem:[#allocation14 + $0x128] ss:$16 sps:$4 sm:$0xff]   ;;  %v6512_v7 = vld [vmem:[#allocation14 + $0x144] ss:$16 sps:$4 sm:$0xff]  }
 0x4eb   :  { %v3400_v17 = vpack.c.bf16 %v3396_v14, %v3396_v14  ;;  %v3402_v18 = vpack.c.bf16 %v3398_v43, %v3398_v43  ;;  %v6515_v30 = vld [vmem:[#allocation14 + $0x14c] ss:$16 sps:$4 sm:$0xff]   ;;  %v6510_v8 = vld [vmem:[#allocation14 + $0x140] ss:$16 sps:$4 sm:$0xff]   ;;  %v6513_v9 = vld [vmem:[#allocation14 + $0x148] ss:$16 sps:$4 sm:$0xff]  }
 0x4ec   :  { %v6518_v33 = vld [vmem:[#allocation14 + $0x164] ss:$16 sps:$4 sm:$0xff]   ;;  %v6521_v6 = vld [vmem:[#allocation14 + $0x16c] ss:$16 sps:$4 sm:$0xff]   ;;  %v6516_v10 = vld [vmem:[#allocation14 + $0x160] ss:$16 sps:$4 sm:$0xff]  }
 0x4ed   :  { %3698 = vmatprep.mubr.bf16.mxu0 %v3400_v17  ;;  %3738 = vmatprep.mubr.bf16.mxu1 %v3402_v18  ;;  %v6519_v12 = vld [vmem:[#allocation14 + $0x168] ss:$16 sps:$4 sm:$0xff]   ;;  %v211_v13 = vsub.s32 4, %v7172_v38  ;;  %v6524_v14 = vld [vmem:[#allocation14 + $0x184] ss:$16 sps:$4 sm:$0xff]  }
 0x4ee   :  { %3699 = vmatmul.mubr.bf16.vlgmr.msra.gmra.mrb[20].mxu0 %v3399_v20  ;;  %3739 = vmatmul.mubr.bf16.vlgmr.msra.gmra.mrb[20].mxu1 %v3401_v21  ;;  %v6527_v43 = vld [vmem:[#allocation14 + $0x18c] ss:$16 sps:$4 sm:$0xff]   ;;  %v6522_v17 = vld [vmem:[#allocation14 + $0x180] ss:$16 sps:$4 sm:$0xff]   ;;  %v6525_v18 = vld [vmem:[#allocation14 + $0x188] ss:$16 sps:$4 sm:$0xff]   ;;  %v224_v21 = vrot.slane %v7240_v52, %v223_v16 }
 0x4ef   :  { %4538 = vmatpush1.bf16.msra.mxu0 %v6450_v19  ;;  %4620 = vmatpush1.bf16.msra.mxu1 %v6453_v39  ;;  %v212_v19 = vrot.slane %v7240_v52, %v211_v13  ;;  %v6530_v39 = vld [vmem:[#allocation14 + $0x1a4] ss:$16 sps:$4 sm:$0xff]   ;;  %v6533_v20 = vld [vmem:[#allocation14 + $0x1ac] ss:$16 sps:$4 sm:$0xff]  }
 0x4f0   :  { %4569 = vmatprep.mubr.bf16.mxu0 %v502_v23  ;;  %4651 = vmatprep.mubr.bf16.mxu1 %v502_v23  ;;  %v6593_v13 = vld [vmem:[#allocation14 + $0x2ec] ss:$16 sps:$4 sm:$0xff]   ;;  %v6596_v16 = vld [vmem:[#allocation14 + $0x304] ss:$16 sps:$4 sm:$0xff]  }
 0x4f1   :  { %4539 = vmatprep.subr.bf16.mxu0 %v6458_v51  ;;  %4621 = vmatprep.subr.bf16.mxu1 %v6461_v22  ;;  %v6528_v51 = vld [vmem:[#allocation14 + $0x1a0] ss:$16 sps:$4 sm:$0xff]   ;;  %v6531_v22 = vld [vmem:[#allocation14 + $0x1a8] ss:$16 sps:$4 sm:$0xff]   ;;  %v434_v23 = vadd.f32 %v7193_v4, %v212_v19 }
 0x4f2   :  { %v6543_v4 = vld [vmem:[#allocation14 + $0x1e8] ss:$16 sps:$4 sm:$0xff]  }
 0x4f3   :  { %4540 = vmatpush1.bf16.msra.mxu0 %v6456_v24  ;;  %4622 = vmatpush1.bf16.msra.mxu1 %v6459_v26  ;;  %v6536_v24 = vld [vmem:[#allocation14 + $0x1c4] ss:$16 sps:$4 sm:$0xff]   ;;  %v6539_v26 = vld [vmem:[#allocation14 + $0x1cc] ss:$16 sps:$4 sm:$0xff]   ;;  %v6597_v19 = vld [vmem:[#allocation14 + $0x308] ss:$16 sps:$4 sm:$0xff]  }
 0x4f4   :  { %4541 = vmatprep.subr.bf16.mxu0 %v6464_v27  ;;  %4623 = vmatprep.subr.bf16.mxu1 %v6467_v28  ;;  %v477_v27 = vadd.f32 %v7199_v15, %v224_v21  ;;  %v6534_v28 = vld [vmem:[#allocation14 + $0x1c0] ss:$16 sps:$4 sm:$0xff]  }
 0x4f5   :  { %v6600_v21 = vld [vmem:[#allocation14 + $0x320] ss:$16 sps:$4 sm:$0xff]  }
 0x4f7   :  { %4542 = vmatpush1.bf16.msra.mxu0 %v6462_v29  ;;  %4624 = vmatpush1.bf16.msra.mxu1 %v6465_v31  ;;  %v6537_v29 = vld [vmem:[#allocation14 + $0x1c8] ss:$16 sps:$4 sm:$0xff]   ;;  %v485_v31 = vmul.f32 0.01, %v434_v23 }
 0x4f8   :  { %4543 = vmatprep.subr.bf16.mxu0 %v6470_v32  ;;  %4625 = vmatprep.subr.bf16.mxu1 %v6473_v34  ;;  %v6542_v32 = vld [vmem:[#allocation14 + $0x1e4] ss:$16 sps:$4 sm:$0xff]   ;;  %v6545_v34 = vld [vmem:[#allocation14 + $0x1ec] ss:$16 sps:$4 sm:$0xff]  }
 0x4fb   :  { %4544 = vmatpush1.bf16.msra.mxu0 %v6468_v35  ;;  %4626 = vmatpush1.bf16.msra.mxu1 %v6471_v36  ;;  %v488_v35 = vmul.f32 0.01, %v477_v27  ;;  %v6540_v36 = vld [vmem:[#allocation14 + $0x1e0] ss:$16 sps:$4 sm:$0xff]  }
 0x4fc   :  { %4545 = vmatprep.subr.bf16.mxu0 %v6476_v37  ;;  %4627 = vmatprep.subr.bf16.mxu1 %v6479_v44  ;;  %v493_v37 = vmax.f32 %v434_v23, %v485_v31  ;;  %v6548_v44 = vld [vmem:[#allocation14 + $0x204] ss:$16 sps:$4 sm:$0xff]   ;;  %v6611_v23 = vld [vmem:[#allocation14 + $0x34c] ss:$16 sps:$4 sm:$0xff]   ;;  %v219_v31 = vsub.s32 6, %v7172_v38 }
 0x4fd   :  { %v496_v15 = vmax.f32 %v477_v27, %v488_v35  ;;  %v6614_v27 = vld [vmem:[#allocation14 + $0x364] ss:$16 sps:$4 sm:$0xff]   ;;  %v6623_v35 = vld [vmem:[#allocation14 + $0x38c] ss:$16 sps:$4 sm:$0xff]  }
 0x4ff   :  { %4546 = vmatpush1.bf16.msra.mxu0 %v6474_v45  ;;  %4628 = vmatpush1.bf16.msra.mxu1 %v6477_v46  ;;  %v6551_v45 = vld [vmem:[#allocation14 + $0x20c] ss:$16 sps:$4 sm:$0xff]   ;;  %v6546_v46 = vld [vmem:[#allocation14 + $0x200] ss:$16 sps:$4 sm:$0xff]  }
 0x500   :  { %4547 = vmatprep.subr.bf16.mxu0 %v6482_v47  ;;  %4629 = vmatprep.subr.bf16.mxu1 %v6485_v48  ;;  %v501_v47 = vpack.c.bf16 %v493_v37, %v493_v37  ;;  %v6549_v48 = vld [vmem:[#allocation14 + $0x208] ss:$16 sps:$4 sm:$0xff]  }
 0x501   :  { %v6621_v37 = vld [vmem:[#allocation14 + $0x388] ss:$16 sps:$4 sm:$0xff]  }
 0x503   :  { %4548 = vmatpush1.bf16.msra.mxu0 %v6480_v50  ;;  %4630 = vmatpush1.bf16.msra.mxu1 %v6483_v53  ;;  %v504_v50 = vpack.c.bf16 %v496_v15, %v496_v15  ;;  %v6554_v53 = vld [vmem:[#allocation14 + $0x224] ss:$16 sps:$4 sm:$0xff]   ;;  %v6624_v15 = vld [vmem:[#allocation14 + $0x3a0] ss:$16 sps:$4 sm:$0xff]  }
 0x504   :  { %4549 = vmatprep.subr.bf16.mxu0 %v6488_v54  ;;  %4631 = vmatprep.subr.bf16.mxu1 %v6491_v55  ;;  %v6557_v54 = vld [vmem:[#allocation14 + $0x22c] ss:$16 sps:$4 sm:$0xff]   ;;  %v6552_v55 = vld [vmem:[#allocation14 + $0x220] ss:$16 sps:$4 sm:$0xff]  }
 0x507   :  { %4550 = vmatpush1.bf16.msra.mxu0 %v6486_v56  ;;  %4632 = vmatpush1.bf16.msra.mxu1 %v6489_v57  ;;  %v6555_v56 = vld [vmem:[#allocation14 + $0x228] ss:$16 sps:$4 sm:$0xff]   ;;  %v6560_v57 = vld [vmem:[#allocation14 + $0x244] ss:$16 sps:$4 sm:$0xff]  }
 0x508   :  { %4551 = vmatprep.subr.bf16.mxu0 %v6494_v58  ;;  %4633 = vmatprep.subr.bf16.mxu1 %v6497_v59  ;;  %v6563_v58 = vld [vmem:[#allocation14 + $0x24c] ss:$16 sps:$4 sm:$0xff]   ;;  %v6558_v59 = vld [vmem:[#allocation14 + $0x240] ss:$16 sps:$4 sm:$0xff]  }
 0x50b   :  { %4552 = vmatpush1.bf16.msra.mxu0 %v6492_v60  ;;  %4634 = vmatpush1.bf16.msra.mxu1 %v6495_v61  ;;  %v6561_v60 = vld [vmem:[#allocation14 + $0x248] ss:$16 sps:$4 sm:$0xff]   ;;  %v6566_v61 = vld [vmem:[#allocation14 + $0x264] ss:$16 sps:$4 sm:$0xff]  }
 0x50c   :  { %4553 = vmatprep.subr.bf16.mxu0 %v6500_v62  ;;  %4635 = vmatprep.subr.bf16.mxu1 %v6503_v63  ;;  %v6569_v62 = vld [vmem:[#allocation14 + $0x26c] ss:$16 sps:$4 sm:$0xff]   ;;  %v6564_v63 = vld [vmem:[#allocation14 + $0x260] ss:$16 sps:$4 sm:$0xff]  }
 0x50f   :  { %4554 = vmatpush1.bf16.msra.mxu0 %v6498_v0  ;;  %4636 = vmatpush1.bf16.msra.mxu1 %v6501_v1  ;;  %v6567_v0 = vld [vmem:[#allocation14 + $0x268] ss:$16 sps:$4 sm:$0xff]   ;;  %v6572_v1 = vld [vmem:[#allocation14 + $0x284] ss:$16 sps:$4 sm:$0xff]  }
 0x510   :  { %4555 = vmatprep.subr.bf16.mxu0 %v6506_v25  ;;  %4637 = vmatprep.subr.bf16.mxu1 %v6509_v2  ;;  %v6575_v25 = vld [vmem:[#allocation14 + $0x28c] ss:$16 sps:$4 sm:$0xff]   ;;  %v6570_v2 = vld [vmem:[#allocation14 + $0x280] ss:$16 sps:$4 sm:$0xff]  }
 0x513   :  { %4556 = vmatpush1.bf16.msra.mxu0 %v6504_v3  ;;  %4638 = vmatpush1.bf16.msra.mxu1 %v6507_v5  ;;  %v6573_v3 = vld [vmem:[#allocation14 + $0x288] ss:$16 sps:$4 sm:$0xff]   ;;  %v6578_v5 = vld [vmem:[#allocation14 + $0x2a4] ss:$16 sps:$4 sm:$0xff]  }
 0x514   :  { %4557 = vmatprep.subr.bf16.mxu0 %v6512_v7  ;;  %4639 = vmatprep.subr.bf16.mxu1 %v6515_v30  ;;  %v6581_v7 = vld [vmem:[#allocation14 + $0x2ac] ss:$16 sps:$4 sm:$0xff]   ;;  %v6576_v30 = vld [vmem:[#allocation14 + $0x2a0] ss:$16 sps:$4 sm:$0xff]  }
 0x517   :  { %4558 = vmatpush1.bf16.msra.mxu0 %v6510_v8  ;;  %4640 = vmatpush1.bf16.msra.mxu1 %v6513_v9  ;;  %v6579_v8 = vld [vmem:[#allocation14 + $0x2a8] ss:$16 sps:$4 sm:$0xff]   ;;  %v6584_v9 = vld [vmem:[#allocation14 + $0x2c4] ss:$16 sps:$4 sm:$0xff]  }
 0x518   :  { %4559 = vmatprep.subr.bf16.mxu0 %v6518_v33  ;;  %4641 = vmatprep.subr.bf16.mxu1 %v6521_v6  ;;  %v6587_v33 = vld [vmem:[#allocation14 + $0x2cc] ss:$16 sps:$4 sm:$0xff]   ;;  %v6582_v6 = vld [vmem:[#allocation14 + $0x2c0] ss:$16 sps:$4 sm:$0xff]  }
 0x51b   :  { %4560 = vmatpush1.bf16.msra.mxu0 %v6516_v10  ;;  %4642 = vmatpush1.bf16.msra.mxu1 %v6519_v12  ;;  %v6585_v10 = vld [vmem:[#allocation14 + $0x2c8] ss:$16 sps:$4 sm:$0xff]   ;;  %v6590_v12 = vld [vmem:[#allocation14 + $0x2e4] ss:$16 sps:$4 sm:$0xff]  }
 0x51c   :  { %4561 = vmatprep.subr.bf16.mxu0 %v6524_v14  ;;  %4643 = vmatprep.subr.bf16.mxu1 %v6527_v43  ;;  %v6588_v14 = vld [vmem:[#allocation14 + $0x2e0] ss:$16 sps:$4 sm:$0xff]   ;;  %v6591_v43 = vld [vmem:[#allocation14 + $0x2e8] ss:$16 sps:$4 sm:$0xff]  }
 0x51f   :  { %4562 = vmatpush1.bf16.msra.mxu0 %v6522_v17  ;;  %4644 = vmatpush1.bf16.msra.mxu1 %v6525_v18  ;;  %v6599_v17 = vld [vmem:[#allocation14 + $0x30c] ss:$16 sps:$4 sm:$0xff]   ;;  %v6594_v18 = vld [vmem:[#allocation14 + $0x300] ss:$16 sps:$4 sm:$0xff]  }
 0x520   :  { %4563 = vmatprep.subr.bf16.mxu0 %v6530_v39  ;;  %4645 = vmatprep.subr.bf16.mxu1 %v6533_v20  ;;  %v6602_v39 = vld [vmem:[#allocation14 + $0x324] ss:$16 sps:$4 sm:$0xff]   ;;  %v6605_v20 = vld [vmem:[#allocation14 + $0x32c] ss:$16 sps:$4 sm:$0xff]  }
 0x523   :  { %4564 = vmatpush1.bf16.msra.mxu0 %v6528_v51  ;;  %4646 = vmatpush1.bf16.msra.mxu1 %v6531_v22  ;;  %v6603_v51 = vld [vmem:[#allocation14 + $0x328] ss:$16 sps:$4 sm:$0xff]   ;;  %v6608_v22 = vld [vmem:[#allocation14 + $0x344] ss:$16 sps:$4 sm:$0xff]  }
 0x524   :  { %4565 = vmatprep.subr.bf16.mxu0 %v6536_v24  ;;  %4647 = vmatprep.subr.bf16.mxu1 %v6539_v26  ;;  %v6606_v24 = vld [vmem:[#allocation14 + $0x340] ss:$16 sps:$4 sm:$0xff]   ;;  %v6609_v26 = vld [vmem:[#allocation14 + $0x348] ss:$16 sps:$4 sm:$0xff]  }
 0x527   :  { %4566 = vmatpush1.bf16.msra.mxu0 %v6534_v28  ;;  %4648 = vmatpush1.bf16.msra.mxu1 %v6537_v29  ;;  %v6617_v28 = vld [vmem:[#allocation14 + $0x36c] ss:$16 sps:$4 sm:$0xff]   ;;  %v6612_v29 = vld [vmem:[#allocation14 + $0x360] ss:$16 sps:$4 sm:$0xff]  }
 0x528   :  { %4567 = vmatprep.subr.bf16.mxu0 %v6542_v32  ;;  %4649 = vmatprep.subr.bf16.mxu1 %v6545_v34  ;;  %v6615_v32 = vld [vmem:[#allocation14 + $0x368] ss:$16 sps:$4 sm:$0xff]   ;;  %v6620_v34 = vld [vmem:[#allocation14 + $0x384] ss:$16 sps:$4 sm:$0xff]  }
 0x52b   :  { %4568 = vmatpush1.bf16.msra.mxu0 %v6540_v36  ;;  %4650 = vmatpush1.bf16.msra.mxu1 %v6543_v4  ;;  %v6618_v36 = vld [vmem:[#allocation14 + $0x380] ss:$16 sps:$4 sm:$0xff]   ;;  %v220_v4 = vrot.slane %v7240_v52, %v219_v31  ;;  %v6633_v52 = vld [vmem:[#allocation14 + $0x3c8] ss:$16 sps:$4 sm:$0xff]  }
 0x52c   :  { %4578 = vmatprep.subr.bf16.mxu0 %v6548_v44  ;;  %4660 = vmatprep.subr.bf16.mxu1 %v6551_v45  ;;  %v6626_v44 = vld [vmem:[#allocation14 + $0x3a4] ss:$16 sps:$4 sm:$0xff]   ;;  %v6629_v45 = vld [vmem:[#allocation14 + $0x3ac] ss:$16 sps:$4 sm:$0xff]  }
 0x52d   :  { %v475_v38 = vadd.f32 %v7197_v11, %v220_v4  ;;  %v6639_v11 = vld [vmem:[#allocation14 + $0x3e8] ss:$16 sps:$4 sm:$0xff]   ;;  %v6668_v31 = vld [vmem:[#allocation16 + $0x30] sm:$0xff]  }
 0x52e   :  { %4570 = vmatmul.mubr.bf16.vlgmr.msra.gmra.mrb[24].mxu0 %v501_v47  ;;  %4652 = vmatmul.mubr.bf16.vlgmr.msra.gmra.mrb[24].mxu1 %v501_v47  ;;  %v6632_v47 = vld [vmem:[#allocation14 + $0x3c4] ss:$16 sps:$4 sm:$0xff]   ;;  %v6671_v4 = vld [vmem:[#allocation16 + $0xf8] sm:$0xff]  }
 0x52f   :  { %4579 = vmatpush1.bf16.msra.mxu0 %v6546_v46  ;;  %4610 = vmatprep.mubr.bf16.mxu0 %v504_v50  ;;  %v6627_v46 = vld [vmem:[#allocation14 + $0x3a8] ss:$16 sps:$4 sm:$0xff]  }
 0x530   :  { %4661 = vmatpush1.bf16.msra.mxu1 %v6549_v48  ;;  %4692 = vmatprep.mubr.bf16.mxu1 %v504_v50  ;;  %v6635_v48 = vld [vmem:[#allocation14 + $0x3cc] ss:$16 sps:$4 sm:$0xff]   ;;  %v6630_v50 = vld [vmem:[#allocation14 + $0x3c0] ss:$16 sps:$4 sm:$0xff]  }
 0x531   :  { %4580 = vmatprep.subr.bf16.mxu0 %v6554_v53  ;;  %4662 = vmatprep.subr.bf16.mxu1 %v6557_v54  ;;  %v487_v53 = vmul.f32 0.01, %v475_v38  ;;  %v6638_v54 = vld [vmem:[#allocation14 + $0x3e4] ss:$16 sps:$4 sm:$0xff]  }
 0x533   :  { %4581 = vmatpush1.bf16.msra.mxu0 %v6552_v55  ;;  %v6641_v55 = vld [vmem:[#allocation14 + $0x3ec] ss:$16 sps:$4 sm:$0xff]  }
 0x534   :  { %4663 = vmatpush1.bf16.msra.mxu1 %v6555_v56  ;;  %4582 = vmatprep.subr.bf16.mxu0 %v6560_v57  ;;  %v6636_v56 = vld [vmem:[#allocation14 + $0x3e0] ss:$16 sps:$4 sm:$0xff]   ;;  %v495_v57 = vmax.f32 %v475_v38, %v487_v53 }
 0x535   :  { %4664 = vmatprep.subr.bf16.mxu1 %v6563_v58  ;;  %v6642_v58 = vld [vmem:[#allocation16 + $0x40] sm:$0xff]  }
 0x537   :  { %4583 = vmatpush1.bf16.msra.mxu0 %v6558_v59  ;;  %v6643_v59 = vld [vmem:[#allocation16 + $0xc0] sm:$0xff]  }
 0x538   :  { %4665 = vmatpush1.bf16.msra.mxu1 %v6561_v60  ;;  %4584 = vmatprep.subr.bf16.mxu0 %v6566_v61  ;;  %v6644_v60 = vld [vmem:[#allocation16] sm:$0xff]   ;;  %v503_v61 = vpack.c.bf16 %v495_v57, %v495_v57 }
 0x539   :  { %4666 = vmatprep.subr.bf16.mxu1 %v6569_v62  ;;  %v6645_v62 = vld [vmem:[#allocation16 + $0x80] sm:$0xff]  }
 0x53b   :  { %4585 = vmatpush1.bf16.msra.mxu0 %v6564_v63  ;;  %v6646_v63 = vld [vmem:[#allocation16 + $0x48] sm:$0xff]  }
 0x53c   :  { %4667 = vmatpush1.bf16.msra.mxu1 %v6567_v0  ;;  %4586 = vmatprep.subr.bf16.mxu0 %v6572_v1  ;;  %v6647_v0 = vld [vmem:[#allocation16 + $0xc8] sm:$0xff]  }
 0x53d   :  { %4668 = vmatprep.subr.bf16.mxu1 %v6575_v25  ;;  %v6648_v1 = vld [vmem:[#allocation16 + $0x8] sm:$0xff]  }
 0x53e   :  { %v6649_v25 = vld [vmem:[#allocation16 + $0x88] sm:$0xff]  }
 0x53f   :  { %4587 = vmatpush1.bf16.msra.mxu0 %v6570_v2  ;;  %v6650_v2 = vld [vmem:[#allocation16 + $0x50] sm:$0xff]  }
 0x540   :  { %4669 = vmatpush1.bf16.msra.mxu1 %v6573_v3  ;;  %4588 = vmatprep.subr.bf16.mxu0 %v6578_v5  ;;  %v6651_v3 = vld [vmem:[#allocation16 + $0xd0] sm:$0xff]  }
 0x541   :  { %4670 = vmatprep.subr.bf16.mxu1 %v6581_v7  ;;  %v6652_v5 = vld [vmem:[#allocation16 + $0x10] sm:$0xff]  }
 0x542   :  { %v6653_v7 = vld [vmem:[#allocation16 + $0x90] sm:$0xff]  }
 0x543   :  { %4589 = vmatpush1.bf16.msra.mxu0 %v6576_v30  ;;  %v6654_v30 = vld [vmem:[#allocation16 + $0x58] sm:$0xff]  }
 0x544   :  { %4671 = vmatpush1.bf16.msra.mxu1 %v6579_v8  ;;  %4590 = vmatprep.subr.bf16.mxu0 %v6584_v9  ;;  %v6655_v8 = vld [vmem:[#allocation16 + $0xd8] sm:$0xff]  }
 0x545   :  { %4672 = vmatprep.subr.bf16.mxu1 %v6587_v33  ;;  %v6656_v9 = vld [vmem:[#allocation16 + $0x18] sm:$0xff]  }
 0x546   :  { %v6657_v33 = vld [vmem:[#allocation16 + $0x98] sm:$0xff]  }
 0x547   :  { %4591 = vmatpush1.bf16.msra.mxu0 %v6582_v6  ;;  %v6658_v6 = vld [vmem:[#allocation16 + $0x60] sm:$0xff]  }
 0x548   :  { %4673 = vmatpush1.bf16.msra.mxu1 %v6585_v10  ;;  %4592 = vmatprep.subr.bf16.mxu0 %v6590_v12  ;;  %v6659_v10 = vld [vmem:[#allocation16 + $0xe0] sm:$0xff]  }
 0x549   :  { %4674 = vmatprep.subr.bf16.mxu1 %v6593_v13  ;;  %v6660_v12 = vld [vmem:[#allocation16 + $0x20] sm:$0xff]  }
 0x54a   :  { %v6661_v13 = vld [vmem:[#allocation16 + $0xa0] sm:$0xff]  }
 0x54b   :  { %4593 = vmatpush1.bf16.msra.mxu0 %v6588_v14  ;;  %v6662_v14 = vld [vmem:[#allocation16 + $0x68] sm:$0xff]  }
 0x54c   :  { %4675 = vmatpush1.bf16.msra.mxu1 %v6591_v43  ;;  %4594 = vmatprep.subr.bf16.mxu0 %v6596_v16  ;;  %v6663_v43 = vld [vmem:[#allocation16 + $0xe8] sm:$0xff]  }
 0x54d   :  { %4676 = vmatprep.subr.bf16.mxu1 %v6599_v17  ;;  %v6664_v16 = vld [vmem:[#allocation16 + $0x28] sm:$0xff]  }
 0x54e   :  { %v6665_v17 = vld [vmem:[#allocation16 + $0xa8] sm:$0xff]  }
 0x54f   :  { %4595 = vmatpush1.bf16.msra.mxu0 %v6594_v18 }
 0x550   :  { %4677 = vmatpush1.bf16.msra.mxu1 %v6597_v19  ;;  %4596 = vmatprep.subr.bf16.mxu0 %v6602_v39  ;;  %v5494_v39 = vld [vmem:[%s7307_s10] ss:$0 sm:$0xff] }
 0x551   :  { %4678 = vmatprep.subr.bf16.mxu1 %v6605_v20 }
 0x553   :  { %4597 = vmatpush1.bf16.msra.mxu0 %v6600_v21 }
 0x554   :  { %4679 = vmatpush1.bf16.msra.mxu1 %v6603_v51  ;;  %4598 = vmatprep.subr.bf16.mxu0 %v6608_v22 }
 0x555   :  { %4680 = vmatprep.subr.bf16.mxu1 %v6611_v23 }
 0x557   :  { %4599 = vmatpush1.bf16.msra.mxu0 %v6606_v24 }
 0x558   :  { %4681 = vmatpush1.bf16.msra.mxu1 %v6609_v26  ;;  %4600 = vmatprep.subr.bf16.mxu0 %v6614_v27  ;;  %v6666_v26 = vld [vmem:[#allocation16 + $0x70] sm:$0xff]  }
 0x559   :  { %4682 = vmatprep.subr.bf16.mxu1 %v6617_v28  ;;  %v6667_v27 = vld [vmem:[#allocation16 + $0xf0] sm:$0xff]  }
 0x55b   :  { %4601 = vmatpush1.bf16.msra.mxu0 %v6612_v29 }
 0x55c   :  { %4683 = vmatpush1.bf16.msra.mxu1 %v6615_v32  ;;  %4602 = vmatprep.subr.bf16.mxu0 %v6620_v34  ;;  %v6669_v32 = vld [vmem:[#allocation16 + $0xb0] sm:$0xff]  }
 0x55d   :  { %4684 = vmatprep.subr.bf16.mxu1 %v6623_v35 }
 0x55f   :  { %4603 = vmatpush1.bf16.msra.mxu0 %v6618_v36  ;;  %v6670_v36 = vld [vmem:[#allocation16 + $0x78] sm:$0xff]  }
 0x560   :  { %4685 = vmatpush1.bf16.msra.mxu1 %v6621_v37  ;;  %4604 = vmatprep.subr.bf16.mxu0 %v6626_v44  ;;  %v6672_v37 = vld [vmem:[#allocation16 + $0x38] sm:$0xff]  }
 0x561   :  { %4686 = vmatprep.subr.bf16.mxu1 %v6629_v45  ;;  %v6673_v44 = vld [vmem:[#allocation16 + $0xb8] sm:$0xff]   ;;  %v3875_v45 = vld [vmem:[%s7309_s12] sm:$0xf]  ;;  %s6947_s12 = smov [#allocation17]  }
 0x562   :  { %v3888_v38 = vrot.slane %v3875_v45, %v7202_v49  ;;  %s5063_s28 = sshll.u32 %s6947_s12, 4  ;;  %s5064_s28 = int_to_ptr.vmem [resolvable:$true] %s5063_s28 }
 0x563   :  { %4605 = vmatpush1.bf16.msra.mxu0 %v6624_v15  ;;  %v3880_v15 = vrot.slane %v3875_v45, %v7177_v40  ;;  %s6873_s5 = scalar_lea.vmem %s5064_s28, 128  ;;  %p6878_p3 = scmp.lt.s32.totalorder %s5064_s28, %s5064_s28 }
 0x564   :  { %4687 = vmatpush1.bf16.msra.mxu1 %v6627_v46  ;;  %4606 = vmatprep.subr.bf16.mxu0 %v6632_v47  ;;  %v3884_v46 = vrot.slane %v3875_v45, %v7180_v41  ;;  %v3892_v47 = vrot.slane %v3875_v45, %v7183_v42  ;;  %p6874_p2 = scmp.ne.s32.totalorder %s5064_s28, %s6873_s5  ;;  %p6879_p4 = scmp.lt.s32.totalorder %s6873_s5, %s6873_s5 }
 0x565   :  { %4688 = vmatprep.subr.bf16.mxu1 %v6635_v48 }
 0x566   :  { %p6880_p5 = por %p6879_p4, %p6878_p3 }
 0x567   :  { %4607 = vmatpush1.bf16.msra.mxu0 %v6630_v50 }
 0x568   :  { %4689 = vmatpush1.bf16.msra.mxu1 %v6633_v52  ;;  %4608 = vmatprep.subr.bf16.mxu0 %v6638_v54  ;;  %p6881_p6 = pnand %p6880_p5, %p6874_p2 }
 0x569   :  { %4690 = vmatprep.subr.bf16.mxu1 %v6641_v55 }
 0x56b   :  { %4609 = vmatpush1.bf16.msra.mxu0 %v6636_v56 }
 0x56c   :  { %4691 = vmatpush1.bf16.msra.mxu1 %v6639_v11  ;;  %5732 = vmatprep.subr.bf16.mxu0 %v6642_v58 }
 0x56d   :  { %5754 = vmatprep.subr.bf16.mxu1 %v6643_v59 }
 0x56e   :  { %4611 = vmatmul.mubr.bf16.vlgmr.msra.gmra.mrb[24].mxu0 %v503_v61 }
 0x56f   :  { %4693 = vmatmul.mubr.bf16.vlgmr.msra.gmra.mrb[24].mxu1 %v503_v61  ;;  %5733 = vmatpush3.bf16.msra.mxu0 %v6644_v60 }
 0x570   :  { %5755 = vmatpush3.bf16.msra.mxu1 %v6645_v62  ;;  %5734 = vmatprep.subr.bf16.mxu0 %v6646_v63 }
 0x571   :  { %5756 = vmatprep.subr.bf16.mxu1 %v6647_v0 }
 0x573   :  { %5735 = vmatpush3.bf16.msra.mxu0 %v6648_v1 }
 0x574   :  { %5757 = vmatpush3.bf16.msra.mxu1 %v6649_v25  ;;  %5736 = vmatprep.subr.bf16.mxu0 %v6650_v2 }
 0x575   :  { %5758 = vmatprep.subr.bf16.mxu1 %v6651_v3 }
 0x577   :  { %5737 = vmatpush3.bf16.msra.mxu0 %v6652_v5 }
 0x578   :  { %5759 = vmatpush3.bf16.msra.mxu1 %v6653_v7  ;;  %5738 = vmatprep.subr.bf16.mxu0 %v6654_v30 }
 0x579   :  { %5760 = vmatprep.subr.bf16.mxu1 %v6655_v8 }
 0x57b   :  { %5739 = vmatpush3.bf16.msra.mxu0 %v6656_v9 }
 0x57c   :  { %5761 = vmatpush3.bf16.msra.mxu1 %v6657_v33  ;;  %5740 = vmatprep.subr.bf16.mxu0 %v6658_v6 }
 0x57d   :  { %5762 = vmatprep.subr.bf16.mxu1 %v6659_v10 }
 0x57f   :  { %5741 = vmatpush3.bf16.msra.mxu0 %v6660_v12 }
 0x580   :  { %5763 = vmatpush3.bf16.msra.mxu1 %v6661_v13  ;;  %5742 = vmatprep.subr.bf16.mxu0 %v6662_v14 }
 0x581   :  { %5764 = vmatprep.subr.bf16.mxu1 %v6663_v43 }
 0x583   :  { %5743 = vmatpush3.bf16.msra.mxu0 %v6664_v16 }
 0x584   :  { %5765 = vmatpush3.bf16.msra.mxu1 %v6665_v17  ;;  %5744 = vmatprep.subr.bf16.mxu0 %v6666_v26 }
 0x585   :  { %5766 = vmatprep.subr.bf16.mxu1 %v6667_v27 }
 0x587   :  { %5745 = vmatpush3.bf16.msra.mxu0 %v6668_v31 }
 0x588   :  { %5767 = vmatpush3.bf16.msra.mxu1 %v6669_v32  ;;  %5746 = vmatprep.subr.bf16.mxu0 %v6670_v36 }
 0x589   :  { %5768 = vmatprep.subr.bf16.mxu1 %v6671_v4 }
 0x58b   :  { %5747 = vmatpush3.bf16.msra.mxu0 %v6672_v37 }
 0x58c   :  { %5769 = vmatpush3.bf16.msra.mxu1 %v6673_v44 }
 0x5c1   :  { %v5704_v18 = vpop.f32.mrb[20].mxu0  ;;  %v5726_v19 = vpop.f32.mrb[20].mxu1 }
 0x5c2   :  { %v5705_v20 = vpop.f32.mrb[21].mxu0  ;;  %v5727_v21 = vpop.f32.mrb[21].mxu1 }
 0x5c3   :  { %v5706_v51 = vadd.f32 %v5705_v20, %v5704_v18  ;;  %v5728_v22 = vadd.f32 %v5727_v21, %v5726_v19  ;;  %v5707_v23 = vpop.f32.mrb[22].mxu0  ;;  %v5729_v24 = vpop.f32.mrb[22].mxu1 }
 0x5c4   :  { %v5708_v28 = vpop.f32.mrb[23].mxu0  ;;  %v5730_v29 = vpop.f32.mrb[23].mxu1 }
 0x5c5   :  { %v3701_v34 = vadd.f32 %v5706_v51, %v5494_v39 }
 0x5c7   :  { %v3741_v35 = vadd.f32 %v5728_v22, %v3701_v34 }
 0x5c9   :  { %3746 = vst [vmem:[#allocation17] sm:$0xff] %v3741_v35 }
 0x641   :  { %v4612_v48 = vpop.f32.mrb[24].mxu0 }
 0x642   :  { %v5788_v50 = vadd.f32 %v4612_v48, %v3880_v15  ;;  %v4694_v53 = vpop.f32.mrb[24].mxu1  ;;  %v4614_v52 = vpop.f32.mrb[25].mxu0 }
 0x643   :  { %v5790_v54 = vadd.f32 %v4694_v53, %v3888_v38  ;;  %v5789_v55 = vadd.f32 %v4614_v52, %v3884_v46  ;;  %v4696_v56 = vpop.f32.mrb[25].mxu1  ;;  %v4616_v57 = vpop.f32.mrb[26].mxu0 }
 0x644   :  { %v4701_v11 = vmul.f32 0.01, %v5788_v50  ;;  %v5791_v58 = vadd.f32 %v4696_v56, %v3892_v47  ;;  %v4698_v59 = vpop.f32.mrb[26].mxu1  ;;  %v4617_v60 = vpop.f32.mrb[27].mxu0 }
 0x645   :  { %v4703_v61 = vmul.f32 0.01, %v5790_v54  ;;  %v4702_v40 = vmul.f32 0.01, %v5789_v55  ;;  %v4699_v62 = vpop.f32.mrb[27].mxu1 }
 0x646   :  { %v4705_v49 = vmax.f32 %v5788_v50, %v4701_v11  ;;  %v4704_v63 = vmul.f32 0.01, %v5791_v58 }
 0x647   :  { %v4707_v41 = vmax.f32 %v5790_v54, %v4703_v61  ;;  %v4706_v0 = vmax.f32 %v5789_v55, %v4702_v40 }
 0x648   :  { %v4708_v42 = vmax.f32 %v5791_v58, %v4704_v63  ;;  %v4709_v25 = vpack.c.bf16 %v4705_v49, %v4705_v49 }
 0x649   :  { %v4710_v1 = vpack.c.bf16 %v4706_v0, %v4706_v0  ;;  %v4711_v3 = vpack.c.bf16 %v4707_v41, %v4707_v41 }
 0x64a   :  { %v4712_v2 = vpack.c.bf16 %v4708_v42, %v4708_v42 }
 0x64b   :  { %5008 = vmatprep.mubr.bf16.mxu0 %v4710_v1 }
 0x64c   :  { %5048 = vmatprep.mubr.bf16.mxu1 %v4712_v2  ;;  %5009 = vmatmul.mubr.bf16.vlgmr.msra.gmra.mrb[28].mxu0 %v4709_v25 }
 0x64d   :  { %5049 = vmatmul.mubr.bf16.vlgmr.msra.gmra.mrb[28].mxu1 %v4711_v3 }
 0x64e   :  { %6884 = shalt.err (!%p6881_p6)
}
 0x64f   :  { %s6885_s26 = scalar_lea.hbm %s7312_s15, 128 }
 0x650   :  { %p6886_p7 = scmp.ne.s32.totalorder %s7312_s15, %s6885_s26  ;;  %p6889_p8 = scmp.lt.u32.totalorder %s6885_s26, %s7312_s15 }
 0x652   :  { %p6891_p9 = pnand %p6889_p8, %p6886_p7 }
 0x654   :  { %6894 = shalt.err (!%p6891_p9)
}
 0x655   :  { %5066 = dma.vmem_to_hbm [thread:$0]  %s5064_s28, 128, %s7312_s15, [#allocation4]   ;;  %v5655_v30 = vld [vmem:[%s7311_s14] ss:$0 sm:$0xff] }
 0x656   :  { %s6948_s20 = smov [#allocation18]  }
 0x657   :  { %s5073_s24 = sshll.u32 %s6948_s20, 4  ;;  %s5074_s24 = int_to_ptr.vmem [resolvable:$true] %s5073_s24 }
 0x658   :  { %s6895_s15 = scalar_lea.vmem %s5074_s24, 128  ;;  %p6900_p11 = scmp.lt.s32.totalorder %s5074_s24, %s5074_s24 }
 0x659   :  { %p6896_p10 = scmp.ne.s32.totalorder %s5074_s24, %s6895_s15  ;;  %p6901_p12 = scmp.lt.s32.totalorder %s6895_s15, %s6895_s15 }
 0x65b   :  { %p6902_p13 = por %p6901_p12, %p6900_p11 }
 0x65d   :  { %p6903_p0 = pnand %p6902_p13, %p6896_p10 }
 0x71f   :  { %v5748_v5 = vpop.f32.mrb[28].mxu0 }
 0x720   :  { %v5770_v7 = vpop.f32.mrb[28].mxu1  ;;  %v5749_v8 = vpop.f32.mrb[29].mxu0 }
 0x721   :  { %v5750_v9 = vadd.f32 %v5749_v8, %v5748_v5  ;;  %v5771_v33 = vpop.f32.mrb[29].mxu1  ;;  %v5751_v6 = vpop.f32.mrb[30].mxu0 }
 0x722   :  { %v5772_v10 = vadd.f32 %v5771_v33, %v5770_v7  ;;  %v5773_v12 = vpop.f32.mrb[30].mxu1  ;;  %v5752_v13 = vpop.f32.mrb[31].mxu0 }
 0x723   :  { %v5011_v14 = vadd.f32 %v5750_v9, %v5655_v30  ;;  %v5774_v43 = vpop.f32.mrb[31].mxu1 }
 0x725   :  { %v5051_v16 = vadd.f32 %v5772_v10, %v5011_v14 }
 0x727   :  { %5056 = vst [vmem:[#allocation18] sm:$0xff] %v5051_v16 }
 0x728   :  { %6906 = shalt.err (!%p6903_p0)
}
 0x729   :  { %s6907_s11 = scalar_lea.hbm %s7313_s16, 128 }
 0x72a   :  { %p6908_p1 = scmp.ne.s32.totalorder %s7313_s16, %s6907_s11  ;;  %p6911_p2 = scmp.lt.u32.totalorder %s6907_s11, %s7313_s16 }
 0x72c   :  { %p6913_p3 = pnand %p6911_p2, %p6908_p1 }
 0x72e   :  { %6916 = shalt.err (!%p6913_p3)
}
 0x72f   :  { %5076 = dma.vmem_to_hbm [thread:$0]  %s5074_s24, 128, %s7313_s16, [#allocation19]  }
 0x730   :  { %6927 = dma.done.wait [#allocation4], 128  }
 0x731   :  { %6928 = vsyncadd [#allocation4], 4294967168 }
 0x732   :  { %6929 = dma.done.wait [#allocation19], 128  }
 0x733   :  { %6930 = vsyncadd [#allocation19], 4294967168 }
 0x734   :  { %5083 = vsyncpa [#allocation3], 1 }
 0x735   :  { %5084 = vsyncpa [#allocation6], 1 }
 0x736   :  { %5085 = vsyncpa [#allocation9], 1 }
 0x737   :  { %5086 = vsyncpa [#allocation12], 1 }
 0x738   :  { %5087 = vsyncpa [#allocation15], 1 }
 0x739   :  { %5088 = vsyncpa [#allocation4], 1 }
 0x73a   :  { %5089 = vsyncpa [#allocation19], 1 }

</bundles_post_ra>
